<compile_context>
chip_gen: v7x
topology: tpu7x:2x2x1
jax: 0.10.0
libtpu: 0.0.40
codegen_flags: <defaults>
</compile_context>

<pallas_src>
import jax
import jax.numpy as jnp
from jax.experimental import pallas as pl
from jax.experimental.pallas import tpu as pltpu


# ------------------------------ Pallas kernel ------------------------------ #

def _outconv_kernel(x_ref, w_ref, b_ref, o_ref):
    # x_ref: (N, Cin, ts)   activation block, spatial on the lane axis
    # w_ref: (Cout, Cin)    full weight, VMEM-resident (constant block index)
    # b_ref: (Cout, 1)      bias column, broadcast across batch and lanes
    # o_ref: (N, Cout, ts)  output block (NCHW layout, spatial on lanes)
    y = jnp.einsum(
        "oc,ncs->nos", w_ref[...], x_ref[...],
        preferred_element_type=jnp.float32,
        precision=jax.lax.Precision.HIGHEST,
    )                                                     # (N, Cout, ts) f32
    o_ref[...] = (y + b_ref[...].astype(jnp.float32)).astype(o_ref.dtype)


# ------------------------------ tile selection ------------------------------ #

def _pick_spatial_tile(hw, n, cin, cout, x_bytes, out_bytes,
                       vmem_budget=24 << 20, max_lanes=1024):
    """Pick a lane-tile size (multiple of 128) and the resulting grid length.

    - Large tiles (512-1024 lanes) for HBM-roofline efficiency.
    - >=2 grid steps whenever hw > 128 so dual-TC v7x shards across cores
      (extra ~0.35us step is negligible on single-TC v5e/v6e).
    - Double-buffered footprint of the x + out blocks is kept inside a
      conservative budget (well under v7x's 32 MiB scoped-VMEM default).
    """
    if hw <= 128:
        return hw, 1                       # full-extent block, single step
    padded = pl.cdiv(hw, 128) * 128
    ts = min(max_lanes, padded)
    if pl.cdiv(hw, ts) < 2:                # keep >=2 parallel steps for v7x
        ts = max(128, pl.cdiv(pl.cdiv(hw, 2), 128) * 128)
    while ts > 128:                        # shrink until VMEM budget is met
        footprint = (2 * n * ts * (cin * x_bytes + cout * out_bytes)
                     + cout * cin * 4 + cout * 4)
        if footprint <= vmem_budget:
            break
        ts -= 128
    # TODO(synk): if N*Cin is ever so large that a 128-lane block still blows
    # the budget, additionally tile the batch axis.
    return ts, pl.cdiv(hw, ts)


# --------------------------------- wrapper --------------------------------- #

def outconv(x_nchw, weight, bias):
    """PyTorch OutConv.forward: 1x1 Conv2d, stride 1, no padding.

    x_nchw : (N, Cin, H, W)        input in its native dtype (NCHW)
    weight : (Cout, Cin, 1, 1) or (Cout, Cin)
    bias   : (Cout,)
    returns: (N, Cout, H, W) in x's dtype
    """
    n, cin, h, w = x_nchw.shape
    cout = weight.shape[0]
    hw = h * w
    out_dtype = x_nchw.dtype

    x3 = x_nchw.reshape(n, cin, hw)        # free view, NO dtype cast
    w2 = weight.reshape(cout, cin)
    b2 = bias.reshape(cout, 1)

    x_bytes = jnp.dtype(x_nchw.dtype).itemsize
    o_bytes = jnp.dtype(out_dtype).itemsize
    ts, n_tiles = _pick_spatial_tile(hw, n, cin, cout, x_bytes, o_bytes)

    cost = pl.CostEstimate(
        flops=2 * n * cout * cin * hw,
        transcendentals=0,
        bytes_accessed=(n * cin * hw * x_bytes
                        + cout * cin * jnp.dtype(w2.dtype).itemsize
                        + cout * jnp.dtype(b2.dtype).itemsize
                        + n * cout * hw * o_bytes),
    )

    out = pl.pallas_call(
        _outconv_kernel,
        out_shape=jax.ShapeDtypeStruct((n, cout, hw), out_dtype),
        grid_spec=pltpu.PrefetchScalarGridSpec(
            num_scalar_prefetch=0,
            grid=(n_tiles,),
            in_specs=[
                # activation block: all batches, all Cin rows, ts spatial lanes
                pl.BlockSpec((n, cin, ts), lambda s: (0, 0, s)),
                # weight / bias: constant block index -> fetched once
                pl.BlockSpec((cout, cin), lambda s: (0, 0)),
                pl.BlockSpec((cout, 1), lambda s: (0, 0)),
            ],
            out_specs=pl.BlockSpec((n, cout, ts), lambda s: (0, 0, s)),
        ),
        compiler_params=pltpu.CompilerParams(
            dimension_semantics=("parallel",)),
        cost_estimate=cost,
    )(x3, w2, b2)
    return out.reshape(n, cout, h, w)


# ----------------------------------- demo ----------------------------------- #

if __name__ == "__main__":
    key = jax.random.PRNGKey(0)
    k_x, k_w, k_b = jax.random.split(key, 3)

    # Shapes consistent with how TacNet uses OutConv: 64 feature channels,
    # 3 output (force) channels, small spatial map, batch of 2.
    # hw = 672 -> ts = 384, 2 grid steps (exercises the ragged last tile).
    N, Cin, H, W, Cout = 2, 64, 24, 28, 3
    x = jax.random.normal(k_x, (N, Cin, H, W), jnp.float32)
    weight = jax.random.normal(k_w, (Cout, Cin, 1, 1), jnp.float32) / jnp.sqrt(Cin)
    bias = 0.5 * jax.random.normal(k_b, (Cout,), jnp.float32)

    y = jax.jit(outconv)(x, weight, bias)
    y = jax.block_until_ready(y)
    assert y.shape == (N, Cout, H, W), y.shape
    assert y.dtype == x.dtype, y.dtype

    # Pure-JAX reference for the 1x1 conv (same eval-mode semantics).
    y_ref = (jnp.einsum("nchw,oc->nohw", x, weight.reshape(Cout, Cin),
                        precision=jax.lax.Precision.HIGHEST)
             + bias[None, :, None, None])
    assert jnp.allclose(y, y_ref, atol=1e-4, rtol=1e-4), \
        float(jnp.max(jnp.abs(y - y_ref)))

    print("KERNEL_OK")
</pallas_src>

<mosaic_0001>
module attributes {stable_mosaic.version = 11 : i64} {
  func.func @_outconv_kernel(%arg0: i32, %arg1: memref<2x64x384xf32, #tpu.memory_space<vmem>>, %arg2: memref<3x64xf32, #tpu.memory_space<vmem>>, %arg3: memref<3x1xf32, #tpu.memory_space<vmem>>, %arg4: memref<2x3x384xf32, #tpu.memory_space<vmem>>) attributes {dimension_semantics = [#tpu.dimension_semantics<parallel>], iteration_bounds = array<i64: 2>, scalar_prefetch = 0 : i64, scratch_operands = 0 : i64, tpu.core_type = #tpu.core_type<tc>, window_params = [{transform_indices = @transform_0, window_bounds = array<i64: 2, 64, 384>}, {pipeline_mode = #tpu.pipeline_mode<synchronous>, transform_indices = @transform_1, window_bounds = array<i64: 3, 64>}, {pipeline_mode = #tpu.pipeline_mode<synchronous>, transform_indices = @transform_2, window_bounds = array<i64: 3, 1>}, {transform_indices = @transform_3, window_bounds = array<i64: 2, 3, 384>}]} {
    %c0 = arith.constant 0 : index
    %c0_0 = arith.constant 0 : index
    %0 = vector.load %arg2[%c0, %c0_0] : memref<3x64xf32, #tpu.memory_space<vmem>>, vector<3x64xf32>
    %c0_1 = arith.constant 0 : index
    %c0_2 = arith.constant 0 : index
    %c0_3 = arith.constant 0 : index
    %1 = vector.load %arg1[%c0_1, %c0_2, %c0_3] : memref<2x64x384xf32, #tpu.memory_space<vmem>>, vector<2x64x384xf32>
    "tpu.trace_start"() <{level = 10 : i32, message = "oc,ncs->nos"}> : () -> ()
    %cst = arith.constant dense<0.000000e+00> : vector<2x384x3xf32>
    %2 = tpu.matmul %1, %0, %cst {dimension_numbers = #tpu.dot_dimension_numbers<[1], [1], [0, 2], [0], [0, 0, 0, 2, 1, 0], [], []>, precision = #tpu.contract_precision<fp32>} : vector<2x64x384xf32>, vector<3x64xf32>, vector<2x384x3xf32> -> vector<2x384x3xf32>
    %3 = tpu.transpose %2, [0, 2, 1] : vector<2x384x3xf32> -> vector<2x3x384xf32>
    "tpu.trace_stop"() : () -> ()
    %c0_4 = arith.constant 0 : index
    %c0_5 = arith.constant 0 : index
    %4 = vector.load %arg3[%c0_4, %c0_5] : memref<3x1xf32, #tpu.memory_space<vmem>>, vector<3x1xf32>
    %5 = vector.shape_cast %4 : vector<3x1xf32> to vector<1x3x1xf32>
    %6 = vector.broadcast %5 : vector<1x3x1xf32> to vector<2x3x384xf32>
    %7 = arith.addf %3, %6 : vector<2x3x384xf32>
    %c0_6 = arith.constant 0 : index
    %c0_7 = arith.constant 0 : index
    %c0_8 = arith.constant 0 : index
    %8 = vector.load %arg4[%c0_6, %c0_7, %c0_8] : memref<2x3x384xf32, #tpu.memory_space<vmem>>, vector<2x3x384xf32>
    tpu.vector_store %arg4[%c0_6, %c0_7, %c0_8], %7 {strides = array<i32>} : memref<2x3x384xf32, #tpu.memory_space<vmem>>, vector<2x3x384xf32>,
    return
  }
  func.func @transform_0(%arg0: i32) -> (i32, i32, i32) {
    %c0_i32 = arith.constant 0 : i32
    %c0_i32_0 = arith.constant 0 : i32
    %c0_i32_1 = arith.constant 0 : i32
    return %c0_i32, %c0_i32_0, %arg0 : i32, i32, i32
  }
  func.func @transform_1(%arg0: i32) -> (i32, i32) {
    %c0_i32 = arith.constant 0 : i32
    %c0_i32_0 = arith.constant 0 : i32
    %c0_i32_1 = arith.constant 0 : i32
    return %c0_i32, %c0_i32_0 : i32, i32
  }
  func.func @transform_2(%arg0: i32) -> (i32, i32) {
    %c0_i32 = arith.constant 0 : i32
    %c0_i32_0 = arith.constant 0 : i32
    %c0_i32_1 = arith.constant 0 : i32
    return %c0_i32, %c0_i32_0 : i32, i32
  }
  func.func @transform_3(%arg0: i32) -> (i32, i32, i32) {
    %c0_i32 = arith.constant 0 : i32
    %c0_i32_0 = arith.constant 0 : i32
    %c0_i32_1 = arith.constant 0 : i32
    return %c0_i32, %c0_i32_0, %arg0 : i32, i32, i32
  }
}

</mosaic_0001>

<bundles_post_ra>
// kernel: outconv.1
= control target key start
LH: loop header
LB: loop body
LE: loop exit
PB: predicated region body
PF: predicated region fallthrough
CT: control target
= control target key end

     0   :  { %s7692_s12 = smov 0   ;;  %s7694_s13 = smov 0   ;;  %s9286_s0 = inlined_call_operand.vmem [shape: f32[2,64,672], index: 0, kind: input, shape index: {}]   ;;  %s9287_s1 = inlined_call_operand.vmem [shape: f32[3,64], index: 1, kind: input, shape index: {}]   ;;  %s9288_s2 = inlined_call_operand.vmem [shape: f32[3,1], index: 2, kind: input, shape index: {}]   ;;  %s9289_s3 = inlined_call_operand.vmem [shape: f32[2,3,672], index: 3, kind: output, shape index: {}]  }
   0x1   :  { %s7696_s14 = smov 0  }
   0x2 LB: > { %s5663_s15 = sadd.s32 4294967295, %s7669_s14   ;;  %s7709_s16 = sadd.s32 1, %s7669_s14   ;;  %s7669_s14 = sphi %s7696_s14, %s9888_s14   ;;  %s7665_s13 = sphi %s7694_s13, %s9887_s13   ;;  %s7661_s12 = sphi %s7692_s12, %s9886_s12  }
   0x3   : > { %s17_s17 = ssub.s32 %s7669_s14, %s7709_s16  ;;  %s20_s18 = sadd.s32 1, %s7665_s13 }
   0x4   : > { %p18_p0 = scmp.eq.s32.totalorder %s17_s17, 0  ;;  %p27_p1 = scmp.ne.s32.totalorder %s7665_s13, %s7661_s12 }
   0x5   : > { %p28_p2 = scmp.eq.s32.totalorder %s7669_s14, 0  ;;  %p99_p3 = scmp.eq.s32.totalorder %s5663_s15, 1 }
   0x6   : > { %s7720_s19 = scalar_select %p18_p0, %s7665_s13, %s20_s18  }
   0x7   : > { %p29_p4 = por %p28_p2, %p27_p1  ;;  %p7722_p5 = por %p99_p3, %p27_p1 }
   0x8   : > { %p5666_p6 = scmp.ge.s32.totalorder %s7669_s14, 2 }
   0xa   : > { %127 = sbr.rel (%p5666_p6) target bundleno = 46 (0x2e), region = 24 }
  0x11   : > { %130 = sbr.rel (!%p29_p4) target bundleno = 46 (0x2e), region = 28  ;;  %s132_s21 = sand.u32 (%p29_p4), 1, %s7665_s13  }
  0x12   : > { %s5676_s22 = smul.u32 (%p29_p4), 24, %s7669_s14 }
  0x13   : > { %s7616_s23 = smul.u32 (%p29_p4), 384, %s132_s21 }
  0x14   : > { %s7732_s26 = scalar_lea.vmem (%p29_p4), %s9286_s0, %s5676_s22 }
  0x15   : > { %v150_v0 = vld [vmem:[%s7732_s26] sm:$0xff] (%p29_p4)  ;;  %v152_v1 = vld [vmem:[%s7732_s26 + $0x8] sm:$0xff] (%p29_p4)  ;;  %v154_v2 = vld [vmem:[%s7732_s26 + $0x10] sm:$0xff] (%p29_p4)  ;;  %s7737_s27 = scalar_lea.vmem (%p29_p4), [#allocation2], %s7616_s23 }
  0x16   : > { %151 = vst [vmem:[%s7737_s27] sm:$0xff] (%p29_p4), %v150_v0  ;;  %153 = vst [vmem:[%s7737_s27 + $0x8] sm:$0xff] (%p29_p4), %v152_v1  ;;  %v156_v3 = vld [vmem:[%s7732_s26 + $0x30] sm:$0xff] (%p29_p4)  ;;  %v158_v4 = vld [vmem:[%s7732_s26 + $0x38] sm:$0xff] (%p29_p4) }
  0x17   : > { %155 = vst [vmem:[%s7737_s27 + $0x10] sm:$0xff] (%p29_p4), %v154_v2  ;;  %v160_v5 = vld [vmem:[%s7732_s26 + $0x40] sm:$0xff] (%p29_p4)  ;;  %157 = vst [vmem:[%s7737_s27 + $0x18] sm:$0xff] (%p29_p4), %v156_v3  ;;  %v164_v7 = vld [vmem:[%s7732_s26 + $0x68] sm:$0xff] (%p29_p4) }
  0x18   : > { %159 = vst [vmem:[%s7737_s27 + $0x20] sm:$0xff] %v158_v4  ;;  %161 = vst [vmem:[%s7737_s27 + $0x28] sm:$0xff] %v160_v5  ;;  %v162_v6 = vld [vmem:[%s7732_s26 + $0x60] sm:$0xff]  ;;  %v166_v8 = vld [vmem:[%s7732_s26 + $0x70] sm:$0xff] }
  0x19   : > { %163 = vst [vmem:[%s7737_s27 + $0x30] sm:$0xff] %v162_v6  ;;  %165 = vst [vmem:[%s7737_s27 + $0x38] sm:$0xff] %v164_v7  ;;  %v168_v9 = vld [vmem:[%s7732_s26 + $0x90] sm:$0xff]  ;;  %v170_v10 = vld [vmem:[%s7732_s26 + $0x98] sm:$0xff] }
  0x1a   : > { %167 = vst [vmem:[%s7737_s27 + $0x40] sm:$0xff] %v166_v8  ;;  %v172_v11 = vld [vmem:[%s7732_s26 + $0xa0] sm:$0xff]  ;;  %169 = vst [vmem:[%s7737_s27 + $0x48] sm:$0xff] %v168_v9  ;;  %v176_v13 = vld [vmem:[%s7732_s26 + $0xc8] sm:$0xff] }
  0x1b   : > { %171 = vst [vmem:[%s7737_s27 + $0x50] sm:$0xff] %v170_v10  ;;  %173 = vst [vmem:[%s7737_s27 + $0x58] sm:$0xff] %v172_v11  ;;  %v174_v12 = vld [vmem:[%s7732_s26 + $0xc0] sm:$0xff]  ;;  %v178_v14 = vld [vmem:[%s7732_s26 + $0xd0] sm:$0xff] }
  0x1c   : > { %175 = vst [vmem:[%s7737_s27 + $0x60] sm:$0xff] %v174_v12  ;;  %177 = vst [vmem:[%s7737_s27 + $0x68] sm:$0xff] %v176_v13  ;;  %v180_v15 = vld [vmem:[%s7732_s26 + $0xf0] sm:$0xff]  ;;  %v182_v16 = vld [vmem:[%s7732_s26 + $0xf8] sm:$0xff] }
  0x1d   : > { %179 = vst [vmem:[%s7737_s27 + $0x70] sm:$0xff] %v178_v14  ;;  %v184_v17 = vld [vmem:[%s7732_s26 + $0x100] sm:$0xff]  ;;  %181 = vst [vmem:[%s7737_s27 + $0x78] sm:$0xff] %v180_v15  ;;  %v188_v19 = vld [vmem:[%s7732_s26 + $0x128] sm:$0xff] }
  0x1e   : > { %183 = vst [vmem:[%s7737_s27 + $0x80] sm:$0xff] %v182_v16  ;;  %185 = vst [vmem:[%s7737_s27 + $0x88] sm:$0xff] %v184_v17  ;;  %v186_v18 = vld [vmem:[%s7732_s26 + $0x120] sm:$0xff]  ;;  %v190_v20 = vld [vmem:[%s7732_s26 + $0x130] sm:$0xff] }
  0x1f   : > { %187 = vst [vmem:[%s7737_s27 + $0x90] sm:$0xff] %v186_v18  ;;  %189 = vst [vmem:[%s7737_s27 + $0x98] sm:$0xff] %v188_v19  ;;  %v192_v21 = vld [vmem:[%s7732_s26 + $0x150] sm:$0xff]  ;;  %v194_v22 = vld [vmem:[%s7732_s26 + $0x158] sm:$0xff] }
  0x20   : > { %191 = vst [vmem:[%s7737_s27 + $0xa0] sm:$0xff] %v190_v20  ;;  %v196_v23 = vld [vmem:[%s7732_s26 + $0x160] sm:$0xff]  ;;  %193 = vst [vmem:[%s7737_s27 + $0xa8] sm:$0xff] %v192_v21  ;;  %v200_v25 = vld [vmem:[%s7732_s26 + $0x188] sm:$0xff] }
  0x21   : > { %195 = vst [vmem:[%s7737_s27 + $0xb0] sm:$0xff] %v194_v22  ;;  %197 = vst [vmem:[%s7737_s27 + $0xb8] sm:$0xff] %v196_v23  ;;  %v198_v24 = vld [vmem:[%s7732_s26 + $0x180] sm:$0xff]  ;;  %v202_v26 = vld [vmem:[%s7732_s26 + $0x190] sm:$0xff] }
  0x22   : > { %199 = vst [vmem:[%s7737_s27 + $0xc0] sm:$0xff] %v198_v24  ;;  %201 = vst [vmem:[%s7737_s27 + $0xc8] sm:$0xff] %v200_v25  ;;  %v204_v27 = vld [vmem:[%s7732_s26 + $0x1b0] sm:$0xff]  ;;  %v206_v28 = vld [vmem:[%s7732_s26 + $0x1b8] sm:$0xff] }
  0x23   : > { %203 = vst [vmem:[%s7737_s27 + $0xd0] sm:$0xff] %v202_v26  ;;  %v208_v29 = vld [vmem:[%s7732_s26 + $0x1c0] sm:$0xff]  ;;  %205 = vst [vmem:[%s7737_s27 + $0xd8] sm:$0xff] %v204_v27  ;;  %v212_v31 = vld [vmem:[%s7732_s26 + $0x1e8] sm:$0xff] }
  0x24   : > { %207 = vst [vmem:[%s7737_s27 + $0xe0] sm:$0xff] %v206_v28  ;;  %209 = vst [vmem:[%s7737_s27 + $0xe8] sm:$0xff] %v208_v29  ;;  %v210_v30 = vld [vmem:[%s7732_s26 + $0x1e0] sm:$0xff]  ;;  %v214_v32 = vld [vmem:[%s7732_s26 + $0x1f0] sm:$0xff] }
  0x25   : > { %211 = vst [vmem:[%s7737_s27 + $0xf0] sm:$0xff] %v210_v30  ;;  %213 = vst [vmem:[%s7737_s27 + $0xf8] sm:$0xff] %v212_v31  ;;  %v216_v33 = vld [vmem:[%s7732_s26 + $0x210] sm:$0xff]  ;;  %v218_v34 = vld [vmem:[%s7732_s26 + $0x218] sm:$0xff] }
  0x26   : > { %215 = vst [vmem:[%s7737_s27 + $0x100] sm:$0xff] %v214_v32  ;;  %v220_v35 = vld [vmem:[%s7732_s26 + $0x220] sm:$0xff]  ;;  %217 = vst [vmem:[%s7737_s27 + $0x108] sm:$0xff] %v216_v33  ;;  %v224_v37 = vld [vmem:[%s7732_s26 + $0x248] sm:$0xff] }
  0x27   : > { %219 = vst [vmem:[%s7737_s27 + $0x110] sm:$0xff] %v218_v34  ;;  %221 = vst [vmem:[%s7737_s27 + $0x118] sm:$0xff] %v220_v35  ;;  %v222_v36 = vld [vmem:[%s7732_s26 + $0x240] sm:$0xff]  ;;  %v226_v38 = vld [vmem:[%s7732_s26 + $0x250] sm:$0xff] }
  0x28   : > { %223 = vst [vmem:[%s7737_s27 + $0x120] sm:$0xff] %v222_v36  ;;  %225 = vst [vmem:[%s7737_s27 + $0x128] sm:$0xff] %v224_v37  ;;  %v228_v39 = vld [vmem:[%s7732_s26 + $0x270] sm:$0xff]  ;;  %v230_v40 = vld [vmem:[%s7732_s26 + $0x278] sm:$0xff] }
  0x29   : > { %227 = vst [vmem:[%s7737_s27 + $0x130] sm:$0xff] %v226_v38  ;;  %v232_v41 = vld [vmem:[%s7732_s26 + $0x280] sm:$0xff]  ;;  %229 = vst [vmem:[%s7737_s27 + $0x138] sm:$0xff] %v228_v39  ;;  %v236_v43 = vld [vmem:[%s7732_s26 + $0x2a8] sm:$0xff] }
  0x2a   : > { %231 = vst [vmem:[%s7737_s27 + $0x140] sm:$0xff] %v230_v40  ;;  %233 = vst [vmem:[%s7737_s27 + $0x148] sm:$0xff] %v232_v41  ;;  %v234_v42 = vld [vmem:[%s7732_s26 + $0x2a0] sm:$0xff]  ;;  %v238_v44 = vld [vmem:[%s7732_s26 + $0x2b0] sm:$0xff] }
  0x2b   : > { %235 = vst [vmem:[%s7737_s27 + $0x150] sm:$0xff] %v234_v42  ;;  %237 = vst [vmem:[%s7737_s27 + $0x158] sm:$0xff] %v236_v43  ;;  %v240_v45 = vld [vmem:[%s7732_s26 + $0x2d0] sm:$0xff]  ;;  %v242_v46 = vld [vmem:[%s7732_s26 + $0x2d8] sm:$0xff] }
  0x2c   : > { %239 = vst [vmem:[%s7737_s27 + $0x160] sm:$0xff] %v238_v44  ;;  %v244_v47 = vld [vmem:[%s7732_s26 + $0x2e0] sm:$0xff]  ;;  %241 = vst [vmem:[%s7737_s27 + $0x168] sm:$0xff] %v240_v45 }
  0x2d   : > { %243 = vst [vmem:[%s7737_s27 + $0x170] sm:$0xff] %v242_v46  ;;  %245 = vst [vmem:[%s7737_s27 + $0x178] sm:$0xff] %v244_v47 }
  0x2e PF: > { %p5668_p7 = scmp.ge.s32.totalorder %s7669_s14, 1  ;;  %p250_p8 = scmp.lt.s32.totalorder %s7669_s14, 3 }
  0x30   : > { %p251_p9 = pnand %p5668_p7, %p250_p8 }
  0x32   : > { %254 = sbr.rel (%p251_p9) target bundleno = 1133 (0x46d), region = 51 }
  0x39   : > { %s257_s28 = sand.u32 1, %s7661_s12   ;;  %vm522_vm0 = vcmask 523264   ;;  %v281_v55 = vld [vmem:[%s9287_s1] sm:$0x7]  ;;  %s5677_s10 = smul.u32 (%p7722_p5), 12, %s5663_s15 }
  0x3a   : > { %s7617_s29 = smul.u32 384, %s257_s28  ;;  %v812_v57 = vsel %vm522_vm0, %v281_v55, 0 }
  0x3b   : > { %v7851_v58 = vand.u32 4294901760, %v812_v57  ;;  %s7618_s8 = smul.u32 24, %s257_s28  ;;  %s5570_s17 = scalar_lea.vmem (%p7722_p5), %s9289_s3, %s5677_s10 }
  0x3c   : > { %s7837_s30 = scalar_lea.vmem [#allocation2], %s7617_s29 }
  0x3d   : > { %v282_v48 = vld [vmem:[%s7837_s30] sm:$0xff]  ;;  %v285_v49 = vld [vmem:[%s7837_s30 + $0x18] sm:$0xff]  ;;  %v283_v50 = vld [vmem:[%s7837_s30 + $0x8] sm:$0xff]  ;;  %6698 = vmatprep.subr.mxu0 %v7851_v58  ;;  %6260 = vmatprep.subr.mxu1 %v7851_v58  ;;  %v7866_v3 = vsub.f32 %v812_v57, %v7851_v58  ;;  %s9251_s9 = scalar_lea.vmem [#allocation3], %s7618_s8 }
  0x3e   : > { %330 = vxpose.xlu0.b32.start [1/8] (short) %v282_v48, 128  ;;  %362 = vxpose.xlu1.b32.start [1/8] (short) %v283_v50, 128  ;;  %v286_v51 = vld [vmem:[%s7837_s30 + $0x20] sm:$0xff]  ;;  %v288_v52 = vld [vmem:[%s7837_s30 + $0x30] sm:$0xff]  ;;  %v289_v53 = vld [vmem:[%s7837_s30 + $0x38] sm:$0xff] }
  0x3f   : > { %v291_v54 = vld [vmem:[%s7837_s30 + $0x48] sm:$0xff]  ;;  %v292_v56 = vld [vmem:[%s7837_s30 + $0x50] sm:$0xff]  ;;  %v294_v59 = vld [vmem:[%s7837_s30 + $0x60] sm:$0xff]  ;;  %6699 = vmatpush3.xpose.msra.mxu0 %v7851_v58  ;;  %6261 = vmatpush3.xpose.msra.mxu1 %v7851_v58  ;;  %v7869_v4 = vand.u32 4294901760, %v7866_v3 }
  0x40   : > { %v295_v60 = vld [vmem:[%s7837_s30 + $0x68] sm:$0xff]  ;;  %v297_v61 = vld [vmem:[%s7837_s30 + $0x78] sm:$0xff]  ;;  %v298_v62 = vld [vmem:[%s7837_s30 + $0x80] sm:$0xff] }
  0x41   : > { %v300_v63 = vld [vmem:[%s7837_s30 + $0x90] sm:$0xff]  ;;  %v301_v0 = vld [vmem:[%s7837_s30 + $0x98] sm:$0xff]  ;;  %v303_v1 = vld [vmem:[%s7837_s30 + $0xa8] sm:$0xff]  ;;  %v1844_v5 = vsub.f32 %v7866_v3, %v7869_v4  ;;  %6844 = vmatprep.subr.mxu0 %v7869_v4 }
  0x42   : > { %331 = vxpose.xlu0.b32.cont [2/8] (short) %v285_v49, 128  ;;  %363 = vxpose.xlu1.b32.cont [2/8] (short) %v286_v51, 128  ;;  %v304_v2 = vld [vmem:[%s7837_s30 + $0xb0] sm:$0xff]  ;;  %v306_v8 = vld [vmem:[%s7837_s30 + $0xc0] sm:$0xff]  ;;  %v287_v9 = vld [vmem:[%s7837_s30 + $0x28] sm:$0xff] }
  0x43   : > { %v7874_v6 = vand.u32 4294901760, %v1844_v5  ;;  %v284_v7 = vld [vmem:[%s7837_s30 + $0x10] sm:$0xff]  ;;  %v309_v10 = vld [vmem:[%s7837_s30 + $0xd8] sm:$0xff]  ;;  %v290_v11 = vld [vmem:[%s7837_s30 + $0x40] sm:$0xff] }
  0x44   : > { %v312_v12 = vld [vmem:[%s7837_s30 + $0xf0] sm:$0xff]  ;;  %v293_v13 = vld [vmem:[%s7837_s30 + $0x58] sm:$0xff]  ;;  %v315_v14 = vld [vmem:[%s7837_s30 + $0x108] sm:$0xff] }
  0x45   : > { %6406 = vmatprep.subr.mxu1 %v7874_v6  ;;  %v296_v15 = vld [vmem:[%s7837_s30 + $0x70] sm:$0xff]  ;;  %v318_v16 = vld [vmem:[%s7837_s30 + $0x120] sm:$0xff]  ;;  %v299_v17 = vld [vmem:[%s7837_s30 + $0x88] sm:$0xff] }
  0x46   : > { %332 = vxpose.xlu0.b32.cont [3/8] (short) %v288_v52, 128  ;;  %364 = vxpose.xlu1.b32.cont [3/8] (short) %v289_v53, 128  ;;  %v321_v18 = vld [vmem:[%s7837_s30 + $0x138] sm:$0xff]  ;;  %v302_v19 = vld [vmem:[%s7837_s30 + $0xa0] sm:$0xff]  ;;  %v324_v20 = vld [vmem:[%s7837_s30 + $0x150] sm:$0xff] }
  0x47   : > { %v305_v21 = vld [vmem:[%s7837_s30 + $0xb8] sm:$0xff]  ;;  %v327_v22 = vld [vmem:[%s7837_s30 + $0x168] sm:$0xff]  ;;  %v308_v24 = vld [vmem:[%s7837_s30 + $0xd0] sm:$0xff] }
  0x48   : > { %v307_v23 = vld [vmem:[%s7837_s30 + $0xc8] sm:$0xff]  ;;  %v310_v25 = vld [vmem:[%s7837_s30 + $0xe0] sm:$0xff]  ;;  %v313_v27 = vld [vmem:[%s7837_s30 + $0xf8] sm:$0xff] }
  0x49   : > { %v311_v26 = vld [vmem:[%s7837_s30 + $0xe8] sm:$0xff]  ;;  %v314_v30 = vld [vmem:[%s7837_s30 + $0x100] sm:$0xff]  ;;  %v316_v33 = vld [vmem:[%s7837_s30 + $0x110] sm:$0xff] }
  0x4a   : > { %333 = vxpose.xlu0.b32.cont [4/8] (short) %v291_v54, 128  ;;  %365 = vxpose.xlu1.b32.cont [4/8] (short) %v292_v56, 128  ;;  %v317_v37 = vld [vmem:[%s7837_s30 + $0x118] sm:$0xff]  ;;  %v319_v41 = vld [vmem:[%s7837_s30 + $0x128] sm:$0xff]  ;;  %v320_v50 = vld [vmem:[%s7837_s30 + $0x130] sm:$0xff] }
  0x4b   : > { %v322_v51 = vld [vmem:[%s7837_s30 + $0x140] sm:$0xff] }
  0x4e   : > { %334 = vxpose.xlu0.b32.cont [5/8] (short) %v294_v59, 128  ;;  %366 = vxpose.xlu1.b32.cont [5/8] (short) %v295_v60, 128 }
  0x52   : > { %335 = vxpose.xlu0.b32.cont [6/8] (short) %v297_v61, 128  ;;  %367 = vxpose.xlu1.b32.cont [6/8] (short) %v298_v62, 128  ;;  %v323_v61 = vld [vmem:[%s7837_s30 + $0x148] sm:$0xff]  ;;  %v325_v62 = vld [vmem:[%s7837_s30 + $0x158] sm:$0xff] }
  0x56   : > { %336 = vxpose.xlu0.b32.cont [7/8] (short) %v300_v63, 128  ;;  %368 = vxpose.xlu1.b32.cont [7/8] (short) %v301_v0, 128 }
  0x5a   : > { %337 = vxpose.xlu0.b32.end [8/8] (short) %v303_v1, 128  ;;  %369 = vxpose.xlu1.b32.end [8/8] (short) %v304_v2, 128 }
  0x7b   : > { %394 = vxpose.xlu0.b32.start [1/8] (short) %v284_v7, 128  ;;  %426 = vxpose.xlu1.b32.start [1/8] (short) %v306_v8, 128 }
  0x7f   : > { %395 = vxpose.xlu0.b32.cont [2/8] (short) %v287_v9, 128  ;;  %427 = vxpose.xlu1.b32.cont [2/8] (short) %v309_v10, 128  ;;  %v326_v9 = vld [vmem:[%s7837_s30 + $0x160] sm:$0xff]  ;;  %v328_v10 = vld [vmem:[%s7837_s30 + $0x170] sm:$0xff] }
  0x83   : > { %396 = vxpose.xlu0.b32.cont [3/8] (short) %v290_v11, 128  ;;  %428 = vxpose.xlu1.b32.cont [3/8] (short) %v312_v12, 128 }
  0x87   : > { %397 = vxpose.xlu0.b32.cont [4/8] (short) %v293_v13, 128  ;;  %429 = vxpose.xlu1.b32.cont [4/8] (short) %v315_v14, 128 }
  0x8b   : > { %398 = vxpose.xlu0.b32.cont [5/8] (short) %v296_v15, 128  ;;  %430 = vxpose.xlu1.b32.cont [5/8] (short) %v318_v16, 128 }
  0x8f   : > { %399 = vxpose.xlu0.b32.cont [6/8] (short) %v299_v17, 128  ;;  %431 = vxpose.xlu1.b32.cont [6/8] (short) %v321_v18, 128  ;;  %v329_v18 = vld [vmem:[%s7837_s30 + $0x178] sm:$0xff] }
  0x93   : > { %400 = vxpose.xlu0.b32.cont [7/8] (short) %v302_v19, 128  ;;  %432 = vxpose.xlu1.b32.cont [7/8] (short) %v324_v20, 128 }
  0x97   : > { %401 = vxpose.xlu0.b32.end [8/8] (short) %v305_v21, 128  ;;  %433 = vxpose.xlu1.b32.end [8/8] (short) %v327_v22, 128 }
  0xb8   : > { %458 = vxpose.xlu0.b32.start [1/8] (short) %v307_v23, 128  ;;  %490 = vxpose.xlu1.b32.start [1/8] (short) %v308_v24, 128 }
  0xbc   : > { %459 = vxpose.xlu0.b32.cont [2/8] (short) %v310_v25, 128  ;;  %491 = vxpose.xlu1.b32.cont [2/8] (short) %v311_v26, 128 }
  0xbe   : > { %v346_v28 = vpop.trf.xlu0  ;;  %v7902_v32 = vpop.trf.xlu1 }
  0xbf   : > { %v524_v29 = vsel %vm522_vm0, %v346_v28, 0 }
  0xc0   : > { %v7900_v31 = vand.u32 4294901760, %v524_v29  ;;  %460 = vxpose.xlu0.b32.cont [3/8] (short) %v313_v27, 128  ;;  %492 = vxpose.xlu1.b32.cont [3/8] (short) %v314_v30, 128 }
  0xc2   : > { %v7906_v34 = vsub.f32 %v524_v29, %v7900_v31  ;;  %v347_v35 = vpop.trf.xlu0  ;;  %v7913_v40 = vpop.trf.xlu1 }
  0xc3   : > { %v527_v36 = vsel %vm522_vm0, %v347_v35, 0 }
  0xc4   : > { %9537 = vst [vmem:[#allocation4_spill] sm:$0xff] %v7906_v34  ;;  %v7910_v38 = vand.u32 4294901760, %v527_v36  ;;  %v882_v39 = vand.u32 4294901760, %v7906_v34  ;;  %461 = vxpose.xlu0.b32.cont [4/8] (short) %v316_v33, 128  ;;  %493 = vxpose.xlu1.b32.cont [4/8] (short) %v317_v37, 128 }
  0xc6   : > { %v7917_v42 = vsub.f32 %v527_v36, %v7910_v38  ;;  %6700 = vmatprep.mubr.f32.mxu0 %v882_v39  ;;  %v348_v43 = vpop.trf.xlu0  ;;  %v883_v44 = vsub.f32 %v7906_v34, %v882_v39  ;;  %v7924_v49 = vpop.trf.xlu1 }
  0xc7   : > { %v530_v45 = vsel %vm522_vm0, %v348_v43, 0 }
  0xc8   : > { %9538 = vst [vmem:[#allocation5_spill] sm:$0xff] %v7917_v42  ;;  %v7921_v46 = vand.u32 4294901760, %v530_v45  ;;  %v884_v47 = vand.u32 4294901760, %v883_v44  ;;  %v892_v48 = vand.u32 4294901760, %v7917_v42  ;;  %462 = vxpose.xlu0.b32.cont [5/8] (short) %v319_v41, 128  ;;  %494 = vxpose.xlu1.b32.cont [5/8] (short) %v320_v50, 128 }
  0xca   : > { %v7929_v52 = vsub.f32 %v530_v45, %v7921_v46  ;;  %6262 = vmatprep.mubr.f32.mxu1 %v884_v47  ;;  %6701 = vmatmul.mubr.f32.vlgmr.msra.gmra.mrb[0].mxu0 %v892_v48  ;;  %v349_v53 = vpop.trf.xlu0  ;;  %v893_v54 = vsub.f32 %v7917_v42, %v892_v48  ;;  %v7937_v60 = vpop.trf.xlu1 }
  0xcb   : > { %v533_v55 = vsel %vm522_vm0, %v349_v53, 0  ;;  %6845 = vmatpush3.xpose.msra.mxu0 %v7869_v4 }
  0xcc   : > { %9539 = vst [vmem:[#allocation6_spill] sm:$0xff] %v7929_v52  ;;  %v7934_v56 = vand.u32 4294901760, %v533_v55  ;;  %v894_v57 = vand.u32 4294901760, %v893_v54  ;;  %v902_v59 = vand.u32 4294901760, %v7929_v52  ;;  %463 = vxpose.xlu0.b32.cont [6/8] (short) %v322_v51, 128  ;;  %6990 = vmatprep.subr.mxu0 %v7851_v58 }
  0xcd   : > { %495 = vxpose.xlu1.b32.cont [6/8] (short) %v323_v61, 128 }
  0xce   : > { %v7943_v63 = vsub.f32 %v533_v55, %v7934_v56  ;;  %6263 = vmatmul.mubr.f32.vlgmr.msra.gmra.mrb[0].mxu1 %v894_v57  ;;  %6703 = vmatprep.mubr.f32.mxu0 %v902_v59  ;;  %v350_v0 = vpop.trf.xlu0  ;;  %v903_v1 = vsub.f32 %v7929_v52, %v902_v59  ;;  %v7951_v8 = vpop.trf.xlu1 }
  0xcf   : > { %v536_v2 = vsel %vm522_vm0, %v350_v0, 0  ;;  %6407 = vmatpush3.xpose.msra.mxu1 %v7874_v6 }
  0xd0   : > { %9540 = vst [vmem:[#allocation7_spill] sm:$0xff] %v7943_v63  ;;  %v7948_v4 = vand.u32 4294901760, %v536_v2  ;;  %v904_v5 = vand.u32 4294901760, %v903_v1  ;;  %v912_v7 = vand.u32 4294901760, %v7943_v63  ;;  %464 = vxpose.xlu0.b32.cont [7/8] (short) %v325_v62, 128  ;;  %6552 = vmatprep.subr.mxu1 %v7866_v3 }
  0xd1   : > { %496 = vxpose.xlu1.b32.cont [7/8] (short) %v326_v9, 128 }
  0xd2   : > { %v7957_v11 = vsub.f32 %v536_v2, %v7948_v4  ;;  %6265 = vmatprep.mubr.f32.mxu1 %v904_v5  ;;  %6704 = vmatmul.mubr.f32.gmra.mrb[2].mxu0 %v912_v7  ;;  %v351_v6 = vpop.trf.xlu0  ;;  %v913_v12 = vsub.f32 %v7943_v63, %v912_v7  ;;  %v7964_v17 = vpop.trf.xlu1 }
  0xd3   : > { %v539_v13 = vsel %vm522_vm0, %v351_v6, 0 }
  0xd4   : > { %9541 = vst [vmem:[#allocation8_spill] sm:$0xff] %v7957_v11  ;;  %v7961_v14 = vand.u32 4294901760, %v539_v13  ;;  %v914_v15 = vand.u32 4294901760, %v913_v12  ;;  %v922_v16 = vand.u32 4294901760, %v7957_v11  ;;  %465 = vxpose.xlu0.b32.end [8/8] (short) %v328_v10, 128 }
  0xd5   : > { %497 = vxpose.xlu1.b32.end [8/8] (short) %v329_v18, 128 }
  0xd6   : > { %v7968_v19 = vsub.f32 %v539_v13, %v7961_v14  ;;  %6266 = vmatmul.mubr.f32.gmra.mrb[2].mxu1 %v914_v15  ;;  %6706 = vmatprep.mubr.f32.mxu0 %v922_v16  ;;  %v352_v20 = vpop.trf.xlu0  ;;  %v923_v21 = vsub.f32 %v7957_v11, %v922_v16  ;;  %v7975_v26 = vpop.trf.xlu1 }
  0xd7   : > { %v542_v22 = vsel %vm522_vm0, %v352_v20, 0 }
  0xd8   : > { %9542 = vst [vmem:[#allocation9_spill] sm:$0xff] %v7968_v19  ;;  %v7972_v23 = vand.u32 4294901760, %v542_v22  ;;  %v924_v24 = vand.u32 4294901760, %v923_v21  ;;  %v932_v25 = vand.u32 4294901760, %v7968_v19 }
  0xda   : > { %v7978_v27 = vsub.f32 %v542_v22, %v7972_v23  ;;  %6268 = vmatprep.mubr.f32.mxu1 %v924_v24  ;;  %6707 = vmatmul.mubr.f32.gmra.mrb[4].mxu0 %v932_v25  ;;  %v353_v28 = vpop.trf.xlu0  ;;  %v933_v29 = vsub.f32 %v7968_v19, %v932_v25  ;;  %v7985_v37 = vpop.trf.xlu1 }
  0xdb   : > { %v545_v30 = vsel %vm522_vm0, %v353_v28, 0 }
  0xdc   : > { %9543 = vst [vmem:[#allocation10_spill] sm:$0xff] %v7978_v27  ;;  %v7982_v33 = vand.u32 4294901760, %v545_v30  ;;  %v934_v35 = vand.u32 4294901760, %v933_v29  ;;  %v942_v36 = vand.u32 4294901760, %v7978_v27 }
  0xde   : > { %v7988_v39 = vsub.f32 %v545_v30, %v7982_v33  ;;  %6269 = vmatmul.mubr.f32.gmra.mrb[4].mxu1 %v934_v35  ;;  %6709 = vmatprep.mubr.f32.mxu0 %v942_v36  ;;  %v354_v41 = vpop.trf.xlu0  ;;  %v943_v43 = vsub.f32 %v7978_v27, %v942_v36  ;;  %v7995_v50 = vpop.trf.xlu1 }
  0xdf   : > { %v548_v44 = vsel %vm522_vm0, %v354_v41, 0 }
  0xe0   : > { %9544 = vst [vmem:[#allocation11_spill] sm:$0xff] %v7988_v39  ;;  %v7992_v45 = vand.u32 4294901760, %v548_v44  ;;  %v944_v47 = vand.u32 4294901760, %v943_v43  ;;  %v952_v48 = vand.u32 4294901760, %v7988_v39  ;;  %v572_v43 = vsel %vm522_vm0, %v7902_v32, 0 }
  0xe1   : > { %v8051_v32 = vand.u32 4294901760, %v572_v43 }
  0xe2   : > { %v7998_v51 = vsub.f32 %v548_v44, %v7992_v45  ;;  %6271 = vmatprep.mubr.f32.mxu1 %v944_v47  ;;  %6710 = vmatmul.mubr.f32.gmra.mrb[6].mxu0 %v952_v48  ;;  %v355_v53 = vpop.trf.xlu0  ;;  %v953_v54 = vsub.f32 %v7988_v39, %v952_v48  ;;  %v8005_v62 = vpop.trf.xlu1 }
  0xe3   : > { %v551_v55 = vsel %vm522_vm0, %v355_v53, 0 }
  0xe4   : > { %9545 = vst [vmem:[#allocation12_spill] sm:$0xff] %v7998_v51  ;;  %v8002_v57 = vand.u32 4294901760, %v551_v55  ;;  %v954_v59 = vand.u32 4294901760, %v953_v54  ;;  %v962_v61 = vand.u32 4294901760, %v7998_v51  ;;  %v575_v54 = vsel %vm522_vm0, %v7913_v40, 0 }
  0xe6   : > { %v8008_v0 = vsub.f32 %v551_v55, %v8002_v57  ;;  %6272 = vmatmul.mubr.f32.gmra.mrb[6].mxu1 %v954_v59  ;;  %6712 = vmatprep.mubr.f32.mxu0 %v962_v61  ;;  %v356_v1 = vpop.trf.xlu0  ;;  %v963_v2 = vsub.f32 %v7998_v51, %v962_v61  ;;  %v8015_v6 = vpop.trf.xlu1 }
  0xe7   : > { %v554_v5 = vsel %vm522_vm0, %v356_v1, 0 }
  0xe8   : > { %9546 = vst [vmem:[#allocation13_spill] sm:$0xff] %v8008_v0  ;;  %v8012_v7 = vand.u32 4294901760, %v554_v5  ;;  %v964_v9 = vand.u32 4294901760, %v963_v2  ;;  %v972_v10 = vand.u32 4294901760, %v8008_v0  ;;  %v578_v2 = vsel %vm522_vm0, %v7924_v49, 0 }
  0xea   : > { %v8018_v12 = vsub.f32 %v554_v5, %v8012_v7  ;;  %6274 = vmatprep.mubr.f32.mxu1 %v964_v9  ;;  %6713 = vmatmul.mubr.f32.gmra.mrb[8].mxu0 %v972_v10  ;;  %v357_v13 = vpop.trf.xlu0  ;;  %v973_v15 = vsub.f32 %v8008_v0, %v972_v10  ;;  %v8025_v22 = vpop.trf.xlu1  ;;  %v8059_v10 = vand.u32 4294901760, %v575_v54 }
  0xeb   : > { %v557_v16 = vsel %vm522_vm0, %v357_v13, 0 }
  0xec   : > { %9547 = vst [vmem:[#allocation14_spill] sm:$0xff] %v8018_v12  ;;  %v8022_v18 = vand.u32 4294901760, %v557_v16  ;;  %v974_v20 = vand.u32 4294901760, %v973_v15  ;;  %v982_v21 = vand.u32 4294901760, %v8018_v12  ;;  %v581_v15 = vsel %vm522_vm0, %v7937_v60, 0 }
  0xee   : > { %v8028_v24 = vsub.f32 %v557_v16, %v8022_v18  ;;  %6275 = vmatmul.mubr.f32.gmra.mrb[8].mxu1 %v974_v20  ;;  %6715 = vmatprep.mubr.f32.mxu0 %v982_v21  ;;  %v358_v25 = vpop.trf.xlu0  ;;  %v983_v28 = vsub.f32 %v8018_v12, %v982_v21  ;;  %v8035_v41 = vpop.trf.xlu1 }
  0xef   : > { %v560_v29 = vsel %vm522_vm0, %v358_v25, 0  ;;  %v8070_v25 = vsub.f32 %v572_v43, %v8051_v32 }
  0xf0   : > { %9548 = vst [vmem:[#allocation15_spill] sm:$0xff] %v8028_v24  ;;  %v8032_v30 = vand.u32 4294901760, %v560_v29  ;;  %v984_v35 = vand.u32 4294901760, %v983_v28  ;;  %v992_v36 = vand.u32 4294901760, %v8028_v24  ;;  %v8072_v28 = vand.u32 4294901760, %v578_v2 }
  0xf1   : > { %9551 = vst [vmem:[#allocation18_spill] sm:$0xff] %v8070_v25 }
  0xf2   : > { %v8040_v44 = vsub.f32 %v560_v29, %v8032_v30  ;;  %6277 = vmatprep.mubr.f32.mxu1 %v984_v35  ;;  %6716 = vmatmul.mubr.f32.gmra.mrb[10].mxu0 %v992_v36  ;;  %v359_v47 = vpop.trf.xlu0  ;;  %v993_v48 = vsub.f32 %v8028_v24, %v992_v36  ;;  %v8049_v1 = vpop.trf.xlu1  ;;  %v584_v29 = vsel %vm522_vm0, %v7951_v8, 0 }
  0xf3   : > { %v563_v53 = vsel %vm522_vm0, %v359_v47, 0  ;;  %v8081_v47 = vsub.f32 %v575_v54, %v8059_v10  ;;  %v590_v54 = vsel %vm522_vm0, %v7975_v26, 0  ;;  %v593_v26 = vsel %vm522_vm0, %v7985_v37, 0 }
  0xf4   : > { %9549 = vst [vmem:[#allocation16_spill] sm:$0xff] %v8040_v44  ;;  %v8046_v55 = vand.u32 4294901760, %v563_v53  ;;  %v994_v59 = vand.u32 4294901760, %v993_v48  ;;  %v1002_v61 = vand.u32 4294901760, %v8040_v44  ;;  %v8083_v48 = vand.u32 4294901760, %v581_v15 }
  0xf5   : > { %9553 = vst [vmem:[#allocation20_spill] sm:$0xff] %v8081_v47  ;;  %v8133_v51 = vand.u32 4294901760, %v593_v26 }
  0xf6   : > { %v8056_v5 = vsub.f32 %v563_v53, %v8046_v55  ;;  %6278 = vmatmul.mubr.f32.gmra.mrb[10].mxu1 %v994_v59  ;;  %6718 = vmatprep.mubr.f32.mxu0 %v1002_v61  ;;  %v360_v9 = vpop.trf.xlu0  ;;  %v1003_v40 = vsub.f32 %v8040_v44, %v1002_v61  ;;  %v8067_v21 = vpop.trf.xlu1  ;;  %v587_v53 = vsel %vm522_vm0, %v7964_v17, 0  ;;  %v8113_v44 = vand.u32 4294901760, %v590_v54 }
  0xf7   : > { %v566_v13 = vsel %vm522_vm0, %v360_v9, 0  ;;  %v8153_v19 = vsub.f32 %v593_v26, %v8133_v51 }
  0xf8   : > { %9550 = vst [vmem:[#allocation17_spill] sm:$0xff] %v8056_v5  ;;  %v8064_v16 = vand.u32 4294901760, %v566_v13  ;;  %v1004_v20 = vand.u32 4294901760, %v1003_v40  ;;  %v1012_v49 = vand.u32 4294901760, %v8056_v5  ;;  %v8094_v40 = vsub.f32 %v578_v2, %v8072_v28 }
  0xf9   : > { %v8110_v2 = vand.u32 4294901760, %v587_v53  ;;  %9560 = vst [vmem:[#allocation27_spill] sm:$0xff] %v8153_v19  ;;  %v1112_v52 = vand.u32 4294901760, %v8153_v19 }
  0xfa   : > { %v8077_v35 = vsub.f32 %v566_v13, %v8064_v16  ;;  %6280 = vmatprep.mubr.f32.mxu1 %v1004_v20  ;;  %6719 = vmatmul.mubr.f32.gmra.mrb[12].mxu0 %v1012_v49  ;;  %v361_v60 = vpop.trf.xlu0  ;;  %v1013_v36 = vsub.f32 %v8056_v5, %v1012_v49  ;;  %v8091_v9 = vpop.trf.xlu1  ;;  %9554 = vst [vmem:[#allocation21_spill] sm:$0xff] %v8094_v40  ;;  %v8096_v13 = vand.u32 4294901760, %v584_v29  ;;  %v1042_v20 = vand.u32 4294901760, %v8070_v25 }
  0xfb   : > { %v569_v43 = vsel %vm522_vm0, %v361_v60, 0  ;;  %v1052_v5 = vand.u32 4294901760, %v8081_v47 }
  0xfc   : > { %9552 = vst [vmem:[#allocation19_spill] sm:$0xff] %v8077_v35  ;;  %v8088_v59 = vand.u32 4294901760, %v569_v43  ;;  %v1014_v8 = vand.u32 4294901760, %v1013_v36  ;;  %v1022_v61 = vand.u32 4294901760, %v8077_v35  ;;  %v8108_v36 = vsub.f32 %v581_v15, %v8083_v48 }
  0xfd   : > { %v8121_v12 = vsub.f32 %v584_v29, %v8096_v13  ;;  %v596_v15 = vsel %vm522_vm0, %v7995_v50, 0  ;;  %v1053_v29 = vsub.f32 %v8081_v47, %v1052_v5  ;;  %v602_v47 = vsel %vm522_vm0, %v8015_v6, 0 }
  0xfe   : > { %v8102_v49 = vsub.f32 %v569_v43, %v8088_v59  ;;  %6281 = vmatmul.mubr.f32.gmra.mrb[12].mxu1 %v1014_v8  ;;  %6721 = vmatprep.mubr.f32.mxu0 %v1022_v61  ;;  %v8104_v17 = vpop.trf.xlu0  ;;  %v1023_v60 = vsub.f32 %v8077_v35, %v1022_v61  ;;  %9556 = vst [vmem:[#allocation23_spill] sm:$0xff] %v8108_v36  ;;  %v8118_v24 = vpop.trf.xlu1  ;;  %v1062_v35 = vand.u32 4294901760, %v8094_v40  ;;  %v1072_v50 = vand.u32 4294901760, %v8108_v36 }
  0xff   : > { %9557 = vst [vmem:[#allocation24_spill] sm:$0xff] %v8121_v12  ;;  %v1043_v61 = vsub.f32 %v8070_v25, %v1042_v20  ;;  %v8138_v25 = vsub.f32 %v590_v54, %v8113_v44  ;;  %v8140_v39 = vand.u32 4294901760, %v596_v15  ;;  %v605_v6 = vsel %vm522_vm0, %v8025_v22, 0 }
 0x100   : > { %9555 = vst [vmem:[#allocation22_spill] sm:$0xff] %v8102_v49  ;;  %v1024_v43 = vand.u32 4294901760, %v1023_v60  ;;  %v1032_v8 = vand.u32 4294901760, %v8102_v49  ;;  %v8131_v60 = vsub.f32 %v587_v53, %v8110_v2  ;;  %v8167_v26 = vand.u32 4294901760, %v602_v47 }
 0x101   : > { %9559 = vst [vmem:[#allocation26_spill] sm:$0xff] %v8138_v25  ;;  %v1044_v53 = vand.u32 4294901760, %v1043_v61 }
 0x102   : > { %6283 = vmatprep.mubr.f32.mxu1 %v1024_v43  ;;  %6722 = vmatmul.mubr.f32.gmra.mrb[14].mxu0 %v1032_v8  ;;  %v8127_v0 = vpop.trf.xlu0  ;;  %v1033_v37 = vsub.f32 %v8102_v49, %v1032_v8  ;;  %9558 = vst [vmem:[#allocation25_spill] sm:$0xff] %v8131_v60  ;;  %v8142_v27 = vpop.trf.xlu1  ;;  %v599_v8 = vsel %vm522_vm0, %v8005_v62, 0  ;;  %v1063_v49 = vsub.f32 %v8094_v40, %v1062_v35  ;;  %v1092_v61 = vand.u32 4294901760, %v8131_v60 }
 0x103   : > { %6724 = vmatprep.mubr.f32.mxu0 %v1042_v20  ;;  %v1082_v20 = vand.u32 4294901760, %v8121_v12  ;;  %v1073_v62 = vsub.f32 %v8108_v36, %v1072_v50  ;;  %v8158_v40 = vsub.f32 %v596_v15, %v8140_v39  ;;  %v8160_v11 = vand.u32 4294901760, %v599_v8  ;;  %9563 = vst [vmem:[#allocation30_spill] sm:$0xff] %v8167_v26 }
 0x104   : > { %v1034_v43 = vand.u32 4294901760, %v1033_v37  ;;  %v1054_v37 = vand.u32 4294901760, %v1053_v29  ;;  %v8174_v36 = vand.u32 4294901760, %v605_v6  ;;  %v1093_v63 = vsub.f32 %v8131_v60, %v1092_v61 }
 0x105   : > { %9561 = vst [vmem:[#allocation28_spill] sm:$0xff] %v8158_v40  ;;  %9562 = vst [vmem:[#allocation29_spill] sm:$0xff] %v8160_v11  ;;  %v1083_v29 = vsub.f32 %v8121_v12, %v1082_v20  ;;  %v1074_v22 = vand.u32 4294901760, %v1073_v62  ;;  %v611_v12 = vsel %vm522_vm0, %v8049_v1, 0 }
 0x106   : > { %6284 = vmatmul.mubr.f32.gmra.mrb[14].mxu1 %v1034_v43  ;;  %6725 = vmatmul.mubr.f32.gmra.mrb[16].mxu0 %v1052_v5  ;;  %v8150_v54 = vpop.trf.xlu0  ;;  %v1102_v5 = vand.u32 4294901760, %v8138_v25  ;;  %v8165_v43 = vpop.trf.xlu1  ;;  %9564 = vst [vmem:[#allocation31_spill] sm:$0xff] %v8174_v36  ;;  %v8195_v1 = vsub.f32 %v605_v6, %v8174_v36  ;;  %v1094_v42 = vand.u32 4294901760, %v1093_v63 }
 0x107   : > { %6286 = vmatprep.mubr.f32.mxu1 %v1044_v53  ;;  %6727 = vmatprep.mubr.f32.mxu0 %v1062_v35  ;;  %v1064_v35 = vand.u32 4294901760, %v1063_v49  ;;  %v608_v53 = vsel %vm522_vm0, %v8035_v41, 0  ;;  %v8179_v49 = vsub.f32 %v599_v8, %v8160_v11  ;;  %v1084_v62 = vand.u32 4294901760, %v1083_v29 }
 0x108   : > { %v1103_v41 = vsub.f32 %v8138_v25, %v1102_v5  ;;  %v614_v8 = vsel %vm522_vm0, %v8067_v21, 0  ;;  %9568 = vst [vmem:[#allocation35_spill] sm:$0xff] %v8195_v1  ;;  %v8197_v25 = vand.u32 4294901760, %v611_v12  ;;  %v617_v29 = vsel %vm522_vm0, %v8091_v9, 0 }
 0x109   : > { %9565 = vst [vmem:[#allocation32_spill] sm:$0xff] %v8179_v49  ;;  %v620_v21 = vsel %vm522_vm0, %v8104_v17, 0  ;;  %v1152_v17 = vand.u32 4294901760, %v8195_v1 }
 0x10a   : > { %6287 = vmatmul.mubr.f32.gmra.mrb[16].mxu1 %v1054_v37  ;;  %6728 = vmatmul.mubr.f32.gmra.mrb[18].mxu0 %v1072_v50  ;;  %v8172_v15 = vpop.trf.xlu0  ;;  %v1122_v50 = vand.u32 4294901760, %v8158_v40  ;;  %v8185_v37 = vpop.trf.xlu1  ;;  %9569 = vst [vmem:[#allocation36_spill] sm:$0xff] %v8197_v25  ;;  %v1104_v34 = vand.u32 4294901760, %v1103_v41  ;;  %v8215_v9 = vsub.f32 %v611_v12, %v8197_v25  ;;  %v626_v12 = vsel %vm522_vm0, %v8150_v54, 0 }
 0x10b   : > { %6289 = vmatprep.mubr.f32.mxu1 %v1064_v35  ;;  %6730 = vmatprep.mubr.f32.mxu0 %v1082_v20  ;;  %v8188_v35 = vsub.f32 %v602_v47, %v8167_v26  ;;  %v8190_v20 = vand.u32 4294901760, %v608_v53  ;;  %v1113_v47 = vsub.f32 %v8153_v19, %v1112_v52  ;;  %v8220_v19 = vand.u32 4294901760, %v620_v21 }
 0x10c   : > { %9572 = vst [vmem:[#allocation39_spill] sm:$0xff] %v8215_v9  ;;  %v1172_v54 = vand.u32 4294901760, %v8215_v9 }
 0x10d   : > { %9566 = vst [vmem:[#allocation33_spill] sm:$0xff] %v8188_v35  ;;  %9567 = vst [vmem:[#allocation34_spill] sm:$0xff] %v8190_v20  ;;  %v8209_v6 = vsub.f32 %v608_v53, %v8190_v20  ;;  %v1142_v63 = vand.u32 4294901760, %v8188_v35  ;;  %v623_v53 = vsel %vm522_vm0, %v8127_v0, 0 }
 0x10e   : > { %6290 = vmatmul.mubr.f32.gmra.mrb[18].mxu1 %v1074_v22  ;;  %6731 = vmatmul.mubr.f32.gmra.mrb[20].mxu0 %v1092_v61  ;;  %v414_v60 = vpop.trf.xlu0  ;;  %v1132_v61 = vand.u32 4294901760, %v8179_v49  ;;  %v1123_v22 = vsub.f32 %v8158_v40, %v1122_v50  ;;  %v8204_v26 = vpop.trf.xlu1  ;;  %v1114_v40 = vand.u32 4294901760, %v1113_v47  ;;  %9574 = vst [vmem:[#allocation41_spill] sm:$0xff] %v8220_v19  ;;  %v8234_v36 = vand.u32 4294901760, %v623_v53 }
 0x10f   : > { %6292 = vmatprep.mubr.f32.mxu1 %v1084_v62  ;;  %6733 = vmatprep.mubr.f32.mxu0 %v1102_v5  ;;  %9570 = vst [vmem:[#allocation37_spill] sm:$0xff] %v8209_v6  ;;  %v8211_v5 = vand.u32 4294901760, %v614_v8  ;;  %v8217_v62 = vand.u32 4294901760, %v617_v29  ;;  %v1162_v47 = vand.u32 4294901760, %v8209_v6 }
 0x110   : > { %v1124_v20 = vand.u32 4294901760, %v1123_v22  ;;  %9576 = vst [vmem:[#allocation43_spill] sm:$0xff] %v8234_v36  ;;  %v1153_v22 = vsub.f32 %v8195_v1, %v1152_v17 }
 0x111   : > { %9571 = vst [vmem:[#allocation38_spill] sm:$0xff] %v8211_v5  ;;  %9573 = vst [vmem:[#allocation40_spill] sm:$0xff] %v8217_v62  ;;  %v8237_v0 = vsub.f32 %v617_v29, %v8217_v62  ;;  %v1163_v29 = vsub.f32 %v8209_v6, %v1162_v47 }
 0x112   : > { %6293 = vmatmul.mubr.f32.gmra.mrb[20].mxu1 %v1094_v42  ;;  %6734 = vmatmul.mubr.f32.gmra.mrb[22].mxu0 %v1112_v52  ;;  %v415_v41 = vpop.trf.xlu0  ;;  %v1133_v42 = vsub.f32 %v8179_v49, %v1132_v61  ;;  %v8225_v52 = vpop.trf.xlu1 }
 0x113   : > { %6295 = vmatprep.mubr.f32.mxu1 %v1104_v34  ;;  %6736 = vmatprep.mubr.f32.mxu0 %v1122_v50  ;;  %v8230_v34 = vsub.f32 %v614_v8, %v8211_v5  ;;  %v1143_v50 = vsub.f32 %v8188_v35, %v1142_v63  ;;  %9577 = vst [vmem:[#allocation44_spill] sm:$0xff] %v8237_v0  ;;  %v8244_v35 = vand.u32 4294901760, %v626_v12 }
 0x114   : > { %v8242_v8 = vsub.f32 %v620_v21, %v8220_v19  ;;  %v1134_v49 = vand.u32 4294901760, %v1133_v42  ;;  %v8254_v21 = vsub.f32 %v623_v53, %v8234_v36  ;;  %v1154_v42 = vand.u32 4294901760, %v1153_v22 }
 0x115   : > { %9575 = vst [vmem:[#allocation42_spill] sm:$0xff] %v8230_v34  ;;  %9579 = vst [vmem:[#allocation46_spill] sm:$0xff] %v8244_v35  ;;  %v1144_v5 = vand.u32 4294901760, %v1143_v50  ;;  %v1173_v19 = vsub.f32 %v8215_v9, %v1172_v54  ;;  %v8259_v50 = vsub.f32 %v626_v12, %v8244_v35 }
 0x116   : > { %6296 = vmatmul.mubr.f32.gmra.mrb[22].mxu1 %v1114_v40  ;;  %6737 = vmatmul.mubr.f32.gmra.mrb[24].mxu0 %v1132_v61  ;;  %v416_v25 = vpop.trf.xlu0  ;;  %9578 = vst [vmem:[#allocation45_spill] sm:$0xff] %v8242_v8  ;;  %v8246_v40 = vpop.trf.xlu1  ;;  %v629_v61 = vsel %vm522_vm0, %v8172_v15, 0  ;;  %9580 = vst [vmem:[#allocation47_spill] sm:$0xff] %v8254_v21  ;;  %v1192_v15 = vand.u32 4294901760, %v8237_v0  ;;  %v1212_v35 = vand.u32 4294901760, %v8254_v21 }
 0x117   : > { %6298 = vmatprep.mubr.f32.mxu1 %v1124_v20  ;;  %6739 = vmatprep.mubr.f32.mxu0 %v1142_v63  ;;  %v1182_v20 = vand.u32 4294901760, %v8230_v34  ;;  %v632_v63 = vsel %vm522_vm0, %v414_v60, 0  ;;  %9581 = vst [vmem:[#allocation48_spill] sm:$0xff] %v8259_v50  ;;  %v8261_v6 = vand.u32 4294901760, %v629_v61  ;;  %v635_v60 = vsel %vm522_vm0, %v415_v41, 0 }
 0x118   : > { %v8267_v53 = vand.u32 4294901760, %v632_v63  ;;  %v638_v22 = vsel %vm522_vm0, %v416_v25, 0  ;;  %v8271_v12 = vand.u32 4294901760, %v635_v60  ;;  %v1193_v41 = vsub.f32 %v8237_v0, %v1192_v15 }
 0x119   : > { %9582 = vst [vmem:[#allocation49_spill] sm:$0xff] %v8261_v6  ;;  %v8276_v36 = vsub.f32 %v629_v61, %v8261_v6  ;;  %v1174_v62 = vand.u32 4294901760, %v1173_v19  ;;  %v1213_v6 = vsub.f32 %v8254_v21, %v1212_v35 }
 0x11a   : > { %6299 = vmatmul.mubr.f32.gmra.mrb[24].mxu1 %v1134_v49  ;;  %6740 = vmatmul.mubr.f32.gmra.mrb[26].mxu0 %v1152_v17  ;;  %v417_v1 = vpop.trf.xlu0  ;;  %v1202_v49 = vand.u32 4294901760, %v8242_v8  ;;  %v8265_v17 = vpop.trf.xlu1  ;;  %9583 = vst [vmem:[#allocation50_spill] sm:$0xff] %v8267_v53  ;;  %9584 = vst [vmem:[#allocation51_spill] sm:$0xff] %v8271_v12  ;;  %v8290_v19 = vsub.f32 %v635_v60, %v8271_v12 }
 0x11b   : > { %6301 = vmatprep.mubr.f32.mxu1 %v1144_v5  ;;  %6742 = vmatprep.mubr.f32.mxu0 %v1162_v47  ;;  %v1164_v5 = vand.u32 4294901760, %v1163_v29  ;;  %v1183_v47 = vsub.f32 %v8230_v34, %v1182_v20  ;;  %9585 = vst [vmem:[#allocation52_spill] sm:$0xff] %v8276_v36  ;;  %v1222_v34 = vand.u32 4294901760, %v8259_v50  ;;  %v1232_v11 = vand.u32 4294901760, %v8276_v36 }
 0x11c   : > { %v1203_v29 = vsub.f32 %v8242_v8, %v1202_v49  ;;  %9588 = vst [vmem:[#allocation55_spill] sm:$0xff] %v8290_v19  ;;  %v1194_v8 = vand.u32 4294901760, %v1193_v41 }
 0x11e   : > { %6302 = vmatmul.mubr.f32.gmra.mrb[26].mxu1 %v1154_v42  ;;  %6743 = vmatmul.mubr.f32.gmra.mrb[28].mxu0 %v1172_v54  ;;  %v418_v9 = vpop.trf.xlu0  ;;  %v8280_v25 = vpop.trf.xlu1  ;;  %v8283_v54 = vsub.f32 %v632_v63, %v8267_v53  ;;  %v8285_v42 = vand.u32 4294901760, %v638_v22  ;;  %v1204_v53 = vand.u32 4294901760, %v1203_v29  ;;  %v1214_v29 = vand.u32 4294901760, %v1213_v6 }
 0x11f   : > { %6304 = vmatprep.mubr.f32.mxu1 %v1164_v5  ;;  %6745 = vmatprep.mubr.f32.mxu0 %v1182_v20  ;;  %v641_v20 = vsel %vm522_vm0, %v417_v1, 0  ;;  %v1184_v5 = vand.u32 4294901760, %v1183_v47  ;;  %v644_v0 = vsel %vm522_vm0, %v418_v9, 0  ;;  %v1223_v1 = vsub.f32 %v8259_v50, %v1222_v34 }
 0x120   : > { %9586 = vst [vmem:[#allocation53_spill] sm:$0xff] %v8283_v54  ;;  %9587 = vst [vmem:[#allocation54_spill] sm:$0xff] %v8285_v42  ;;  %v8293_v63 = vand.u32 4294901760, %v641_v20  ;;  %v8300_v9 = vsub.f32 %v638_v22, %v8285_v42  ;;  %v1242_v60 = vand.u32 4294901760, %v8283_v54 }
 0x121   : > { %v1224_v21 = vand.u32 4294901760, %v1223_v1 }
 0x122   : > { %6305 = vmatmul.mubr.f32.gmra.mrb[28].mxu1 %v1174_v62  ;;  %6746 = vmatmul.mubr.f32.gmra.mrb[30].mxu0 %v1192_v15  ;;  %v419_v61 = vpop.trf.xlu0  ;;  %9589 = vst [vmem:[#allocation56_spill] sm:$0xff] %v8293_v63  ;;  %v8297_v47 = vpop.trf.xlu1  ;;  %9590 = vst [vmem:[#allocation57_spill] sm:$0xff] %v8300_v9  ;;  %v8302_v62 = vand.u32 4294901760, %v644_v0  ;;  %v8309_v50 = vsub.f32 %v641_v20, %v8293_v63  ;;  %v1262_v6 = vand.u32 4294901760, %v8300_v9 }
 0x123   : > { %6307 = vmatprep.mubr.f32.mxu1 %v1184_v5  ;;  %6748 = vmatprep.mubr.f32.mxu0 %v1202_v49  ;;  %v647_v15 = vsel %vm522_vm0, %v419_v61, 0  ;;  %v1252_v5 = vand.u32 4294901760, %v8290_v19  ;;  %v1233_v61 = vsub.f32 %v8276_v36, %v1232_v11 }
 0x124   : > { %9591 = vst [vmem:[#allocation58_spill] sm:$0xff] %v8302_v62  ;;  %9592 = vst [vmem:[#allocation59_spill] sm:$0xff] %v8309_v50  ;;  %v8311_v22 = vand.u32 4294901760, %v647_v15 }
 0x125   : > { %v1253_v1 = vsub.f32 %v8290_v19, %v1252_v5  ;;  %v1234_v36 = vand.u32 4294901760, %v1233_v61 }
 0x126   : > { %6308 = vmatmul.mubr.f32.gmra.mrb[30].mxu1 %v1194_v8  ;;  %6749 = vmatmul.mubr.f32.gmra.mrb[32].mxu0 %v1212_v35  ;;  %v420_v49 = vpop.trf.xlu0  ;;  %9593 = vst [vmem:[#allocation60_spill] sm:$0xff] %v8311_v22  ;;  %v8314_v42 = vpop.trf.xlu1  ;;  %v8317_v35 = vsub.f32 %v644_v0, %v8302_v62  ;;  %v1272_v62 = vand.u32 4294901760, %v8309_v50 }
 0x127   : > { %v650_v41 = vsel %vm522_vm0, %v420_v49, 0  ;;  %6310 = vmatprep.mubr.f32.mxu1 %v1204_v53  ;;  %6751 = vmatprep.mubr.f32.mxu0 %v1222_v34  ;;  %v1243_v34 = vsub.f32 %v8283_v54, %v1242_v60  ;;  %v8326_v49 = vsub.f32 %v647_v15, %v8311_v22  ;;  %v1254_v61 = vand.u32 4294901760, %v1253_v1 }
 0x128   : > { %9594 = vst [vmem:[#allocation61_spill] sm:$0xff] %v8317_v35  ;;  %v8319_v8 = vand.u32 4294901760, %v650_v41 }
 0x129   : > { %9596 = vst [vmem:[#allocation63_spill] sm:$0xff] %v8326_v49 }
 0x12a   : > { %9595 = vst [vmem:[#allocation62_spill] sm:$0xff] %v8319_v8  ;;  %6311 = vmatmul.mubr.f32.gmra.mrb[32].mxu1 %v1214_v29  ;;  %6752 = vmatmul.mubr.f32.gmra.mrb[34].mxu0 %v1232_v11  ;;  %v421_v53 = vpop.trf.xlu0  ;;  %v8331_v54 = vpop.trf.xlu1  ;;  %v8334_v29 = vsub.f32 %v650_v41, %v8319_v8  ;;  %v1244_v11 = vand.u32 4294901760, %v1243_v34  ;;  %v1273_v41 = vsub.f32 %v8309_v50, %v1272_v62  ;;  %v1292_v34 = vand.u32 4294901760, %v8326_v49 }
 0x12b   : > { %v653_v20 = vsel %vm522_vm0, %v421_v53, 0  ;;  %6313 = vmatprep.mubr.f32.mxu1 %v1224_v21  ;;  %6754 = vmatprep.mubr.f32.mxu0 %v1242_v60  ;;  %v1263_v53 = vsub.f32 %v8300_v9, %v1262_v6  ;;  %v1282_v21 = vand.u32 4294901760, %v8317_v35 }
 0x12c   : > { %v8328_v0 = vand.u32 4294901760, %v653_v20  ;;  %9598 = vst [vmem:[#allocation65_spill] sm:$0xff] %v8334_v29  ;;  %v1293_v50 = vsub.f32 %v8326_v49, %v1292_v34 }
 0x12d   : > { %v1264_v8 = vand.u32 4294901760, %v1263_v53 }
 0x12e   : > { %9597 = vst [vmem:[#allocation64_spill] sm:$0xff] %v8328_v0  ;;  %6314 = vmatmul.mubr.f32.gmra.mrb[34].mxu1 %v1234_v36  ;;  %6755 = vmatmul.mubr.f32.gmra.mrb[36].mxu0 %v1252_v5  ;;  %v422_v60 = vpop.trf.xlu0  ;;  %v8340_v19 = vsub.f32 %v653_v20, %v8328_v0  ;;  %v8346_v9 = vpop.trf.xlu1  ;;  %v1283_v36 = vsub.f32 %v8317_v35, %v1282_v21  ;;  %v1302_v5 = vand.u32 4294901760, %v8334_v29  ;;  %v1274_v35 = vand.u32 4294901760, %v1273_v41 }
 0x12f   : > { %v656_v15 = vsel %vm522_vm0, %v422_v60, 0  ;;  %6316 = vmatprep.mubr.f32.mxu1 %v1244_v11  ;;  %6757 = vmatprep.mubr.f32.mxu0 %v1262_v6  ;;  %v668_v6 = vsel %vm522_vm0, %v8118_v24, 0  ;;  %v671_v11 = vsel %vm522_vm0, %v8142_v27, 0  ;;  %v1294_v49 = vand.u32 4294901760, %v1293_v50 }
 0x130   : > { %9599 = vst [vmem:[#allocation66_spill] sm:$0xff] %v8340_v19  ;;  %v8342_v22 = vand.u32 4294901760, %v656_v15  ;;  %v1312_v24 = vand.u32 4294901760, %v8340_v19  ;;  %v680_v50 = vsel %vm522_vm0, %v8204_v26, 0 }
 0x132   : > { %9600 = vst [vmem:[#allocation67_spill] sm:$0xff] %v8342_v22  ;;  %v8353_v1 = vsub.f32 %v656_v15, %v8342_v22  ;;  %6317 = vmatmul.mubr.f32.gmra.mrb[36].mxu1 %v1254_v61  ;;  %6758 = vmatmul.mubr.f32.gmra.mrb[38].mxu0 %v1272_v62  ;;  %v423_v20 = vpop.trf.xlu0  ;;  %v8362_v0 = vpop.trf.xlu1  ;;  %v8364_v15 = vand.u32 4294901760, %v668_v6  ;;  %v1284_v62 = vand.u32 4294901760, %v1283_v36  ;;  %v1303_v61 = vsub.f32 %v8334_v29, %v1302_v5 }
 0x133   : > { %v659_v60 = vsel %vm522_vm0, %v423_v20, 0  ;;  %6319 = vmatprep.mubr.f32.mxu1 %v1264_v8  ;;  %6760 = vmatprep.mubr.f32.mxu0 %v1282_v21  ;;  %v8368_v22 = vand.u32 4294901760, %v671_v11  ;;  %v674_v8 = vsel %vm522_vm0, %v8165_v43, 0  ;;  %v677_v20 = vsel %vm522_vm0, %v8185_v37, 0 }
 0x134   : > { %9601 = vst [vmem:[#allocation68_spill] sm:$0xff] %v8353_v1  ;;  %v8358_v53 = vand.u32 4294901760, %v659_v60  ;;  %9603 = vst [vmem:[#allocation70_spill] sm:$0xff] %v8364_v15  ;;  %v1322_v27 = vand.u32 4294901760, %v8353_v1  ;;  %v1313_v63 = vsub.f32 %v8340_v19, %v1312_v24  ;;  %v8398_v19 = vand.u32 4294901760, %v677_v20 }
 0x135   : > { %9604 = vst [vmem:[#allocation71_spill] sm:$0xff] %v8368_v22 }
 0x136   : > { %9602 = vst [vmem:[#allocation69_spill] sm:$0xff] %v8358_v53  ;;  %v8373_v21 = vsub.f32 %v659_v60, %v8358_v53  ;;  %6320 = vmatmul.mubr.f32.gmra.mrb[38].mxu1 %v1274_v35  ;;  %6761 = vmatmul.mubr.f32.gmra.mrb[40].mxu0 %v1292_v34  ;;  %v424_v41 = vpop.trf.xlu0  ;;  %v8382_v12 = vpop.trf.xlu1  ;;  %v8385_v35 = vsub.f32 %v668_v6, %v8364_v15  ;;  %v8387_v34 = vand.u32 4294901760, %v674_v8  ;;  %v1304_v60 = vand.u32 4294901760, %v1303_v61 }
 0x137   : > { %v662_v36 = vsel %vm522_vm0, %v424_v41, 0  ;;  %6322 = vmatprep.mubr.f32.mxu1 %v1284_v62  ;;  %6763 = vmatprep.mubr.f32.mxu0 %v1302_v5  ;;  %v1323_v37 = vsub.f32 %v8353_v1, %v1322_v27  ;;  %v8391_v62 = vsub.f32 %v671_v11, %v8368_v22  ;;  %9611 = vst [vmem:[#allocation78_spill] sm:$0xff] %v8398_v19  ;;  %v683_v6 = vsel %vm522_vm0, %v8225_v52, 0 }
 0x138   : > { %9605 = vst [vmem:[#allocation72_spill] sm:$0xff] %v8373_v21  ;;  %v8378_v29 = vand.u32 4294901760, %v662_v36  ;;  %v1332_v43 = vand.u32 4294901760, %v8373_v21  ;;  %9607 = vst [vmem:[#allocation74_spill] sm:$0xff] %v8385_v35  ;;  %v686_v61 = vsel %vm522_vm0, %v8246_v40, 0  ;;  %v1314_v26 = vand.u32 4294901760, %v1313_v63 }
 0x139   : > { %9608 = vst [vmem:[#allocation75_spill] sm:$0xff] %v8387_v34  ;;  %9609 = vst [vmem:[#allocation76_spill] sm:$0xff] %v8391_v62  ;;  %v8412_v22 = vsub.f32 %v674_v8, %v8387_v34  ;;  %v8414_v52 = vand.u32 4294901760, %v680_v50  ;;  %v1324_v15 = vand.u32 4294901760, %v1323_v37  ;;  %v1362_v40 = vand.u32 4294901760, %v8385_v35 }
 0x13a   : > { %9606 = vst [vmem:[#allocation73_spill] sm:$0xff] %v8378_v29  ;;  %v8396_v5 = vsub.f32 %v662_v36, %v8378_v29  ;;  %6323 = vmatmul.mubr.f32.gmra.mrb[40].mxu1 %v1294_v49  ;;  %6764 = vmatmul.mubr.f32.gmra.mrb[42].mxu0 %v1312_v24  ;;  %v425_v41 = vpop.trf.xlu0  ;;  %v1333_v49 = vsub.f32 %v8373_v21, %v1332_v43  ;;  %v8409_v24 = vpop.trf.xlu1  ;;  %v8426_v21 = vand.u32 4294901760, %v683_v6  ;;  %v8428_v8 = vand.u32 4294901760, %v686_v61 }
 0x13b   : > { %v665_v11 = vsel %vm522_vm0, %v425_v41, 0  ;;  %6325 = vmatprep.mubr.f32.mxu1 %v1304_v60  ;;  %6766 = vmatprep.mubr.f32.mxu0 %v1322_v27  ;;  %9613 = vst [vmem:[#allocation80_spill] sm:$0xff] %v8412_v22  ;;  %9614 = vst [vmem:[#allocation81_spill] sm:$0xff] %v8414_v52  ;;  %v8424_v41 = vsub.f32 %v677_v20, %v8398_v19  ;;  %v1372_v37 = vand.u32 4294901760, %v8391_v62 }
 0x13c   : > { %9610 = vst [vmem:[#allocation77_spill] sm:$0xff] %v8396_v5  ;;  %v8405_v1 = vand.u32 4294901760, %v665_v11  ;;  %v1342_v36 = vand.u32 4294901760, %v8396_v5  ;;  %9617 = vst [vmem:[#allocation84_spill] sm:$0xff] %v8426_v21  ;;  %v8437_v20 = vsub.f32 %v680_v50, %v8414_v52 }
 0x13d   : > { %9616 = vst [vmem:[#allocation83_spill] sm:$0xff] %v8424_v41  ;;  %9618 = vst [vmem:[#allocation85_spill] sm:$0xff] %v8428_v8  ;;  %v1373_v50 = vsub.f32 %v8391_v62, %v1372_v37 }
 0x13e   : > { %9612 = vst [vmem:[#allocation79_spill] sm:$0xff] %v8405_v1  ;;  %v8418_v60 = vsub.f32 %v665_v11, %v8405_v1  ;;  %6326 = vmatmul.mubr.f32.gmra.mrb[42].mxu1 %v1314_v26  ;;  %6767 = vmatmul.mubr.f32.gmra.mrb[44].mxu0 %v1332_v43  ;;  %v8420_v63 = vpop.trf.xlu0  ;;  %v1343_v27 = vsub.f32 %v8396_v5, %v1342_v36  ;;  %v689_v11 = vsel %vm522_vm0, %v8265_v17, 0  ;;  %v1334_v26 = vand.u32 4294901760, %v1333_v49  ;;  %v8434_v1 = vpop.trf.xlu1 }
 0x13f   : > { %6328 = vmatprep.mubr.f32.mxu1 %v1324_v15  ;;  %6769 = vmatprep.mubr.f32.mxu0 %v1342_v36  ;;  %9619 = vst [vmem:[#allocation86_spill] sm:$0xff] %v8437_v20  ;;  %v692_v5 = vsel %vm522_vm0, %v8280_v25, 0  ;;  %v1363_v15 = vsub.f32 %v8385_v35, %v1362_v40  ;;  %v1382_v36 = vand.u32 4294901760, %v8412_v22  ;;  %v8447_v49 = vsub.f32 %v683_v6, %v8426_v21 }
 0x140   : > { %9615 = vst [vmem:[#allocation82_spill] sm:$0xff] %v8418_v60  ;;  %v1352_v43 = vand.u32 4294901760, %v8418_v60  ;;  %v1344_v34 = vand.u32 4294901760, %v1343_v27  ;;  %v8449_v27 = vand.u32 4294901760, %v689_v11  ;;  %v1392_v25 = vand.u32 4294901760, %v8424_v41 }
 0x141   : > { %9620 = vst [vmem:[#allocation87_spill] sm:$0xff] %v8447_v49  ;;  %v8454_v35 = vsub.f32 %v686_v61, %v8428_v8  ;;  %v695_v6 = vsel %vm522_vm0, %v8297_v47, 0 }
 0x142   : > { %6329 = vmatmul.mubr.f32.gmra.mrb[44].mxu1 %v1334_v26  ;;  %6770 = vmatmul.mubr.f32.gmra.mrb[46].mxu0 %v1352_v43  ;;  %v8443_v19 = vpop.trf.xlu0  ;;  %v1353_v17 = vsub.f32 %v8418_v60, %v1352_v43  ;;  %9621 = vst [vmem:[#allocation88_spill] sm:$0xff] %v8449_v27  ;;  %v8456_v26 = vand.u32 4294901760, %v692_v5  ;;  %v8458_v29 = vpop.trf.xlu1  ;;  %v1364_v43 = vand.u32 4294901760, %v1363_v15  ;;  %v1383_v60 = vsub.f32 %v8412_v22, %v1382_v36 }
 0x143   : > { %6331 = vmatprep.mubr.f32.mxu1 %v1344_v34  ;;  %6772 = vmatprep.mubr.f32.mxu0 %v1362_v40  ;;  %9622 = vst [vmem:[#allocation89_spill] sm:$0xff] %v8454_v35  ;;  %v1402_v34 = vand.u32 4294901760, %v8437_v20  ;;  %v698_v40 = vsel %vm522_vm0, %v8314_v42, 0  ;;  %v8469_v62 = vsub.f32 %v689_v11, %v8449_v27  ;;  %v1393_v47 = vsub.f32 %v8424_v41, %v1392_v25 }
 0x144   : > { %9623 = vst [vmem:[#allocation90_spill] sm:$0xff] %v8456_v26  ;;  %v1354_v52 = vand.u32 4294901760, %v1353_v17  ;;  %v1374_v17 = vand.u32 4294901760, %v1373_v50  ;;  %v1412_v15 = vand.u32 4294901760, %v8447_v49  ;;  %v8474_v22 = vsub.f32 %v692_v5, %v8456_v26 }
 0x145   : > { %9624 = vst [vmem:[#allocation91_spill] sm:$0xff] %v8469_v62  ;;  %v8476_v8 = vand.u32 4294901760, %v695_v6  ;;  %v701_v42 = vsel %vm522_vm0, %v8331_v54, 0  ;;  %v8483_v11 = vand.u32 4294901760, %v698_v40  ;;  %v1403_v50 = vsub.f32 %v8437_v20, %v1402_v34 }
 0x146   : > { %6332 = vmatmul.mubr.f32.gmra.mrb[46].mxu1 %v1354_v52  ;;  %6773 = vmatmul.mubr.f32.gmra.mrb[48].mxu0 %v1372_v37  ;;  %v8466_v61 = vpop.trf.xlu0  ;;  %9625 = vst [vmem:[#allocation92_spill] sm:$0xff] %v8474_v22  ;;  %v1422_v52 = vand.u32 4294901760, %v8454_v35  ;;  %v8481_v37 = vpop.trf.xlu1  ;;  %v8490_v41 = vand.u32 4294901760, %v701_v42  ;;  %v1394_v54 = vand.u32 4294901760, %v1393_v47  ;;  %v1413_v26 = vsub.f32 %v8447_v49, %v1412_v15 }
 0x147   : > { %6334 = vmatprep.mubr.f32.mxu1 %v1364_v43  ;;  %6775 = vmatprep.mubr.f32.mxu0 %v1382_v36  ;;  %9626 = vst [vmem:[#allocation93_spill] sm:$0xff] %v8476_v8  ;;  %9627 = vst [vmem:[#allocation94_spill] sm:$0xff] %v8483_v11  ;;  %v1384_v36 = vand.u32 4294901760, %v1383_v60  ;;  %v704_v43 = vsel %vm522_vm0, %v8346_v9, 0  ;;  %v1432_v27 = vand.u32 4294901760, %v8469_v62  ;;  %v8495_v60 = vsub.f32 %v695_v6, %v8476_v8 }
 0x148   : > { %9628 = vst [vmem:[#allocation95_spill] sm:$0xff] %v8490_v41  ;;  %v707_v20 = vsel %vm522_vm0, %v8362_v0, 0  ;;  %v1423_v9 = vsub.f32 %v8454_v35, %v1422_v52  ;;  %v1404_v47 = vand.u32 4294901760, %v1403_v50  ;;  %v710_v6 = vsel %vm522_vm0, %v8382_v12, 0 }
 0x149   : > { %9629 = vst [vmem:[#allocation96_spill] sm:$0xff] %v8495_v60  ;;  %v8511_v0 = vsub.f32 %v701_v42, %v8490_v41  ;;  %v8513_v35 = vand.u32 4294901760, %v707_v20  ;;  %v1414_v8 = vand.u32 4294901760, %v1413_v26  ;;  %v713_v50 = vsel %vm522_vm0, %v8409_v24, 0 }
 0x14a   : > { %6335 = vmatmul.mubr.f32.gmra.mrb[48].mxu1 %v1374_v17  ;;  %6776 = vmatmul.mubr.f32.gmra.mrb[50].mxu0 %v1392_v25  ;;  %v8488_v5 = vpop.trf.xlu0  ;;  %v1442_v25 = vand.u32 4294901760, %v8474_v22  ;;  %v8501_v17 = vpop.trf.xlu1  ;;  %v716_v12 = vsel %vm522_vm0, %v8420_v63, 0 }
 0x14b   : > { %6337 = vmatprep.mubr.f32.mxu1 %v1384_v36  ;;  %6778 = vmatprep.mubr.f32.mxu0 %v1402_v34  ;;  %v8504_v36 = vsub.f32 %v698_v40, %v8483_v11  ;;  %v8506_v34 = vand.u32 4294901760, %v704_v43  ;;  %9632 = vst [vmem:[#allocation99_spill] sm:$0xff] %v8511_v0  ;;  %9633 = vst [vmem:[#allocation100_spill] sm:$0xff] %v8513_v35  ;;  %v1433_v40 = vsub.f32 %v8469_v62, %v1432_v27 }
 0x14c   : > { %v1424_v11 = vand.u32 4294901760, %v1423_v9  ;;  %v8531_v24 = vsub.f32 %v707_v20, %v8513_v35  ;;  %v1472_v63 = vand.u32 4294901760, %v8511_v0  ;;  %v8536_v62 = vand.u32 4294901760, %v716_v12 }
 0x14d   : > { %9630 = vst [vmem:[#allocation97_spill] sm:$0xff] %v8504_v36  ;;  %9631 = vst [vmem:[#allocation98_spill] sm:$0xff] %v8506_v34  ;;  %v8525_v42 = vsub.f32 %v704_v43, %v8506_v34  ;;  %v1462_v26 = vand.u32 4294901760, %v8504_v36  ;;  %v719_v43 = vsel %vm522_vm0, %v8443_v19, 0  ;;  %v722_v20 = vsel %vm522_vm0, %v8466_v61, 0 }
 0x14e   : > { %6338 = vmatmul.mubr.f32.gmra.mrb[50].mxu1 %v1394_v54  ;;  %6779 = vmatmul.mubr.f32.gmra.mrb[52].mxu0 %v1412_v15  ;;  %v478_v49 = vpop.trf.xlu0  ;;  %v1452_v15 = vand.u32 4294901760, %v8495_v60  ;;  %v1443_v54 = vsub.f32 %v8474_v22, %v1442_v25  ;;  %v8520_v21 = vpop.trf.xlu1  ;;  %9636 = vst [vmem:[#allocation103_spill] sm:$0xff] %v8531_v24  ;;  %v1434_v22 = vand.u32 4294901760, %v1433_v40  ;;  %9638 = vst [vmem:[#allocation105_spill] sm:$0xff] %v8536_v62  ;;  %v8550_v41 = vand.u32 4294901760, %v719_v43 }
 0x14f   : > { %6340 = vmatprep.mubr.f32.mxu1 %v1404_v47  ;;  %6781 = vmatprep.mubr.f32.mxu0 %v1422_v52  ;;  %9634 = vst [vmem:[#allocation101_spill] sm:$0xff] %v8525_v42  ;;  %v8527_v52 = vand.u32 4294901760, %v710_v6  ;;  %v8533_v47 = vand.u32 4294901760, %v713_v50  ;;  %v1482_v40 = vand.u32 4294901760, %v8525_v42  ;;  %v1492_v61 = vand.u32 4294901760, %v8531_v24 }
 0x150   : > { %v1444_v34 = vand.u32 4294901760, %v1443_v54  ;;  %9640 = vst [vmem:[#allocation107_spill] sm:$0xff] %v8550_v41  ;;  %v1473_v54 = vsub.f32 %v8511_v0, %v1472_v63 }
 0x151   : > { %9635 = vst [vmem:[#allocation102_spill] sm:$0xff] %v8527_v52  ;;  %9637 = vst [vmem:[#allocation104_spill] sm:$0xff] %v8533_v47  ;;  %v8553_v19 = vsub.f32 %v713_v50, %v8533_v47  ;;  %v1483_v50 = vsub.f32 %v8525_v42, %v1482_v40 }
 0x152   : > { %6341 = vmatmul.mubr.f32.gmra.mrb[52].mxu1 %v1414_v8  ;;  %6782 = vmatmul.mubr.f32.gmra.mrb[54].mxu0 %v1432_v27  ;;  %v479_v9 = vpop.trf.xlu0  ;;  %v1453_v8 = vsub.f32 %v8495_v60, %v1452_v15  ;;  %v8541_v27 = vpop.trf.xlu1 }
 0x153   : > { %6343 = vmatprep.mubr.f32.mxu1 %v1424_v11  ;;  %6784 = vmatprep.mubr.f32.mxu0 %v1442_v25  ;;  %v8546_v11 = vsub.f32 %v710_v6, %v8527_v52  ;;  %v1463_v25 = vsub.f32 %v8504_v36, %v1462_v26  ;;  %9641 = vst [vmem:[#allocation108_spill] sm:$0xff] %v8553_v19  ;;  %v8560_v36 = vand.u32 4294901760, %v722_v20 }
 0x154   : > { %v8558_v6 = vsub.f32 %v716_v12, %v8536_v62  ;;  %v1454_v60 = vand.u32 4294901760, %v1453_v8  ;;  %v8570_v12 = vsub.f32 %v719_v43, %v8550_v41  ;;  %v1474_v8 = vand.u32 4294901760, %v1473_v54 }
 0x155   : > { %9639 = vst [vmem:[#allocation106_spill] sm:$0xff] %v8546_v11  ;;  %9643 = vst [vmem:[#allocation110_spill] sm:$0xff] %v8560_v36  ;;  %v1464_v52 = vand.u32 4294901760, %v1463_v25  ;;  %v1493_v62 = vsub.f32 %v8531_v24, %v1492_v61  ;;  %v8575_v25 = vsub.f32 %v722_v20, %v8560_v36  ;;  %v1484_v43 = vand.u32 4294901760, %v1483_v50 }
 0x156   : > { %6344 = vmatmul.mubr.f32.gmra.mrb[54].mxu1 %v1434_v22  ;;  %6785 = vmatmul.mubr.f32.gmra.mrb[56].mxu0 %v1452_v15  ;;  %v480_v35 = vpop.trf.xlu0  ;;  %9642 = vst [vmem:[#allocation109_spill] sm:$0xff] %v8558_v6  ;;  %v8562_v22 = vpop.trf.xlu1  ;;  %v725_v15 = vsel %vm522_vm0, %v8488_v5, 0  ;;  %9644 = vst [vmem:[#allocation111_spill] sm:$0xff] %v8570_v12  ;;  %v1512_v5 = vand.u32 4294901760, %v8553_v19  ;;  %v1532_v36 = vand.u32 4294901760, %v8570_v12 }
 0x157   : > { %6346 = vmatprep.mubr.f32.mxu1 %v1444_v34  ;;  %6787 = vmatprep.mubr.f32.mxu0 %v1462_v26  ;;  %v1502_v34 = vand.u32 4294901760, %v8546_v11  ;;  %v728_v26 = vsel %vm522_vm0, %v478_v49, 0  ;;  %9645 = vst [vmem:[#allocation112_spill] sm:$0xff] %v8575_v25  ;;  %v8577_v42 = vand.u32 4294901760, %v725_v15  ;;  %v731_v49 = vsel %vm522_vm0, %v479_v9, 0 }
 0x158   : > { %v8587_v20 = vand.u32 4294901760, %v731_v49  ;;  %v1513_v9 = vsub.f32 %v8553_v19, %v1512_v5  ;;  %v1494_v50 = vand.u32 4294901760, %v1493_v62 }
 0x159   : > { %9646 = vst [vmem:[#allocation113_spill] sm:$0xff] %v8577_v42  ;;  %v8592_v41 = vsub.f32 %v725_v15, %v8577_v42 }
 0x15a   : > { %6347 = vmatmul.mubr.f32.gmra.mrb[56].mxu1 %v1454_v60  ;;  %6788 = vmatmul.mubr.f32.gmra.mrb[58].mxu0 %v1472_v63  ;;  %v481_v0 = vpop.trf.xlu0  ;;  %v1522_v60 = vand.u32 4294901760, %v8558_v6  ;;  %v8581_v63 = vand.u32 4294901760, %v728_v26  ;;  %v8585_v24 = vpop.trf.xlu1  ;;  %9648 = vst [vmem:[#allocation115_spill] sm:$0xff] %v8587_v20  ;;  %v8604_v15 = vsub.f32 %v731_v49, %v8587_v20  ;;  %v1514_v62 = vand.u32 4294901760, %v1513_v9 }
 0x15b   : > { %6349 = vmatprep.mubr.f32.mxu1 %v1464_v52  ;;  %6790 = vmatprep.mubr.f32.mxu0 %v1482_v40  ;;  %v1503_v52 = vsub.f32 %v8546_v11, %v1502_v34  ;;  %v734_v40 = vsel %vm522_vm0, %v480_v35, 0  ;;  %9649 = vst [vmem:[#allocation116_spill] sm:$0xff] %v8592_v41  ;;  %v1542_v35 = vand.u32 4294901760, %v8575_v25  ;;  %v1552_v42 = vand.u32 4294901760, %v8592_v41 }
 0x15c   : > { %9647 = vst [vmem:[#allocation114_spill] sm:$0xff] %v8581_v63  ;;  %v1523_v11 = vsub.f32 %v8558_v6, %v1522_v60  ;;  %9652 = vst [vmem:[#allocation119_spill] sm:$0xff] %v8604_v15  ;;  %v1533_v6 = vsub.f32 %v8570_v12, %v1532_v36 }
 0x15e   : > { %6350 = vmatmul.mubr.f32.gmra.mrb[58].mxu1 %v1474_v8  ;;  %6791 = vmatmul.mubr.f32.gmra.mrb[60].mxu0 %v1492_v61  ;;  %v482_v54 = vpop.trf.xlu0  ;;  %v8597_v61 = vsub.f32 %v728_v26, %v8581_v63  ;;  %v8599_v8 = vand.u32 4294901760, %v734_v40  ;;  %v1524_v63 = vand.u32 4294901760, %v1523_v11 }
 0x15f   : > { %6352 = vmatprep.mubr.f32.mxu1 %v1484_v43  ;;  %6793 = vmatprep.mubr.f32.mxu0 %v1502_v34  ;;  %v737_v43 = vsel %vm522_vm0, %v481_v0, 0  ;;  %v1504_v34 = vand.u32 4294901760, %v1503_v52  ;;  %v740_v19 = vsel %vm522_vm0, %v482_v54, 0  ;;  %v1543_v0 = vsub.f32 %v8575_v25, %v1542_v35  ;;  %v8611_v52 = vpop.trf.xlu1 }
 0x160   : > { %9650 = vst [vmem:[#allocation117_spill] sm:$0xff] %v8597_v61  ;;  %9651 = vst [vmem:[#allocation118_spill] sm:$0xff] %v8599_v8  ;;  %v8607_v26 = vand.u32 4294901760, %v737_v43  ;;  %v8616_v54 = vand.u32 4294901760, %v740_v19 }
 0x161   : > { %v1544_v12 = vand.u32 4294901760, %v1543_v0 }
 0x162   : > { %6353 = vmatmul.mubr.f32.gmra.mrb[60].mxu1 %v1494_v50  ;;  %6794 = vmatmul.mubr.f32.gmra.mrb[62].mxu0 %v1512_v5  ;;  %v483_v47 = vpop.trf.xlu0  ;;  %v8614_v5 = vsub.f32 %v734_v40, %v8599_v8  ;;  %9654 = vst [vmem:[#allocation121_spill] sm:$0xff] %v8616_v54  ;;  %v1534_v50 = vand.u32 4294901760, %v1533_v6  ;;  %v8623_v25 = vsub.f32 %v737_v43, %v8607_v26 }
 0x163   : > { %6355 = vmatprep.mubr.f32.mxu1 %v1504_v34  ;;  %6796 = vmatprep.mubr.f32.mxu0 %v1522_v60  ;;  %v743_v49 = vsel %vm522_vm0, %v483_v47, 0  ;;  %v1562_v60 = vand.u32 4294901760, %v8597_v61  ;;  %v1572_v34 = vand.u32 4294901760, %v8604_v15  ;;  %v1553_v47 = vsub.f32 %v8592_v41, %v1552_v42 }
 0x164   : > { %9653 = vst [vmem:[#allocation120_spill] sm:$0xff] %v8614_v5  ;;  %9655 = vst [vmem:[#allocation122_spill] sm:$0xff] %v8623_v25  ;;  %v8625_v40 = vand.u32 4294901760, %v743_v49  ;;  %v8629_v8 = vsub.f32 %v740_v19, %v8616_v54 }
 0x165   : > { %v1573_v0 = vsub.f32 %v8604_v15, %v1572_v34  ;;  %v1554_v41 = vand.u32 4294901760, %v1553_v47 }
 0x166   : > { %6356 = vmatmul.mubr.f32.gmra.mrb[62].mxu1 %v1514_v62  ;;  %6797 = vmatmul.mubr.f32.gmra.mrb[64].mxu0 %v1532_v36  ;;  %v484_v9 = vpop.trf.xlu0  ;;  %9656 = vst [vmem:[#allocation123_spill] sm:$0xff] %v8625_v40  ;;  %9657 = vst [vmem:[#allocation124_spill] sm:$0xff] %v8629_v8  ;;  %v1563_v62 = vsub.f32 %v8597_v61, %v1562_v60  ;;  %v8640_v19 = vsub.f32 %v743_v49, %v8625_v40  ;;  %v1592_v61 = vand.u32 4294901760, %v8623_v25 }
 0x167   : > { %v746_v11 = vsel %vm522_vm0, %v484_v9, 0  ;;  %6358 = vmatprep.mubr.f32.mxu1 %v1524_v63  ;;  %6799 = vmatprep.mubr.f32.mxu0 %v1542_v35  ;;  %v1582_v63 = vand.u32 4294901760, %v8614_v5  ;;  %v8635_v35 = vpop.trf.xlu1  ;;  %v1574_v49 = vand.u32 4294901760, %v1573_v0 }
 0x168   : > { %v8631_v36 = vand.u32 4294901760, %v746_v11  ;;  %9659 = vst [vmem:[#allocation126_spill] sm:$0xff] %v8640_v19 }
 0x169   : > { %v1583_v54 = vsub.f32 %v8614_v5, %v1582_v63 }
 0x16a   : > { %9658 = vst [vmem:[#allocation125_spill] sm:$0xff] %v8631_v36  ;;  %6359 = vmatmul.mubr.f32.gmra.mrb[64].mxu1 %v1534_v50  ;;  %6800 = vmatmul.mubr.f32.gmra.mrb[66].mxu0 %v1552_v42  ;;  %v485_v6 = vpop.trf.xlu0  ;;  %v8646_v50 = vsub.f32 %v746_v11, %v8631_v36  ;;  %v1564_v42 = vand.u32 4294901760, %v1563_v62  ;;  %v1593_v11 = vsub.f32 %v8623_v25, %v1592_v61  ;;  %v1612_v62 = vand.u32 4294901760, %v8640_v19 }
 0x16b   : > { %v749_v43 = vsel %vm522_vm0, %v485_v6, 0  ;;  %6361 = vmatprep.mubr.f32.mxu1 %v1544_v12  ;;  %6802 = vmatprep.mubr.f32.mxu0 %v1562_v60  ;;  %v1602_v6 = vand.u32 4294901760, %v8629_v8  ;;  %v8658_v5 = vpop.trf.xlu1  ;;  %v1584_v36 = vand.u32 4294901760, %v1583_v54 }
 0x16c   : > { %v8642_v9 = vand.u32 4294901760, %v749_v43  ;;  %9661 = vst [vmem:[#allocation128_spill] sm:$0xff] %v8646_v50  ;;  %v1613_v25 = vsub.f32 %v8640_v19, %v1612_v62 }
 0x16e   : > { %9660 = vst [vmem:[#allocation127_spill] sm:$0xff] %v8642_v9  ;;  %6362 = vmatmul.mubr.f32.gmra.mrb[66].mxu1 %v1554_v41  ;;  %6803 = vmatmul.mubr.f32.gmra.mrb[68].mxu0 %v1572_v34  ;;  %v486_v12 = vpop.trf.xlu0  ;;  %v8652_v47 = vsub.f32 %v749_v43, %v8642_v9  ;;  %v1603_v41 = vsub.f32 %v8629_v8, %v1602_v6  ;;  %v1622_v34 = vand.u32 4294901760, %v8646_v50  ;;  %v1594_v8 = vand.u32 4294901760, %v1593_v11 }
 0x16f   : > { %v752_v60 = vsel %vm522_vm0, %v486_v12, 0  ;;  %6364 = vmatprep.mubr.f32.mxu1 %v1564_v42  ;;  %6805 = vmatprep.mubr.f32.mxu0 %v1582_v63  ;;  %v764_v63 = vsel %vm522_vm0, %v8434_v1, 0  ;;  %v767_v42 = vsel %vm522_vm0, %v8458_v29, 0  ;;  %v770_v29 = vsel %vm522_vm0, %v8481_v37, 0  ;;  %v8685_v11 = vpop.trf.xlu1 }
 0x170   : > { %9662 = vst [vmem:[#allocation129_spill] sm:$0xff] %v8652_v47  ;;  %v8654_v15 = vand.u32 4294901760, %v752_v60  ;;  %v1632_v1 = vand.u32 4294901760, %v8652_v47  ;;  %v8674_v9 = vand.u32 4294901760, %v764_v63  ;;  %v1614_v19 = vand.u32 4294901760, %v1613_v25 }
 0x172   : > { %9663 = vst [vmem:[#allocation130_spill] sm:$0xff] %v8654_v15  ;;  %v8665_v0 = vsub.f32 %v752_v60, %v8654_v15  ;;  %6365 = vmatmul.mubr.f32.gmra.mrb[68].mxu1 %v1574_v49  ;;  %6806 = vmatmul.mubr.f32.gmra.mrb[70].mxu0 %v1592_v61  ;;  %v487_v43 = vpop.trf.xlu0  ;;  %9666 = vst [vmem:[#allocation133_spill] sm:$0xff] %v8674_v9  ;;  %v1604_v60 = vand.u32 4294901760, %v1603_v41  ;;  %v1623_v61 = vsub.f32 %v8646_v50, %v1622_v34 }
 0x173   : > { %v755_v12 = vsel %vm522_vm0, %v487_v43, 0  ;;  %6367 = vmatprep.mubr.f32.mxu1 %v1584_v36  ;;  %6808 = vmatprep.mubr.f32.mxu0 %v1602_v6  ;;  %v8678_v15 = vand.u32 4294901760, %v767_v42  ;;  %v773_v41 = vsel %vm522_vm0, %v8501_v17, 0  ;;  %v1633_v37 = vsub.f32 %v8652_v47, %v1632_v1 }
 0x174   : > { %9664 = vst [vmem:[#allocation131_spill] sm:$0xff] %v8665_v0  ;;  %v8670_v54 = vand.u32 4294901760, %v755_v12  ;;  %v1642_v49 = vand.u32 4294901760, %v8665_v0 }
 0x175   : > { %9667 = vst [vmem:[#allocation134_spill] sm:$0xff] %v8678_v15  ;;  %v8701_v17 = vsub.f32 %v767_v42, %v8678_v15 }
 0x176   : > { %9665 = vst [vmem:[#allocation132_spill] sm:$0xff] %v8670_v54  ;;  %v8683_v36 = vsub.f32 %v755_v12, %v8670_v54  ;;  %6368 = vmatmul.mubr.f32.gmra.mrb[70].mxu1 %v1594_v8  ;;  %6809 = vmatmul.mubr.f32.gmra.mrb[72].mxu0 %v1612_v62  ;;  %v488_v6 = vpop.trf.xlu0  ;;  %v8695_v8 = vsub.f32 %v764_v63, %v8674_v9  ;;  %v8697_v62 = vand.u32 4294901760, %v770_v29  ;;  %v1624_v54 = vand.u32 4294901760, %v1623_v61 }
 0x177   : > { %v758_v43 = vsel %vm522_vm0, %v488_v6, 0  ;;  %6370 = vmatprep.mubr.f32.mxu1 %v1604_v60  ;;  %6811 = vmatprep.mubr.f32.mxu0 %v1622_v34  ;;  %v1643_v40 = vsub.f32 %v8665_v0, %v1642_v49  ;;  %9671 = vst [vmem:[#allocation138_spill] sm:$0xff] %v8701_v17  ;;  %v776_v34 = vsel %vm522_vm0, %v8520_v21, 0  ;;  %v8708_v6 = vand.u32 4294901760, %v773_v41 }
 0x178   : > { %9668 = vst [vmem:[#allocation135_spill] sm:$0xff] %v8683_v36  ;;  %v8690_v50 = vand.u32 4294901760, %v758_v43  ;;  %v1652_v12 = vand.u32 4294901760, %v8683_v36  ;;  %9669 = vst [vmem:[#allocation136_spill] sm:$0xff] %v8695_v8  ;;  %v779_v63 = vsel %vm522_vm0, %v8541_v27, 0  ;;  %v782_v61 = vsel %vm522_vm0, %v8562_v22, 0 }
 0x179   : > { %9670 = vst [vmem:[#allocation137_spill] sm:$0xff] %v8697_v62  ;;  %9673 = vst [vmem:[#allocation140_spill] sm:$0xff] %v8708_v6  ;;  %v1634_v21 = vand.u32 4294901760, %v1633_v37  ;;  %v8720_v47 = vsub.f32 %v770_v29, %v8697_v62  ;;  %v8722_v15 = vand.u32 4294901760, %v776_v34  ;;  %v1644_v27 = vand.u32 4294901760, %v1643_v40 }
 0x17a   : > { %v8706_v25 = vsub.f32 %v758_v43, %v8690_v50  ;;  %6371 = vmatmul.mubr.f32.gmra.mrb[72].mxu1 %v1614_v19  ;;  %6812 = vmatmul.mubr.f32.gmra.mrb[74].mxu0 %v1632_v1  ;;  %v489_v60 = vpop.trf.xlu0  ;;  %v1653_v19 = vsub.f32 %v8683_v36, %v1652_v12  ;;  %v518_v1 = vpop.trf.xlu1  ;;  %v1682_v22 = vand.u32 4294901760, %v8695_v8  ;;  %v8732_v37 = vand.u32 4294901760, %v779_v63 }
 0x17b   : > { %v761_v42 = vsel %vm522_vm0, %v489_v60, 0  ;;  %6373 = vmatprep.mubr.f32.mxu1 %v1624_v54  ;;  %6814 = vmatprep.mubr.f32.mxu0 %v1642_v49  ;;  %9675 = vst [vmem:[#allocation142_spill] sm:$0xff] %v8720_v47  ;;  %v8730_v49 = vsub.f32 %v773_v41, %v8708_v6  ;;  %v8734_v36 = vand.u32 4294901760, %v782_v61  ;;  %v1692_v40 = vand.u32 4294901760, %v8701_v17 }
 0x17c   : > { %9672 = vst [vmem:[#allocation139_spill] sm:$0xff] %v8706_v25  ;;  %v8715_v0 = vand.u32 4294901760, %v761_v42  ;;  %v1662_v43 = vand.u32 4294901760, %v8706_v25  ;;  %v785_v29 = vsel %vm522_vm0, %v8585_v24, 0  ;;  %v788_v41 = vsel %vm522_vm0, %v8611_v52, 0 }
 0x17d   : > { %9677 = vst [vmem:[#allocation144_spill] sm:$0xff] %v8730_v49  ;;  %9678 = vst [vmem:[#allocation145_spill] sm:$0xff] %v8734_v36  ;;  %v1683_v6 = vsub.f32 %v8695_v8, %v1682_v22  ;;  %v8749_v24 = vsub.f32 %v779_v63, %v8732_v37  ;;  %v8756_v52 = vand.u32 4294901760, %v788_v41  ;;  %v1693_v8 = vsub.f32 %v8701_v17, %v1692_v40 }
 0x17e   : > { %9674 = vst [vmem:[#allocation141_spill] sm:$0xff] %v8715_v0  ;;  %v8726_v60 = vsub.f32 %v761_v42, %v8715_v0  ;;  %6374 = vmatmul.mubr.f32.gmra.mrb[74].mxu1 %v1634_v21  ;;  %6815 = vmatmul.mubr.f32.gmra.mrb[76].mxu0 %v1652_v12  ;;  %v1663_v54 = vsub.f32 %v8706_v25, %v1662_v43  ;;  %v1654_v42 = vand.u32 4294901760, %v1653_v19  ;;  %v519_v62 = vpop.trf.xlu1 }
 0x17f   : > { %6376 = vmatprep.mubr.f32.mxu1 %v1644_v27  ;;  %6817 = vmatprep.mubr.f32.mxu0 %v1662_v43  ;;  %v8741_v25 = vsub.f32 %v776_v34, %v8722_v15  ;;  %v1702_v27 = vand.u32 4294901760, %v8720_v47  ;;  %9680 = vst [vmem:[#allocation147_spill] sm:$0xff] %v8749_v24  ;;  %v8752_v19 = vsub.f32 %v782_v61, %v8734_v36  ;;  %v8754_v34 = vand.u32 4294901760, %v785_v29 }
 0x180   : > { %9676 = vst [vmem:[#allocation143_spill] sm:$0xff] %v8726_v60  ;;  %v1672_v21 = vand.u32 4294901760, %v8726_v60  ;;  %v1664_v12 = vand.u32 4294901760, %v1663_v54  ;;  %9683 = vst [vmem:[#allocation150_spill] sm:$0xff] %v8756_v52  ;;  %v794_v36 = vsel %vm522_vm0, %v8658_v5, 0 }
 0x181   : > { %9679 = vst [vmem:[#allocation146_spill] sm:$0xff] %v8741_v25  ;;  %9681 = vst [vmem:[#allocation148_spill] sm:$0xff] %v8752_v19  ;;  %v1703_v63 = vsub.f32 %v8720_v47, %v1702_v27  ;;  %v1722_v61 = vand.u32 4294901760, %v8741_v25  ;;  %v1694_v47 = vand.u32 4294901760, %v1693_v8 }
 0x182   : > { %6377 = vmatmul.mubr.f32.gmra.mrb[76].mxu1 %v1654_v42  ;;  %6818 = vmatmul.mubr.f32.gmra.mrb[78].mxu0 %v1672_v21  ;;  %v1673_v43 = vsub.f32 %v8726_v60, %v1672_v21  ;;  %9682 = vst [vmem:[#allocation149_spill] sm:$0xff] %v8754_v34  ;;  %v1712_v42 = vand.u32 4294901760, %v8730_v49  ;;  %v791_v21 = vsel %vm522_vm0, %v8635_v35, 0  ;;  %v1684_v60 = vand.u32 4294901760, %v1683_v6  ;;  %v520_v5 = vpop.trf.xlu1 }
 0x183   : > { %6379 = vmatprep.mubr.f32.mxu1 %v1664_v12  ;;  %6820 = vmatprep.mubr.f32.mxu0 %v1682_v22  ;;  %v8767_v22 = vsub.f32 %v785_v29, %v8754_v34  ;;  %v1732_v12 = vand.u32 4294901760, %v8749_v24  ;;  %v8772_v35 = vsub.f32 %v788_v41, %v8756_v52  ;;  %v8774_v6 = vand.u32 4294901760, %v791_v21 }
 0x184   : > { %v1674_v54 = vand.u32 4294901760, %v1673_v43  ;;  %v1742_v43 = vand.u32 4294901760, %v8752_v19  ;;  %v1713_v17 = vsub.f32 %v8730_v49, %v1712_v42  ;;  %v1723_v29 = vsub.f32 %v8741_v25, %v1722_v61 }
 0x185   : > { %9684 = vst [vmem:[#allocation151_spill] sm:$0xff] %v8767_v22  ;;  %9685 = vst [vmem:[#allocation152_spill] sm:$0xff] %v8772_v35  ;;  %v1733_v41 = vsub.f32 %v8749_v24, %v1732_v12  ;;  %v1752_v8 = vand.u32 4294901760, %v8767_v22  ;;  %v8787_v52 = vsub.f32 %v791_v21, %v8774_v6 }
 0x186   : > { %6380 = vmatmul.mubr.f32.gmra.mrb[78].mxu1 %v1674_v54  ;;  %6821 = vmatmul.mubr.f32.gmra.mrb[80].mxu0 %v1692_v40  ;;  %v8777_v54 = vand.u32 4294901760, %v794_v36  ;;  %v797_v40 = vsel %vm522_vm0, %v8685_v11, 0  ;;  %v1743_v49 = vsub.f32 %v8752_v19, %v1742_v43  ;;  %v1714_v11 = vand.u32 4294901760, %v1713_v17  ;;  %v521_v19 = vpop.trf.xlu1 }
 0x187   : > { %6382 = vmatprep.mubr.f32.mxu1 %v1684_v60  ;;  %6823 = vmatprep.mubr.f32.mxu0 %v1702_v27  ;;  %v1704_v60 = vand.u32 4294901760, %v1703_v63  ;;  %v800_v27 = vsel %vm522_vm0, %v518_v1, 0  ;;  %9687 = vst [vmem:[#allocation154_spill] sm:$0xff] %v8787_v52  ;;  %v8789_v34 = vand.u32 4294901760, %v797_v40  ;;  %v1762_v63 = vand.u32 4294901760, %v8772_v35 }
 0x188   : > { %9686 = vst [vmem:[#allocation153_spill] sm:$0xff] %v8777_v54  ;;  %v8793_v1 = vsub.f32 %v794_v36, %v8777_v54  ;;  %v1734_v21 = vand.u32 4294901760, %v1733_v41  ;;  %v1744_v24 = vand.u32 4294901760, %v1743_v49  ;;  %v1753_v17 = vsub.f32 %v8767_v22, %v1752_v8  ;;  %v9721_v22 = vld [vmem:[#allocation75_spill] sm:$0xff] }
 0x189   : > { %9688 = vst [vmem:[#allocation155_spill] sm:$0xff] %v8789_v34  ;;  %v8801_v25 = vsub.f32 %v797_v40, %v8789_v34  ;;  %v1772_v54 = vand.u32 4294901760, %v8787_v52 }
 0x18a   : > { %6383 = vmatmul.mubr.f32.gmra.mrb[80].mxu1 %v1694_v47  ;;  %6824 = vmatmul.mubr.f32.gmra.mrb[82].mxu0 %v1712_v42  ;;  %9689 = vst [vmem:[#allocation156_spill] sm:$0xff] %v8793_v1  ;;  %v8795_v47 = vand.u32 4294901760, %v800_v27  ;;  %v803_v42 = vsel %vm522_vm0, %v519_v62, 0  ;;  %v1763_v62 = vsub.f32 %v8772_v35, %v1762_v63  ;;  %v1782_v49 = vand.u32 4294901760, %v8793_v1 }
 0x18b   : > { %6385 = vmatprep.mubr.f32.mxu1 %v1704_v60  ;;  %6826 = vmatprep.mubr.f32.mxu0 %v1722_v61  ;;  %v1724_v61 = vand.u32 4294901760, %v1723_v29  ;;  %v806_v60 = vsel %vm522_vm0, %v520_v5, 0  ;;  %9691 = vst [vmem:[#allocation158_spill] sm:$0xff] %v8801_v25  ;;  %v8803_v36 = vand.u32 4294901760, %v803_v42  ;;  %v1754_v40 = vand.u32 4294901760, %v1753_v17 }
 0x18c   : > { %9690 = vst [vmem:[#allocation157_spill] sm:$0xff] %v8795_v47  ;;  %v8810_v5 = vand.u32 4294901760, %v806_v60  ;;  %v1783_v35 = vsub.f32 %v8793_v1, %v1782_v49  ;;  %v9719_v1 = vld [vmem:[#allocation70_spill] sm:$0xff] }
 0x18d   : > { %9692 = vst [vmem:[#allocation159_spill] sm:$0xff] %v8803_v36  ;;  %v8815_v29 = vsub.f32 %v803_v42, %v8803_v36 }
 0x18e   : > { %6386 = vmatmul.mubr.f32.gmra.mrb[82].mxu1 %v1714_v11  ;;  %6827 = vmatmul.mubr.f32.gmra.mrb[84].mxu0 %v1732_v12  ;;  %v8808_v12 = vsub.f32 %v800_v27, %v8795_v47  ;;  %v1773_v11 = vsub.f32 %v8787_v52, %v1772_v54  ;;  %v1792_v27 = vand.u32 4294901760, %v8801_v25  ;;  %v1784_v17 = vand.u32 4294901760, %v1783_v35  ;;  %v9720_v52 = vld [vmem:[#allocation71_spill] sm:$0xff] }
 0x18f   : > { %6388 = vmatprep.mubr.f32.mxu1 %v1724_v61  ;;  %6829 = vmatprep.mubr.f32.mxu0 %v1742_v43  ;;  %v809_v43 = vsel %vm522_vm0, %v521_v19, 0  ;;  %9694 = vst [vmem:[#allocation161_spill] sm:$0xff] %v8815_v29  ;;  %v8822_v61 = vsub.f32 %v806_v60, %v8810_v5  ;;  %v1764_v19 = vand.u32 4294901760, %v1763_v62 }
 0x190   : > { %9693 = vst [vmem:[#allocation160_spill] sm:$0xff] %v8808_v12  ;;  %v8817_v41 = vand.u32 4294901760, %v809_v43  ;;  %v1793_v42 = vsub.f32 %v8801_v25, %v1792_v27  ;;  %v9718_v25 = vld [vmem:[#allocation79_spill] sm:$0xff] }
 0x191   : > { %9695 = vst [vmem:[#allocation162_spill] sm:$0xff] %v8822_v61  ;;  %v1822_v62 = vand.u32 4294901760, %v8822_v61 }
 0x192   : > { %6389 = vmatmul.mubr.f32.gmra.mrb[84].mxu1 %v1734_v21  ;;  %6830 = vmatmul.mubr.f32.gmra.mrb[86].mxu0 %v1752_v8  ;;  %v1802_v8 = vand.u32 4294901760, %v8808_v12  ;;  %v1812_v21 = vand.u32 4294901760, %v8815_v29 }
 0x193   : > { %6391 = vmatprep.mubr.f32.mxu1 %v1744_v24  ;;  %6832 = vmatprep.mubr.f32.mxu0 %v1762_v63  ;;  %v8827_v24 = vsub.f32 %v809_v43, %v8817_v41  ;;  %v1774_v63 = vand.u32 4294901760, %v1773_v11  ;;  %v1823_v11 = vsub.f32 %v8822_v61, %v1822_v62  ;;  %v9716_v61 = vld [vmem:[#allocation67_spill] sm:$0xff] }
 0x194   : > { %v1803_v60 = vsub.f32 %v8808_v12, %v1802_v8 }
 0x195   : > { %9696 = vst [vmem:[#allocation163_spill] sm:$0xff] %v8827_v24  ;;  %v1832_v43 = vand.u32 4294901760, %v8827_v24  ;;  %v1824_v12 = vand.u32 4294901760, %v1823_v11  ;;  %v9711_v11 = vld [vmem:[#allocation56_spill] sm:$0xff] }
 0x196   : > { %6392 = vmatmul.mubr.f32.gmra.mrb[86].mxu1 %v1754_v40  ;;  %6833 = vmatmul.mubr.f32.gmra.mrb[88].mxu0 %v1772_v54  ;;  %v1794_v54 = vand.u32 4294901760, %v1793_v42  ;;  %v1804_v40 = vand.u32 4294901760, %v1803_v60  ;;  %v9702_v42 = vld [vmem:[#allocation38_spill] sm:$0xff]  ;;  %v9705_v60 = vld [vmem:[#allocation43_spill] sm:$0xff] }
 0x197   : > { %6394 = vmatprep.mubr.f32.mxu1 %v1764_v19  ;;  %6835 = vmatprep.mubr.f32.mxu0 %v1782_v49  ;;  %v1813_v49 = vsub.f32 %v8815_v29, %v1812_v21  ;;  %v1833_v19 = vsub.f32 %v8827_v24, %v1832_v43  ;;  %v9715_v24 = vld [vmem:[#allocation64_spill] sm:$0xff]  ;;  %v9717_v29 = vld [vmem:[#allocation73_spill] sm:$0xff] }
 0x199   : > { %v1814_v35 = vand.u32 4294901760, %v1813_v49  ;;  %v9708_v49 = vld [vmem:[#allocation50_spill] sm:$0xff] }
 0x19a   : > { %6395 = vmatmul.mubr.f32.gmra.mrb[88].mxu1 %v1774_v63  ;;  %6836 = vmatmul.mubr.f32.gmra.mrb[90].mxu0 %v1792_v27  ;;  %v1834_v27 = vand.u32 4294901760, %v1833_v19  ;;  %v9701_v63 = vld [vmem:[#allocation36_spill] sm:$0xff] }
 0x19b   : > { %6397 = vmatprep.mubr.f32.mxu1 %v1784_v17  ;;  %6838 = vmatprep.mubr.f32.mxu0 %v1802_v8  ;;  %v9700_v8 = vld [vmem:[#allocation34_spill] sm:$0xff]  ;;  %v9704_v17 = vld [vmem:[#allocation41_spill] sm:$0xff]  ;;  %v9713_v19 = vld [vmem:[#allocation60_spill] sm:$0xff] }
 0x19e   : > { %6398 = vmatmul.mubr.f32.gmra.mrb[90].mxu1 %v1794_v54  ;;  %6839 = vmatmul.mubr.f32.gmra.mrb[92].mxu0 %v1812_v21  ;;  %v9703_v21 = vld [vmem:[#allocation40_spill] sm:$0xff]  ;;  %v9707_v54 = vld [vmem:[#allocation49_spill] sm:$0xff] }
 0x19f   : > { %6400 = vmatprep.mubr.f32.mxu1 %v1804_v40  ;;  %6841 = vmatprep.mubr.f32.mxu0 %v1822_v62  ;;  %v9706_v62 = vld [vmem:[#allocation46_spill] sm:$0xff] }
 0x1a0   : > { %v9710_v40 = vld [vmem:[#allocation54_spill] sm:$0xff] }
 0x1a2   : > { %6401 = vmatmul.mubr.f32.gmra.mrb[92].mxu1 %v1814_v35  ;;  %6842 = vmatmul.mubr.f32.gmra.mrb[94].mxu0 %v1832_v43  ;;  %v9709_v43 = vld [vmem:[#allocation51_spill] sm:$0xff]  ;;  %v9712_v35 = vld [vmem:[#allocation58_spill] sm:$0xff] }
 0x1a3   : > { %6403 = vmatprep.mubr.f32.mxu1 %v1824_v12  ;;  %6846 = vmatprep.mubr.f32.mxu0 %v7900_v31  ;;  %v9699_v12 = vld [vmem:[#allocation31_spill] sm:$0xff] }
 0x1a6   : > { %6404 = vmatmul.mubr.f32.gmra.mrb[94].mxu1 %v1834_v27  ;;  %6847 = vmatmul.mubr.f32.vlgmr.msra.gmra.mrb[0].mxu0 %v7910_v38  ;;  %v9714_v27 = vld [vmem:[#allocation62_spill] sm:$0xff] }
 0x1a7   : > { %6408 = vmatprep.mubr.f32.mxu1 %v7900_v31  ;;  %6849 = vmatprep.mubr.f32.mxu0 %v7921_v46 }
 0x1a8   : > { %6991 = vmatpush3.xpose.msra.mxu0 %v7851_v58  ;;  %v9697_v58 = vld [vmem:[#allocation29_spill] sm:$0xff] }
 0x1aa   : > { %6409 = vmatmul.mubr.f32.vlgmr.msra.gmra.mrb[0].mxu1 %v7910_v38  ;;  %6850 = vmatmul.mubr.f32.gmra.mrb[2].mxu0 %v7934_v56 }
 0x1ab   : > { %6553 = vmatpush3.xpose.msra.mxu1 %v7866_v3  ;;  %6411 = vmatprep.mubr.f32.mxu1 %v7921_v46  ;;  %v9698_v3 = vld [vmem:[#allocation30_spill] sm:$0xff] }
 0x1ac   : > { %6852 = vmatprep.mubr.f32.mxu0 %v7948_v4 }
 0x1ae   : > { %6412 = vmatmul.mubr.f32.gmra.mrb[2].mxu1 %v7934_v56  ;;  %6853 = vmatmul.mubr.f32.gmra.mrb[4].mxu0 %v7961_v14 }
 0x1af   : > { %6414 = vmatprep.mubr.f32.mxu1 %v7948_v4  ;;  %6855 = vmatprep.mubr.f32.mxu0 %v7972_v23 }
 0x1b2   : > { %6415 = vmatmul.mubr.f32.gmra.mrb[4].mxu1 %v7961_v14  ;;  %6856 = vmatmul.mubr.f32.gmra.mrb[6].mxu0 %v7982_v33 }
 0x1b3   : > { %6417 = vmatprep.mubr.f32.mxu1 %v7972_v23  ;;  %6858 = vmatprep.mubr.f32.mxu0 %v7992_v45 }
 0x1b6   : > { %6418 = vmatmul.mubr.f32.gmra.mrb[6].mxu1 %v7982_v33  ;;  %6859 = vmatmul.mubr.f32.gmra.mrb[8].mxu0 %v8002_v57 }
 0x1b7   : > { %6420 = vmatprep.mubr.f32.mxu1 %v7992_v45  ;;  %6861 = vmatprep.mubr.f32.mxu0 %v8012_v7 }
 0x1ba   : > { %6421 = vmatmul.mubr.f32.gmra.mrb[8].mxu1 %v8002_v57  ;;  %6862 = vmatmul.mubr.f32.gmra.mrb[10].mxu0 %v8022_v18 }
 0x1bb   : > { %6423 = vmatprep.mubr.f32.mxu1 %v8012_v7  ;;  %6864 = vmatprep.mubr.f32.mxu0 %v8032_v30 }
 0x1be   : > { %6424 = vmatmul.mubr.f32.gmra.mrb[10].mxu1 %v8022_v18  ;;  %6865 = vmatmul.mubr.f32.gmra.mrb[12].mxu0 %v8046_v55 }
 0x1bf   : > { %6426 = vmatprep.mubr.f32.mxu1 %v8032_v30  ;;  %6867 = vmatprep.mubr.f32.mxu0 %v8064_v16 }
 0x1c2   : > { %6427 = vmatmul.mubr.f32.gmra.mrb[12].mxu1 %v8046_v55  ;;  %6868 = vmatmul.mubr.f32.gmra.mrb[14].mxu0 %v8088_v59 }
 0x1c3   : > { %6429 = vmatprep.mubr.f32.mxu1 %v8064_v16  ;;  %6870 = vmatprep.mubr.f32.mxu0 %v8051_v32 }
 0x1c6   : > { %6430 = vmatmul.mubr.f32.gmra.mrb[14].mxu1 %v8088_v59  ;;  %6871 = vmatmul.mubr.f32.gmra.mrb[16].mxu0 %v8059_v10 }
 0x1c7   : > { %6432 = vmatprep.mubr.f32.mxu1 %v8051_v32  ;;  %6873 = vmatprep.mubr.f32.mxu0 %v8072_v28 }
 0x1ca   : > { %6433 = vmatmul.mubr.f32.gmra.mrb[16].mxu1 %v8059_v10  ;;  %6874 = vmatmul.mubr.f32.gmra.mrb[18].mxu0 %v8083_v48 }
 0x1cb   : > { %6435 = vmatprep.mubr.f32.mxu1 %v8072_v28  ;;  %6876 = vmatprep.mubr.f32.mxu0 %v8096_v13 }
 0x1ce   : > { %6436 = vmatmul.mubr.f32.gmra.mrb[18].mxu1 %v8083_v48  ;;  %6877 = vmatmul.mubr.f32.gmra.mrb[20].mxu0 %v8110_v2 }
 0x1cf   : > { %6438 = vmatprep.mubr.f32.mxu1 %v8096_v13  ;;  %6879 = vmatprep.mubr.f32.mxu0 %v8113_v44 }
 0x1d2   : > { %6439 = vmatmul.mubr.f32.gmra.mrb[20].mxu1 %v8110_v2  ;;  %6880 = vmatmul.mubr.f32.gmra.mrb[22].mxu0 %v8133_v51 }
 0x1d3   : > { %6441 = vmatprep.mubr.f32.mxu1 %v8113_v44  ;;  %6882 = vmatprep.mubr.f32.mxu0 %v8140_v39 }
 0x1d6   : > { %6442 = vmatmul.mubr.f32.gmra.mrb[22].mxu1 %v8133_v51  ;;  %6883 = vmatmul.mubr.f32.gmra.mrb[24].mxu0 %v9697_v58 }
 0x1d7   : > { %6444 = vmatprep.mubr.f32.mxu1 %v8140_v39  ;;  %6885 = vmatprep.mubr.f32.mxu0 %v9698_v3 }
 0x1da   : > { %6445 = vmatmul.mubr.f32.gmra.mrb[24].mxu1 %v9697_v58  ;;  %6886 = vmatmul.mubr.f32.gmra.mrb[26].mxu0 %v9699_v12 }
 0x1db   : > { %6447 = vmatprep.mubr.f32.mxu1 %v9698_v3  ;;  %6888 = vmatprep.mubr.f32.mxu0 %v9700_v8 }
 0x1de   : > { %6448 = vmatmul.mubr.f32.gmra.mrb[26].mxu1 %v9699_v12  ;;  %6889 = vmatmul.mubr.f32.gmra.mrb[28].mxu0 %v9701_v63 }
 0x1df   : > { %6450 = vmatprep.mubr.f32.mxu1 %v9700_v8  ;;  %6891 = vmatprep.mubr.f32.mxu0 %v9702_v42 }
 0x1e2   : > { %6451 = vmatmul.mubr.f32.gmra.mrb[28].mxu1 %v9701_v63  ;;  %6892 = vmatmul.mubr.f32.gmra.mrb[30].mxu0 %v9703_v21 }
 0x1e3   : > { %6453 = vmatprep.mubr.f32.mxu1 %v9702_v42  ;;  %6894 = vmatprep.mubr.f32.mxu0 %v9704_v17 }
 0x1e6   : > { %6454 = vmatmul.mubr.f32.gmra.mrb[30].mxu1 %v9703_v21  ;;  %6895 = vmatmul.mubr.f32.gmra.mrb[32].mxu0 %v9705_v60 }
 0x1e7   : > { %6456 = vmatprep.mubr.f32.mxu1 %v9704_v17  ;;  %6897 = vmatprep.mubr.f32.mxu0 %v9706_v62 }
 0x1ea   : > { %6457 = vmatmul.mubr.f32.gmra.mrb[32].mxu1 %v9705_v60  ;;  %6898 = vmatmul.mubr.f32.gmra.mrb[34].mxu0 %v9707_v54 }
 0x1eb   : > { %6459 = vmatprep.mubr.f32.mxu1 %v9706_v62  ;;  %6900 = vmatprep.mubr.f32.mxu0 %v9708_v49 }
 0x1ee   : > { %6460 = vmatmul.mubr.f32.gmra.mrb[34].mxu1 %v9707_v54  ;;  %6901 = vmatmul.mubr.f32.gmra.mrb[36].mxu0 %v9709_v43 }
 0x1ef   : > { %6462 = vmatprep.mubr.f32.mxu1 %v9708_v49  ;;  %6903 = vmatprep.mubr.f32.mxu0 %v9710_v40 }
 0x1f2   : > { %6463 = vmatmul.mubr.f32.gmra.mrb[36].mxu1 %v9709_v43  ;;  %6904 = vmatmul.mubr.f32.gmra.mrb[38].mxu0 %v9711_v11 }
 0x1f3   : > { %6465 = vmatprep.mubr.f32.mxu1 %v9710_v40  ;;  %6906 = vmatprep.mubr.f32.mxu0 %v9712_v35 }
 0x1f6   : > { %6466 = vmatmul.mubr.f32.gmra.mrb[38].mxu1 %v9711_v11  ;;  %6907 = vmatmul.mubr.f32.gmra.mrb[40].mxu0 %v9713_v19 }
 0x1f7   : > { %6468 = vmatprep.mubr.f32.mxu1 %v9712_v35  ;;  %6909 = vmatprep.mubr.f32.mxu0 %v9714_v27 }
 0x1fa   : > { %6469 = vmatmul.mubr.f32.gmra.mrb[40].mxu1 %v9713_v19  ;;  %6910 = vmatmul.mubr.f32.gmra.mrb[42].mxu0 %v9715_v24 }
 0x1fb   : > { %6471 = vmatprep.mubr.f32.mxu1 %v9714_v27  ;;  %6912 = vmatprep.mubr.f32.mxu0 %v9716_v61 }
 0x1fe   : > { %6472 = vmatmul.mubr.f32.gmra.mrb[42].mxu1 %v9715_v24  ;;  %6913 = vmatmul.mubr.f32.gmra.mrb[44].mxu0 %v8358_v53 }
 0x1ff   : > { %6474 = vmatprep.mubr.f32.mxu1 %v9716_v61  ;;  %6915 = vmatprep.mubr.f32.mxu0 %v9717_v29  ;;  %v9722_v61 = vld [vmem:[#allocation78_spill] sm:$0xff] }
 0x202   : > { %6475 = vmatmul.mubr.f32.gmra.mrb[44].mxu1 %v8358_v53  ;;  %6916 = vmatmul.mubr.f32.gmra.mrb[46].mxu0 %v9718_v25  ;;  %v9723_v53 = vld [vmem:[#allocation81_spill] sm:$0xff] }
 0x203   : > { %6477 = vmatprep.mubr.f32.mxu1 %v9717_v29  ;;  %6918 = vmatprep.mubr.f32.mxu0 %v9719_v1  ;;  %v9724_v29 = vld [vmem:[#allocation84_spill] sm:$0xff] }
 0x206   : > { %6478 = vmatmul.mubr.f32.gmra.mrb[46].mxu1 %v9718_v25  ;;  %6919 = vmatmul.mubr.f32.gmra.mrb[48].mxu0 %v9720_v52  ;;  %v9725_v25 = vld [vmem:[#allocation85_spill] sm:$0xff] }
 0x207   : > { %6480 = vmatprep.mubr.f32.mxu1 %v9719_v1  ;;  %6921 = vmatprep.mubr.f32.mxu0 %v9721_v22  ;;  %v9726_v1 = vld [vmem:[#allocation88_spill] sm:$0xff] }
 0x20a   : > { %6481 = vmatmul.mubr.f32.gmra.mrb[48].mxu1 %v9720_v52  ;;  %6922 = vmatmul.mubr.f32.gmra.mrb[50].mxu0 %v9722_v61  ;;  %v9727_v52 = vld [vmem:[#allocation90_spill] sm:$0xff] }
 0x20b   : > { %6483 = vmatprep.mubr.f32.mxu1 %v9721_v22  ;;  %6924 = vmatprep.mubr.f32.mxu0 %v9723_v53  ;;  %v9728_v22 = vld [vmem:[#allocation93_spill] sm:$0xff] }
 0x20e   : > { %6484 = vmatmul.mubr.f32.gmra.mrb[50].mxu1 %v9722_v61  ;;  %6925 = vmatmul.mubr.f32.gmra.mrb[52].mxu0 %v9724_v29  ;;  %v9729_v61 = vld [vmem:[#allocation94_spill] sm:$0xff] }
 0x20f   : > { %6486 = vmatprep.mubr.f32.mxu1 %v9723_v53  ;;  %6927 = vmatprep.mubr.f32.mxu0 %v9725_v25  ;;  %v9730_v53 = vld [vmem:[#allocation95_spill] sm:$0xff] }
 0x212   : > { %6487 = vmatmul.mubr.f32.gmra.mrb[52].mxu1 %v9724_v29  ;;  %6928 = vmatmul.mubr.f32.gmra.mrb[54].mxu0 %v9726_v1  ;;  %v9731_v29 = vld [vmem:[#allocation98_spill] sm:$0xff] }
 0x213   : > { %6489 = vmatprep.mubr.f32.mxu1 %v9725_v25  ;;  %6930 = vmatprep.mubr.f32.mxu0 %v9727_v52  ;;  %v9732_v25 = vld [vmem:[#allocation100_spill] sm:$0xff] }
 0x216   : > { %6490 = vmatmul.mubr.f32.gmra.mrb[54].mxu1 %v9726_v1  ;;  %6931 = vmatmul.mubr.f32.gmra.mrb[56].mxu0 %v9728_v22  ;;  %v9733_v1 = vld [vmem:[#allocation102_spill] sm:$0xff] }
 0x217   : > { %6492 = vmatprep.mubr.f32.mxu1 %v9727_v52  ;;  %6933 = vmatprep.mubr.f32.mxu0 %v9729_v61  ;;  %v9734_v52 = vld [vmem:[#allocation104_spill] sm:$0xff] }
 0x21a   : > { %6493 = vmatmul.mubr.f32.gmra.mrb[56].mxu1 %v9728_v22  ;;  %6934 = vmatmul.mubr.f32.gmra.mrb[58].mxu0 %v9730_v53  ;;  %v9735_v22 = vld [vmem:[#allocation105_spill] sm:$0xff] }
 0x21b   : > { %6495 = vmatprep.mubr.f32.mxu1 %v9729_v61  ;;  %6936 = vmatprep.mubr.f32.mxu0 %v9731_v29  ;;  %v9736_v61 = vld [vmem:[#allocation107_spill] sm:$0xff] }
 0x21e   : > { %6496 = vmatmul.mubr.f32.gmra.mrb[58].mxu1 %v9730_v53  ;;  %6937 = vmatmul.mubr.f32.gmra.mrb[60].mxu0 %v9732_v25  ;;  %v9737_v53 = vld [vmem:[#allocation110_spill] sm:$0xff] }
 0x21f   : > { %6498 = vmatprep.mubr.f32.mxu1 %v9731_v29  ;;  %6939 = vmatprep.mubr.f32.mxu0 %v9733_v1  ;;  %v9738_v29 = vld [vmem:[#allocation113_spill] sm:$0xff] }
 0x222   : > { %6499 = vmatmul.mubr.f32.gmra.mrb[60].mxu1 %v9732_v25  ;;  %6940 = vmatmul.mubr.f32.gmra.mrb[62].mxu0 %v9734_v52  ;;  %v9739_v25 = vld [vmem:[#allocation114_spill] sm:$0xff] }
 0x223   : > { %6501 = vmatprep.mubr.f32.mxu1 %v9733_v1  ;;  %6942 = vmatprep.mubr.f32.mxu0 %v9735_v22 }
 0x226   : > { %6502 = vmatmul.mubr.f32.gmra.mrb[62].mxu1 %v9734_v52  ;;  %6943 = vmatmul.mubr.f32.gmra.mrb[64].mxu0 %v9736_v61  ;;  %v9740_v52 = vld [vmem:[#allocation118_spill] sm:$0xff] }
 0x227   : > { %6504 = vmatprep.mubr.f32.mxu1 %v9735_v22  ;;  %6945 = vmatprep.mubr.f32.mxu0 %v9737_v53 }
 0x22a   : > { %6505 = vmatmul.mubr.f32.gmra.mrb[64].mxu1 %v9736_v61  ;;  %6946 = vmatmul.mubr.f32.gmra.mrb[66].mxu0 %v9738_v29  ;;  %v9741_v61 = vld [vmem:[#allocation121_spill] sm:$0xff] }
 0x22b   : > { %6507 = vmatprep.mubr.f32.mxu1 %v9737_v53  ;;  %6948 = vmatprep.mubr.f32.mxu0 %v9739_v25  ;;  %v9742_v53 = vld [vmem:[#allocation123_spill] sm:$0xff] }
 0x22e   : > { %6508 = vmatmul.mubr.f32.gmra.mrb[66].mxu1 %v9738_v29  ;;  %6949 = vmatmul.mubr.f32.gmra.mrb[68].mxu0 %v8587_v20  ;;  %v9743_v29 = vld [vmem:[#allocation125_spill] sm:$0xff] }
 0x22f   : > { %6510 = vmatprep.mubr.f32.mxu1 %v9739_v25  ;;  %6951 = vmatprep.mubr.f32.mxu0 %v9740_v52  ;;  %v9744_v25 = vld [vmem:[#allocation127_spill] sm:$0xff] }
 0x232   : > { %6511 = vmatmul.mubr.f32.gmra.mrb[68].mxu1 %v8587_v20  ;;  %6952 = vmatmul.mubr.f32.gmra.mrb[70].mxu0 %v8607_v26  ;;  %v9745_v20 = vld [vmem:[#allocation130_spill] sm:$0xff] }
 0x233   : > { %6513 = vmatprep.mubr.f32.mxu1 %v9740_v52  ;;  %6954 = vmatprep.mubr.f32.mxu0 %v9741_v61  ;;  %v9746_v52 = vld [vmem:[#allocation132_spill] sm:$0xff] }
 0x236   : > { %6514 = vmatmul.mubr.f32.gmra.mrb[70].mxu1 %v8607_v26  ;;  %6955 = vmatmul.mubr.f32.gmra.mrb[72].mxu0 %v9742_v53 }
 0x237   : > { %6516 = vmatprep.mubr.f32.mxu1 %v9741_v61  ;;  %6957 = vmatprep.mubr.f32.mxu0 %v9743_v29 }
 0x23a   : > { %6517 = vmatmul.mubr.f32.gmra.mrb[72].mxu1 %v9742_v53  ;;  %6958 = vmatmul.mubr.f32.gmra.mrb[74].mxu0 %v9744_v25 }
 0x23b   : > { %6519 = vmatprep.mubr.f32.mxu1 %v9743_v29  ;;  %6960 = vmatprep.mubr.f32.mxu0 %v9745_v20  ;;  %v9747_v29 = vld [vmem:[#allocation134_spill] sm:$0xff] }
 0x23e   : > { %6520 = vmatmul.mubr.f32.gmra.mrb[74].mxu1 %v9744_v25  ;;  %6961 = vmatmul.mubr.f32.gmra.mrb[76].mxu0 %v9746_v52  ;;  %v9748_v25 = vld [vmem:[#allocation137_spill] sm:$0xff] }
 0x23f   : > { %6522 = vmatprep.mubr.f32.mxu1 %v9745_v20  ;;  %6963 = vmatprep.mubr.f32.mxu0 %v8690_v50  ;;  %v9749_v20 = vld [vmem:[#allocation140_spill] sm:$0xff] }
 0x242   : > { %6523 = vmatmul.mubr.f32.gmra.mrb[76].mxu1 %v9746_v52  ;;  %6964 = vmatmul.mubr.f32.gmra.mrb[78].mxu0 %v8715_v0 }
 0x243   : > { %6525 = vmatprep.mubr.f32.mxu1 %v8690_v50  ;;  %6966 = vmatprep.mubr.f32.mxu0 %v8674_v9 }
 0x246   : > { %6526 = vmatmul.mubr.f32.gmra.mrb[78].mxu1 %v8715_v0  ;;  %6967 = vmatmul.mubr.f32.gmra.mrb[80].mxu0 %v9747_v29  ;;  %v9750_v0 = vld [vmem:[#allocation145_spill] sm:$0xff] }
 0x247   : > { %6528 = vmatprep.mubr.f32.mxu1 %v8674_v9  ;;  %6969 = vmatprep.mubr.f32.mxu0 %v9748_v25  ;;  %v9751_v9 = vld [vmem:[#allocation149_spill] sm:$0xff] }
 0x24a   : > { %6529 = vmatmul.mubr.f32.gmra.mrb[80].mxu1 %v9747_v29  ;;  %6970 = vmatmul.mubr.f32.gmra.mrb[82].mxu0 %v9749_v20  ;;  %v9752_v29 = vld [vmem:[#allocation150_spill] sm:$0xff] }
 0x24b   : > { %6531 = vmatprep.mubr.f32.mxu1 %v9748_v25  ;;  %6972 = vmatprep.mubr.f32.mxu0 %v8722_v15 }
 0x24e   : > { %6532 = vmatmul.mubr.f32.gmra.mrb[82].mxu1 %v9749_v20  ;;  %6973 = vmatmul.mubr.f32.gmra.mrb[84].mxu0 %v8732_v37  ;;  %v9753_v20 = vld [vmem:[#allocation153_spill] sm:$0xff] }
 0x24f   : > { %6534 = vmatprep.mubr.f32.mxu1 %v8722_v15  ;;  %6975 = vmatprep.mubr.f32.mxu0 %v9750_v0 }
 0x252   : > { %6535 = vmatmul.mubr.f32.gmra.mrb[84].mxu1 %v8732_v37  ;;  %6976 = vmatmul.mubr.f32.gmra.mrb[86].mxu0 %v9751_v9 }
 0x253   : > { %6537 = vmatprep.mubr.f32.mxu1 %v9750_v0  ;;  %6978 = vmatprep.mubr.f32.mxu0 %v9752_v29 }
 0x256   : > { %6538 = vmatmul.mubr.f32.gmra.mrb[86].mxu1 %v9751_v9  ;;  %6979 = vmatmul.mubr.f32.gmra.mrb[88].mxu0 %v8774_v6 }
 0x257   : > { %6540 = vmatprep.mubr.f32.mxu1 %v9752_v29  ;;  %6981 = vmatprep.mubr.f32.mxu0 %v9753_v20 }
 0x25a   : > { %6541 = vmatmul.mubr.f32.gmra.mrb[88].mxu1 %v8774_v6  ;;  %6982 = vmatmul.mubr.f32.gmra.mrb[90].mxu0 %v8789_v34 }
 0x25b   : > { %6543 = vmatprep.mubr.f32.mxu1 %v9753_v20  ;;  %6984 = vmatprep.mubr.f32.mxu0 %v8795_v47  ;;  %v9754_v20 = vld [vmem:[#allocation4_spill] sm:$0xff] }
 0x25e   : > { %6544 = vmatmul.mubr.f32.gmra.mrb[90].mxu1 %v8789_v34  ;;  %6985 = vmatmul.mubr.f32.gmra.mrb[92].mxu0 %v8803_v36  ;;  %v9755_v34 = vld [vmem:[#allocation5_spill] sm:$0xff] }
 0x25f   : > { %6546 = vmatprep.mubr.f32.mxu1 %v8795_v47  ;;  %6987 = vmatprep.mubr.f32.mxu0 %v8810_v5  ;;  %v9756_v47 = vld [vmem:[#allocation6_spill] sm:$0xff] }
 0x262   : > { %6547 = vmatmul.mubr.f32.gmra.mrb[92].mxu1 %v8803_v36  ;;  %6988 = vmatmul.mubr.f32.gmra.mrb[94].mxu0 %v8817_v41  ;;  %v9757_v36 = vld [vmem:[#allocation7_spill] sm:$0xff] }
 0x263   : > { %6549 = vmatprep.mubr.f32.mxu1 %v8810_v5  ;;  %6992 = vmatprep.mubr.f32.mxu0 %v7900_v31  ;;  %v9758_v31 = vld [vmem:[#allocation8_spill] sm:$0xff] }
 0x266   : > { %6550 = vmatmul.mubr.f32.gmra.mrb[94].mxu1 %v8817_v41  ;;  %6993 = vmatmul.mubr.f32.vlgmr.msra.gmra.mrb[0].mxu0 %v7910_v38  ;;  %v9759_v38 = vld [vmem:[#allocation9_spill] sm:$0xff] }
 0x267   : > { %6554 = vmatprep.mubr.f32.mxu1 %v9754_v20  ;;  %6995 = vmatprep.mubr.f32.mxu0 %v7921_v46  ;;  %v9760_v46 = vld [vmem:[#allocation10_spill] sm:$0xff]  ;;  %v9783_v20 = vld [vmem:[#allocation39_spill] sm:$0xff] }
 0x26a   : > { %6555 = vmatmul.mubr.f32.vlgmr.msra.gmra.mrb[0].mxu1 %v9755_v34  ;;  %6996 = vmatmul.mubr.f32.gmra.mrb[2].mxu0 %v7934_v56  ;;  %v9761_v56 = vld [vmem:[#allocation11_spill] sm:$0xff]  ;;  %v9784_v34 = vld [vmem:[#allocation42_spill] sm:$0xff] }
 0x26b   : > { %6557 = vmatprep.mubr.f32.mxu1 %v9756_v47  ;;  %6998 = vmatprep.mubr.f32.mxu0 %v7948_v4  ;;  %v9762_v4 = vld [vmem:[#allocation12_spill] sm:$0xff] }
 0x26c   : > { %v9785_v47 = vld [vmem:[#allocation44_spill] sm:$0xff] }
 0x26e   : > { %6558 = vmatmul.mubr.f32.gmra.mrb[2].mxu1 %v9757_v36  ;;  %6999 = vmatmul.mubr.f32.gmra.mrb[4].mxu0 %v7961_v14  ;;  %v9763_v14 = vld [vmem:[#allocation13_spill] sm:$0xff]  ;;  %v5537_v36 = vld [vmem:[%s9288_s2] sm:$0x7] }
 0x26f   : > { %6560 = vmatprep.mubr.f32.mxu1 %v9758_v31  ;;  %7001 = vmatprep.mubr.f32.mxu0 %v7972_v23  ;;  %v9764_v23 = vld [vmem:[#allocation14_spill] sm:$0xff]  ;;  %v9801_v31 = vld [vmem:[#allocation73_spill] sm:$0xff] }
 0x272   : > { %6561 = vmatmul.mubr.f32.gmra.mrb[4].mxu1 %v9759_v38  ;;  %7002 = vmatmul.mubr.f32.gmra.mrb[6].mxu0 %v7982_v33  ;;  %v9765_v33 = vld [vmem:[#allocation15_spill] sm:$0xff] }
 0x273   : > { %6563 = vmatprep.mubr.f32.mxu1 %v9760_v46  ;;  %7004 = vmatprep.mubr.f32.mxu0 %v7992_v45  ;;  %v9766_v45 = vld [vmem:[#allocation16_spill] sm:$0xff]  ;;  %v9803_v38 = vld [vmem:[#allocation79_spill] sm:$0xff]  ;;  %v9805_v46 = vld [vmem:[#allocation70_spill] sm:$0xff] }
 0x276   : > { %6564 = vmatmul.mubr.f32.gmra.mrb[6].mxu1 %v9761_v56  ;;  %7005 = vmatmul.mubr.f32.gmra.mrb[8].mxu0 %v8002_v57  ;;  %v9767_v57 = vld [vmem:[#allocation17_spill] sm:$0xff]  ;;  %v9807_v56 = vld [vmem:[#allocation71_spill] sm:$0xff] }
 0x277   : > { %6566 = vmatprep.mubr.f32.mxu1 %v9762_v4  ;;  %7007 = vmatprep.mubr.f32.mxu0 %v8012_v7  ;;  %v9768_v7 = vld [vmem:[#allocation19_spill] sm:$0xff]  ;;  %v9808_v4 = vld [vmem:[#allocation74_spill] sm:$0xff] }
 0x27a   : > { %6567 = vmatmul.mubr.f32.gmra.mrb[8].mxu1 %v9763_v14  ;;  %7008 = vmatmul.mubr.f32.gmra.mrb[10].mxu0 %v8022_v18  ;;  %v9769_v18 = vld [vmem:[#allocation22_spill] sm:$0xff]  ;;  %v9809_v14 = vld [vmem:[#allocation75_spill] sm:$0xff] }
 0x27b   : > { %6569 = vmatprep.mubr.f32.mxu1 %v9764_v23  ;;  %7010 = vmatprep.mubr.f32.mxu0 %v8032_v30  ;;  %v9770_v30 = vld [vmem:[#allocation18_spill] sm:$0xff]  ;;  %v9810_v23 = vld [vmem:[#allocation76_spill] sm:$0xff] }
 0x27e   : > { %6570 = vmatmul.mubr.f32.gmra.mrb[10].mxu1 %v9765_v33  ;;  %7011 = vmatmul.mubr.f32.gmra.mrb[12].mxu0 %v8046_v55  ;;  %v9771_v55 = vld [vmem:[#allocation20_spill] sm:$0xff]  ;;  %v9811_v33 = vld [vmem:[#allocation78_spill] sm:$0xff] }
 0x27f   : > { %6572 = vmatprep.mubr.f32.mxu1 %v9766_v45  ;;  %7013 = vmatprep.mubr.f32.mxu0 %v8064_v16  ;;  %v9772_v16 = vld [vmem:[#allocation21_spill] sm:$0xff]  ;;  %v9812_v45 = vld [vmem:[#allocation80_spill] sm:$0xff] }
 0x282   : > { %6573 = vmatmul.mubr.f32.gmra.mrb[12].mxu1 %v9767_v57  ;;  %7014 = vmatmul.mubr.f32.gmra.mrb[14].mxu0 %v8088_v59  ;;  %v9773_v59 = vld [vmem:[#allocation23_spill] sm:$0xff]  ;;  %v9813_v57 = vld [vmem:[#allocation81_spill] sm:$0xff] }
 0x283   : > { %6575 = vmatprep.mubr.f32.mxu1 %v9768_v7  ;;  %7016 = vmatprep.mubr.f32.mxu0 %v8051_v32  ;;  %v9774_v32 = vld [vmem:[#allocation24_spill] sm:$0xff]  ;;  %v9814_v7 = vld [vmem:[#allocation83_spill] sm:$0xff] }
 0x286   : > { %6576 = vmatmul.mubr.f32.gmra.mrb[14].mxu1 %v9769_v18  ;;  %7017 = vmatmul.mubr.f32.gmra.mrb[16].mxu0 %v8059_v10  ;;  %v9775_v10 = vld [vmem:[#allocation25_spill] sm:$0xff]  ;;  %v9815_v18 = vld [vmem:[#allocation84_spill] sm:$0xff] }
 0x287   : > { %6578 = vmatprep.mubr.f32.mxu1 %v9770_v30  ;;  %7019 = vmatprep.mubr.f32.mxu0 %v8072_v28  ;;  %v9776_v28 = vld [vmem:[#allocation26_spill] sm:$0xff] }
 0x288   : > { %v9816_v30 = vld [vmem:[#allocation86_spill] sm:$0xff] }
 0x28a   : > { %6579 = vmatmul.mubr.f32.gmra.mrb[16].mxu1 %v9771_v55  ;;  %7020 = vmatmul.mubr.f32.gmra.mrb[18].mxu0 %v8083_v48  ;;  %v9777_v48 = vld [vmem:[#allocation27_spill] sm:$0xff]  ;;  %v9817_v55 = vld [vmem:[#allocation85_spill] sm:$0xff] }
 0x28b   : > { %6581 = vmatprep.mubr.f32.mxu1 %v9772_v16  ;;  %7022 = vmatprep.mubr.f32.mxu0 %v8096_v13  ;;  %v9778_v13 = vld [vmem:[#allocation28_spill] sm:$0xff]  ;;  %v9818_v16 = vld [vmem:[#allocation87_spill] sm:$0xff] }
 0x28e   : > { %6582 = vmatmul.mubr.f32.gmra.mrb[18].mxu1 %v9773_v59  ;;  %7023 = vmatmul.mubr.f32.gmra.mrb[20].mxu0 %v8110_v2  ;;  %v9779_v2 = vld [vmem:[#allocation32_spill] sm:$0xff] }
 0x28f   : > { %6584 = vmatprep.mubr.f32.mxu1 %v9774_v32  ;;  %7025 = vmatprep.mubr.f32.mxu0 %v8113_v44  ;;  %v9780_v44 = vld [vmem:[#allocation33_spill] sm:$0xff]  ;;  %v9819_v59 = vld [vmem:[#allocation88_spill] sm:$0xff] }
 0x290   : > { %v9820_v32 = vld [vmem:[#allocation89_spill] sm:$0xff] }
 0x292   : > { %6585 = vmatmul.mubr.f32.gmra.mrb[20].mxu1 %v9775_v10  ;;  %7026 = vmatmul.mubr.f32.gmra.mrb[22].mxu0 %v8133_v51  ;;  %v9781_v51 = vld [vmem:[#allocation35_spill] sm:$0xff]  ;;  %v9821_v10 = vld [vmem:[#allocation90_spill] sm:$0xff] }
 0x293   : > { %6587 = vmatprep.mubr.f32.mxu1 %v9776_v28  ;;  %7028 = vmatprep.mubr.f32.mxu0 %v8140_v39  ;;  %v9782_v39 = vld [vmem:[#allocation37_spill] sm:$0xff]  ;;  %v9822_v28 = vld [vmem:[#allocation91_spill] sm:$0xff] }
 0x296   : > { %6588 = vmatmul.mubr.f32.gmra.mrb[22].mxu1 %v9777_v48  ;;  %7029 = vmatmul.mubr.f32.gmra.mrb[24].mxu0 %v9697_v58  ;;  %v9786_v58 = vld [vmem:[#allocation45_spill] sm:$0xff] }
 0x297   : > { %6590 = vmatprep.mubr.f32.mxu1 %v9778_v13  ;;  %7031 = vmatprep.mubr.f32.mxu0 %v9698_v3  ;;  %v7671_v3 = vmov 0   ;;  %v9823_v48 = vld [vmem:[#allocation93_spill] sm:$0xff]  ;;  %v9824_v13 = vld [vmem:[#allocation92_spill] sm:$0xff] }
 0x298   : > { %7645 = vset.pattern.permute.xlu1 %v7671_v3 }
 0x299   : > { %5540 = vperm.xlu1 %7645, %v5537_v36   ;;  %v9832_v36 = vld [vmem:[#allocation101_spill] sm:$0xff] }
 0x29a   : > { %6591 = vmatmul.mubr.f32.gmra.mrb[24].mxu1 %v9779_v2  ;;  %7032 = vmatmul.mubr.f32.gmra.mrb[26].mxu0 %v9699_v12  ;;  %v9787_v12 = vld [vmem:[#allocation47_spill] sm:$0xff]  ;;  %v9825_v2 = vld [vmem:[#allocation94_spill] sm:$0xff] }
 0x29b   : > { %6593 = vmatprep.mubr.f32.mxu1 %v9780_v44  ;;  %7034 = vmatprep.mubr.f32.mxu0 %v9700_v8  ;;  %v9788_v8 = vld [vmem:[#allocation48_spill] sm:$0xff] }
 0x29c   : > { %v9826_v44 = vld [vmem:[#allocation96_spill] sm:$0xff] }
 0x29e   : > { %6594 = vmatmul.mubr.f32.gmra.mrb[26].mxu1 %v9781_v51  ;;  %7035 = vmatmul.mubr.f32.gmra.mrb[28].mxu0 %v9701_v63  ;;  %v9789_v63 = vld [vmem:[#allocation52_spill] sm:$0xff]  ;;  %v9827_v51 = vld [vmem:[#allocation95_spill] sm:$0xff] }
 0x29f   : > { %6596 = vmatprep.mubr.f32.mxu1 %v9782_v39  ;;  %7037 = vmatprep.mubr.f32.mxu0 %v9702_v42  ;;  %v9790_v42 = vld [vmem:[#allocation53_spill] sm:$0xff] }
 0x2a0   : > { %v9828_v39 = vld [vmem:[#allocation97_spill] sm:$0xff] }
 0x2a2   : > { %6597 = vmatmul.mubr.f32.gmra.mrb[28].mxu1 %v9783_v20  ;;  %7038 = vmatmul.mubr.f32.gmra.mrb[30].mxu0 %v9703_v21  ;;  %v9791_v21 = vld [vmem:[#allocation55_spill] sm:$0xff]  ;;  %v9829_v20 = vld [vmem:[#allocation98_spill] sm:$0xff] }
 0x2a3   : > { %6599 = vmatprep.mubr.f32.mxu1 %v9784_v34  ;;  %7040 = vmatprep.mubr.f32.mxu0 %v9704_v17  ;;  %v9792_v17 = vld [vmem:[#allocation57_spill] sm:$0xff]  ;;  %v9830_v34 = vld [vmem:[#allocation99_spill] sm:$0xff] }
 0x2a6   : > { %6600 = vmatmul.mubr.f32.gmra.mrb[30].mxu1 %v9785_v47  ;;  %7041 = vmatmul.mubr.f32.gmra.mrb[32].mxu0 %v9705_v60  ;;  %v9793_v60 = vld [vmem:[#allocation59_spill] sm:$0xff]  ;;  %v9831_v47 = vld [vmem:[#allocation100_spill] sm:$0xff] }
 0x2a7   : > { %6602 = vmatprep.mubr.f32.mxu1 %v9786_v58  ;;  %7043 = vmatprep.mubr.f32.mxu0 %v9706_v62  ;;  %v9794_v62 = vld [vmem:[#allocation61_spill] sm:$0xff]  ;;  %v9833_v58 = vld [vmem:[#allocation103_spill] sm:$0xff] }
 0x2aa   : > { %6603 = vmatmul.mubr.f32.gmra.mrb[32].mxu1 %v9787_v12  ;;  %7044 = vmatmul.mubr.f32.gmra.mrb[34].mxu0 %v9707_v54  ;;  %v9795_v54 = vld [vmem:[#allocation63_spill] sm:$0xff]  ;;  %v9834_v12 = vld [vmem:[#allocation104_spill] sm:$0xff] }
 0x2ab   : > { %6605 = vmatprep.mubr.f32.mxu1 %v9788_v8  ;;  %7046 = vmatprep.mubr.f32.mxu0 %v9708_v49  ;;  %v9796_v49 = vld [vmem:[#allocation65_spill] sm:$0xff]  ;;  %v9835_v8 = vld [vmem:[#allocation106_spill] sm:$0xff] }
 0x2ae   : > { %6606 = vmatmul.mubr.f32.gmra.mrb[34].mxu1 %v9789_v63  ;;  %7047 = vmatmul.mubr.f32.gmra.mrb[36].mxu0 %v9709_v43  ;;  %v9797_v43 = vld [vmem:[#allocation67_spill] sm:$0xff]  ;;  %v9836_v63 = vld [vmem:[#allocation108_spill] sm:$0xff] }
 0x2af   : > { %6608 = vmatprep.mubr.f32.mxu1 %v9790_v42  ;;  %7049 = vmatprep.mubr.f32.mxu0 %v9710_v40  ;;  %v9798_v40 = vld [vmem:[#allocation66_spill] sm:$0xff]  ;;  %v9837_v42 = vld [vmem:[#allocation107_spill] sm:$0xff] }
 0x2b2   : > { %6609 = vmatmul.mubr.f32.gmra.mrb[36].mxu1 %v9791_v21  ;;  %7050 = vmatmul.mubr.f32.gmra.mrb[38].mxu0 %v9711_v11  ;;  %v9799_v11 = vld [vmem:[#allocation69_spill] sm:$0xff] }
 0x2b3   : > { %6611 = vmatprep.mubr.f32.mxu1 %v9792_v17  ;;  %7052 = vmatprep.mubr.f32.mxu0 %v9712_v35  ;;  %v9800_v35 = vld [vmem:[#allocation68_spill] sm:$0xff]  ;;  %v9838_v21 = vld [vmem:[#allocation109_spill] sm:$0xff]  ;;  %v9839_v17 = vld [vmem:[#allocation110_spill] sm:$0xff] }
 0x2b6   : > { %6612 = vmatmul.mubr.f32.gmra.mrb[38].mxu1 %v9793_v60  ;;  %7053 = vmatmul.mubr.f32.gmra.mrb[40].mxu0 %v9713_v19  ;;  %v9802_v19 = vld [vmem:[#allocation72_spill] sm:$0xff]  ;;  %v9840_v60 = vld [vmem:[#allocation111_spill] sm:$0xff] }
 0x2b7   : > { %6614 = vmatprep.mubr.f32.mxu1 %v9794_v62  ;;  %7055 = vmatprep.mubr.f32.mxu0 %v9714_v27  ;;  %v9804_v27 = vld [vmem:[#allocation77_spill] sm:$0xff] }
 0x2b8   : > { %v9841_v62 = vld [vmem:[#allocation113_spill] sm:$0xff] }
 0x2ba   : > { %6615 = vmatmul.mubr.f32.gmra.mrb[40].mxu1 %v9795_v54  ;;  %7056 = vmatmul.mubr.f32.gmra.mrb[42].mxu0 %v9715_v24  ;;  %v9806_v24 = vld [vmem:[#allocation82_spill] sm:$0xff] }
 0x2bb   : > { %6617 = vmatprep.mubr.f32.mxu1 %v9796_v49  ;;  %7058 = vmatprep.mubr.f32.mxu0 %v9797_v43  ;;  %v9843_v54 = vld [vmem:[#allocation114_spill] sm:$0xff]  ;;  %v9844_v49 = vld [vmem:[#allocation116_spill] sm:$0xff]  ;;  %v9845_v43 = vld [vmem:[#allocation115_spill] sm:$0xff] }
 0x2be   : > { %6618 = vmatmul.mubr.f32.gmra.mrb[42].mxu1 %v9798_v40  ;;  %7059 = vmatmul.mubr.f32.gmra.mrb[44].mxu0 %v9799_v11  ;;  %v9847_v40 = vld [vmem:[#allocation118_spill] sm:$0xff]  ;;  %v9848_v11 = vld [vmem:[#allocation119_spill] sm:$0xff] }
 0x2bf   : > { %6620 = vmatprep.mubr.f32.mxu1 %v9800_v35  ;;  %7061 = vmatprep.mubr.f32.mxu0 %v9801_v31  ;;  %v9849_v35 = vld [vmem:[#allocation120_spill] sm:$0xff]  ;;  %v9850_v31 = vld [vmem:[#allocation122_spill] sm:$0xff] }
 0x2c2   : > { %6621 = vmatmul.mubr.f32.gmra.mrb[44].mxu1 %v9802_v19  ;;  %7062 = vmatmul.mubr.f32.gmra.mrb[46].mxu0 %v9803_v38  ;;  %v9851_v19 = vld [vmem:[#allocation124_spill] sm:$0xff]  ;;  %v9852_v38 = vld [vmem:[#allocation125_spill] sm:$0xff] }
 0x2c3   : > { %6623 = vmatprep.mubr.f32.mxu1 %v9804_v27  ;;  %7064 = vmatprep.mubr.f32.mxu0 %v9805_v46  ;;  %v9853_v27 = vld [vmem:[#allocation126_spill] sm:$0xff]  ;;  %v9854_v46 = vld [vmem:[#allocation127_spill] sm:$0xff] }
 0x2c6   : > { %6624 = vmatmul.mubr.f32.gmra.mrb[46].mxu1 %v9806_v24  ;;  %7065 = vmatmul.mubr.f32.gmra.mrb[48].mxu0 %v9807_v56  ;;  %v9855_v24 = vld [vmem:[#allocation128_spill] sm:$0xff]  ;;  %v9856_v56 = vld [vmem:[#allocation130_spill] sm:$0xff] }
 0x2c7   : > { %6626 = vmatprep.mubr.f32.mxu1 %v9808_v4  ;;  %7067 = vmatprep.mubr.f32.mxu0 %v9809_v14  ;;  %v9860_v4 = vld [vmem:[#allocation141_spill] sm:$0xff]  ;;  %v9861_v14 = vld [vmem:[#allocation139_spill] sm:$0xff] }
 0x2ca   : > { %6627 = vmatmul.mubr.f32.gmra.mrb[48].mxu1 %v9810_v23  ;;  %7068 = vmatmul.mubr.f32.gmra.mrb[50].mxu0 %v9811_v33  ;;  %v9862_v23 = vld [vmem:[#allocation133_spill] sm:$0xff]  ;;  %v9863_v33 = vld [vmem:[#allocation143_spill] sm:$0xff] }
 0x2cb   : > { %6629 = vmatprep.mubr.f32.mxu1 %v9812_v45  ;;  %7070 = vmatprep.mubr.f32.mxu0 %v9813_v57  ;;  %v9864_v45 = vld [vmem:[#allocation134_spill] sm:$0xff]  ;;  %v9865_v57 = vld [vmem:[#allocation136_spill] sm:$0xff] }
 0x2ce   : > { %6630 = vmatmul.mubr.f32.gmra.mrb[50].mxu1 %v9814_v7  ;;  %7071 = vmatmul.mubr.f32.gmra.mrb[52].mxu0 %v9815_v18  ;;  %v9867_v7 = vld [vmem:[#allocation140_spill] sm:$0xff] }
 0x2cf   : > { %6632 = vmatprep.mubr.f32.mxu1 %v9816_v30  ;;  %7073 = vmatprep.mubr.f32.mxu0 %v9817_v55  ;;  %v9869_v18 = vld [vmem:[#allocation144_spill] sm:$0xff]  ;;  %v9870_v30 = vld [vmem:[#allocation146_spill] sm:$0xff]  ;;  %v9871_v55 = vld [vmem:[#allocation147_spill] sm:$0xff] }
 0x2d2   : > { %6633 = vmatmul.mubr.f32.gmra.mrb[52].mxu1 %v9818_v16  ;;  %7074 = vmatmul.mubr.f32.gmra.mrb[54].mxu0 %v9819_v59  ;;  %v9873_v16 = vld [vmem:[#allocation151_spill] sm:$0xff]  ;;  %v9875_v59 = vld [vmem:[#allocation153_spill] sm:$0xff] }
 0x2d3   : > { %6635 = vmatprep.mubr.f32.mxu1 %v9820_v32  ;;  %7076 = vmatprep.mubr.f32.mxu0 %v9821_v10  ;;  %v9877_v32 = vld [vmem:[#allocation155_spill] sm:$0xff]  ;;  %v9879_v10 = vld [vmem:[#allocation157_spill] sm:$0xff] }
 0x2d6   : > { %6636 = vmatmul.mubr.f32.gmra.mrb[54].mxu1 %v9822_v28  ;;  %7077 = vmatmul.mubr.f32.gmra.mrb[56].mxu0 %v9823_v48  ;;  %v9881_v28 = vld [vmem:[#allocation159_spill] sm:$0xff]  ;;  %v9884_v48 = vld [vmem:[#allocation162_spill] sm:$0xff] }
 0x2d7   : > { %6638 = vmatprep.mubr.f32.mxu1 %v9824_v13  ;;  %7079 = vmatprep.mubr.f32.mxu0 %v9825_v2  ;;  %v9885_v13 = vld [vmem:[#allocation163_spill] sm:$0xff] }
 0x2da   : > { %6639 = vmatmul.mubr.f32.gmra.mrb[56].mxu1 %v9826_v44  ;;  %7080 = vmatmul.mubr.f32.gmra.mrb[58].mxu0 %v9827_v51 }
 0x2db   : > { %6641 = vmatprep.mubr.f32.mxu1 %v9828_v39  ;;  %7082 = vmatprep.mubr.f32.mxu0 %v9829_v20 }
 0x2de   : > { %6642 = vmatmul.mubr.f32.gmra.mrb[58].mxu1 %v9830_v34  ;;  %7083 = vmatmul.mubr.f32.gmra.mrb[60].mxu0 %v9831_v47 }
 0x2df   : > { %6644 = vmatprep.mubr.f32.mxu1 %v9832_v36  ;;  %7085 = vmatprep.mubr.f32.mxu0 %v9733_v1  ;;  %v9842_v1 = vld [vmem:[#allocation112_spill] sm:$0xff] }
 0x2e2   : > { %6645 = vmatmul.mubr.f32.gmra.mrb[60].mxu1 %v9833_v58  ;;  %7086 = vmatmul.mubr.f32.gmra.mrb[62].mxu0 %v9834_v12 }
 0x2e3   : > { %6647 = vmatprep.mubr.f32.mxu1 %v9835_v8  ;;  %7088 = vmatprep.mubr.f32.mxu0 %v9735_v22  ;;  %v9846_v22 = vld [vmem:[#allocation117_spill] sm:$0xff] }
 0x2e6   : > { %6648 = vmatmul.mubr.f32.gmra.mrb[62].mxu1 %v9836_v63  ;;  %7089 = vmatmul.mubr.f32.gmra.mrb[64].mxu0 %v9837_v42 }
 0x2e7   : > { %6650 = vmatprep.mubr.f32.mxu1 %v9838_v21  ;;  %7091 = vmatprep.mubr.f32.mxu0 %v9839_v17 }
 0x2ea   : > { %6651 = vmatmul.mubr.f32.gmra.mrb[64].mxu1 %v9840_v60  ;;  %7092 = vmatmul.mubr.f32.gmra.mrb[66].mxu0 %v9841_v62 }
 0x2eb   : > { %6653 = vmatprep.mubr.f32.mxu1 %v9842_v1  ;;  %7094 = vmatprep.mubr.f32.mxu0 %v9843_v54 }
 0x2ee   : > { %6654 = vmatmul.mubr.f32.gmra.mrb[66].mxu1 %v9844_v49  ;;  %7095 = vmatmul.mubr.f32.gmra.mrb[68].mxu0 %v9845_v43 }
 0x2ef   : > { %6656 = vmatprep.mubr.f32.mxu1 %v9846_v22  ;;  %7097 = vmatprep.mubr.f32.mxu0 %v9847_v40 }
 0x2f2   : > { %6657 = vmatmul.mubr.f32.gmra.mrb[68].mxu1 %v9848_v11  ;;  %7098 = vmatmul.mubr.f32.gmra.mrb[70].mxu0 %v8607_v26  ;;  %v9857_v26 = vld [vmem:[#allocation129_spill] sm:$0xff] }
 0x2f3   : > { %6659 = vmatprep.mubr.f32.mxu1 %v9849_v35  ;;  %7100 = vmatprep.mubr.f32.mxu0 %v9741_v61  ;;  %v9858_v61 = vld [vmem:[#allocation131_spill] sm:$0xff] }
 0x2f6   : > { %6660 = vmatmul.mubr.f32.gmra.mrb[70].mxu1 %v9850_v31  ;;  %7101 = vmatmul.mubr.f32.gmra.mrb[72].mxu0 %v9742_v53  ;;  %v9859_v53 = vld [vmem:[#allocation135_spill] sm:$0xff] }
 0x2f7   : > { %6662 = vmatprep.mubr.f32.mxu1 %v9851_v19  ;;  %7103 = vmatprep.mubr.f32.mxu0 %v9852_v38 }
 0x2fa   : > { %6663 = vmatmul.mubr.f32.gmra.mrb[72].mxu1 %v9853_v27  ;;  %7104 = vmatmul.mubr.f32.gmra.mrb[74].mxu0 %v9854_v46 }
 0x2fb   : > { %6665 = vmatprep.mubr.f32.mxu1 %v9855_v24  ;;  %7106 = vmatprep.mubr.f32.mxu0 %v9856_v56 }
 0x2fe   : > { %6666 = vmatmul.mubr.f32.gmra.mrb[74].mxu1 %v9857_v26  ;;  %7107 = vmatmul.mubr.f32.gmra.mrb[76].mxu0 %v9746_v52  ;;  %v9866_v52 = vld [vmem:[#allocation138_spill] sm:$0xff] }
 0x2ff   : > { %6668 = vmatprep.mubr.f32.mxu1 %v9858_v61  ;;  %7109 = vmatprep.mubr.f32.mxu0 %v8690_v50  ;;  %v9868_v50 = vld [vmem:[#allocation142_spill] sm:$0xff] }
 0x302   : > { %6669 = vmatmul.mubr.f32.gmra.mrb[76].mxu1 %v9859_v53  ;;  %7110 = vmatmul.mubr.f32.gmra.mrb[78].mxu0 %v9860_v4 }
 0x303   : > { %6671 = vmatprep.mubr.f32.mxu1 %v9861_v14  ;;  %7112 = vmatprep.mubr.f32.mxu0 %v9862_v23 }
 0x306   : > { %6672 = vmatmul.mubr.f32.gmra.mrb[78].mxu1 %v9863_v33  ;;  %7113 = vmatmul.mubr.f32.gmra.mrb[80].mxu0 %v9864_v45 }
 0x307   : > { %6674 = vmatprep.mubr.f32.mxu1 %v9865_v57  ;;  %7115 = vmatprep.mubr.f32.mxu0 %v9748_v25  ;;  %v9872_v25 = vld [vmem:[#allocation148_spill] sm:$0xff] }
 0x30a   : > { %6675 = vmatmul.mubr.f32.gmra.mrb[80].mxu1 %v9866_v52  ;;  %7116 = vmatmul.mubr.f32.gmra.mrb[82].mxu0 %v9867_v7 }
 0x30b   : > { %6677 = vmatprep.mubr.f32.mxu1 %v9868_v50  ;;  %7118 = vmatprep.mubr.f32.mxu0 %v8722_v15  ;;  %v9874_v15 = vld [vmem:[#allocation152_spill] sm:$0xff] }
 0x30e   : > { %6678 = vmatmul.mubr.f32.gmra.mrb[82].mxu1 %v9869_v18  ;;  %7119 = vmatmul.mubr.f32.gmra.mrb[84].mxu0 %v8732_v37  ;;  %v9876_v37 = vld [vmem:[#allocation154_spill] sm:$0xff] }
 0x30f   : > { %6680 = vmatprep.mubr.f32.mxu1 %v9870_v30  ;;  %7121 = vmatprep.mubr.f32.mxu0 %v9750_v0  ;;  %v9878_v0 = vld [vmem:[#allocation156_spill] sm:$0xff] }
 0x312   : > { %6681 = vmatmul.mubr.f32.gmra.mrb[84].mxu1 %v9871_v55  ;;  %7122 = vmatmul.mubr.f32.gmra.mrb[86].mxu0 %v9751_v9  ;;  %v9880_v9 = vld [vmem:[#allocation158_spill] sm:$0xff] }
 0x313   : > { %6683 = vmatprep.mubr.f32.mxu1 %v9872_v25  ;;  %7124 = vmatprep.mubr.f32.mxu0 %v9752_v29  ;;  %v9882_v29 = vld [vmem:[#allocation160_spill] sm:$0xff] }
 0x316   : > { %6684 = vmatmul.mubr.f32.gmra.mrb[86].mxu1 %v9873_v16  ;;  %7125 = vmatmul.mubr.f32.gmra.mrb[88].mxu0 %v8774_v6  ;;  %v9883_v6 = vld [vmem:[#allocation161_spill] sm:$0xff] }
 0x317   : > { %6686 = vmatprep.mubr.f32.mxu1 %v9874_v15  ;;  %7127 = vmatprep.mubr.f32.mxu0 %v9875_v59 }
 0x31a   : > { %6687 = vmatmul.mubr.f32.gmra.mrb[88].mxu1 %v9876_v37  ;;  %7128 = vmatmul.mubr.f32.gmra.mrb[90].mxu0 %v9877_v32 }
 0x31b   : > { %6689 = vmatprep.mubr.f32.mxu1 %v9878_v0  ;;  %7130 = vmatprep.mubr.f32.mxu0 %v9879_v10 }
 0x31e   : > { %6690 = vmatmul.mubr.f32.gmra.mrb[90].mxu1 %v9880_v9  ;;  %7131 = vmatmul.mubr.f32.gmra.mrb[92].mxu0 %v9881_v28 }
 0x31f   : > { %6692 = vmatprep.mubr.f32.mxu1 %v9882_v29  ;;  %7133 = vmatprep.mubr.f32.mxu0 %v8810_v5 }
 0x322   : > { %6693 = vmatmul.mubr.f32.gmra.mrb[92].mxu1 %v9883_v6  ;;  %7134 = vmatmul.mubr.f32.gmra.mrb[94].mxu0 %v8817_v41 }
 0x323   : > { %6695 = vmatprep.mubr.f32.mxu1 %v9884_v48 }
 0x326   : > { %6696 = vmatmul.mubr.f32.gmra.mrb[94].mxu1 %v9885_v13 }
 0x339   : > { %v6994_v2 = vpop.f32.mrb[0].mxu0 }
 0x33a   : > { %v4771_v44 = vpop.f32.mrb[1].mxu0 }
 0x33d   : > { %v6556_v51 = vpop.f32.mrb[0].mxu1  ;;  %v6997_v39 = vpop.f32.mrb[2].mxu0 }
 0x33e   : > { %v7136_v20 = vadd.f32 %v6994_v2, %v6556_v51  ;;  %v2556_v34 = vpop.f32.mrb[1].mxu1  ;;  %v4783_v47 = vpop.f32.mrb[3].mxu0 }
 0x33f   : > { %v7137_v36 = vadd.f32 %v4771_v44, %v2556_v34 }
 0x341   : > { %v7000_v58 = vpop.f32.mrb[4].mxu0  ;;  %5345 = vxpose.xlu0.b32.start [1/16] (narrow) %v7137_v36, 8  ;;  %v6559_v12 = vpop.f32.mrb[2].mxu1 }
 0x342   : > { %v7138_v5 = vadd.f32 %v6997_v39, %v6559_v12  ;;  %v2570_v8 = vpop.f32.mrb[3].mxu1  ;;  %v4795_v63 = vpop.f32.mrb[5].mxu0 }
 0x343   : > { %v7139_v42 = vadd.f32 %v4783_v47, %v2570_v8 }
 0x345   : > { %v7003_v41 = vpop.f32.mrb[6].mxu0  ;;  %5346 = vxpose.xlu0.b32.cont [2/16] (narrow) %v7136_v20, 8  ;;  %v6562_v21 = vpop.f32.mrb[4].mxu1 }
 0x346   : > { %v7140_v17 = vadd.f32 %v7000_v58, %v6562_v21  ;;  %v2584_v60 = vpop.f32.mrb[5].mxu1  ;;  %v4807_v62 = vpop.f32.mrb[7].mxu0 }
 0x347   : > { %v7141_v1 = vadd.f32 %v4795_v63, %v2584_v60 }
 0x349   : > { %v7006_v54 = vpop.f32.mrb[8].mxu0  ;;  %5347 = vxpose.xlu0.b32.cont [3/16] (narrow) %v7139_v42, 8  ;;  %v6565_v49 = vpop.f32.mrb[6].mxu1 }
 0x34a   : > { %v7142_v43 = vadd.f32 %v7003_v41, %v6565_v49  ;;  %v2598_v22 = vpop.f32.mrb[7].mxu1  ;;  %v4819_v40 = vpop.f32.mrb[9].mxu0 }
 0x34b   : > { %v7143_v11 = vadd.f32 %v4807_v62, %v2598_v22 }
 0x34d   : > { %v7009_v35 = vpop.f32.mrb[10].mxu0  ;;  %5348 = vxpose.xlu0.b32.cont [4/16] (narrow) %v7138_v5, 8  ;;  %v6568_v31 = vpop.f32.mrb[8].mxu1 }
 0x34e   : > { %v7144_v19 = vadd.f32 %v7006_v54, %v6568_v31  ;;  %v2612_v38 = vpop.f32.mrb[9].mxu1  ;;  %v4831_v27 = vpop.f32.mrb[11].mxu0 }
 0x34f   : > { %v7145_v46 = vadd.f32 %v4819_v40, %v2612_v38 }
 0x351   : > { %v7012_v24 = vpop.f32.mrb[12].mxu0  ;;  %5349 = vxpose.xlu0.b32.cont [5/16] (narrow) %v7141_v1, 8  ;;  %v6571_v56 = vpop.f32.mrb[10].mxu1 }
 0x352   : > { %v7146_v26 = vadd.f32 %v7009_v35, %v6571_v56  ;;  %v2626_v61 = vpop.f32.mrb[11].mxu1  ;;  %v4843_v53 = vpop.f32.mrb[13].mxu0 }
 0x353   : > { %v7147_v4 = vadd.f32 %v4831_v27, %v2626_v61 }
 0x355   : > { %v7015_v14 = vpop.f32.mrb[14].mxu0  ;;  %5350 = vxpose.xlu0.b32.cont [6/16] (narrow) %v7140_v17, 8  ;;  %v6574_v23 = vpop.f32.mrb[12].mxu1 }
 0x356   : > { %v7148_v33 = vadd.f32 %v7012_v24, %v6574_v23  ;;  %v2640_v45 = vpop.f32.mrb[13].mxu1  ;;  %v4855_v57 = vpop.f32.mrb[15].mxu0 }
 0x357   : > { %v7149_v52 = vadd.f32 %v4843_v53, %v2640_v45 }
 0x359   : > { %v7018_v7 = vpop.f32.mrb[16].mxu0  ;;  %5351 = vxpose.xlu0.b32.cont [7/16] (narrow) %v7143_v11, 8  ;;  %v6577_v50 = vpop.f32.mrb[14].mxu1 }
 0x35a   : > { %v9227_v18 = vadd.f32 %v7015_v14, %v6577_v50  ;;  %v2654_v30 = vpop.f32.mrb[15].mxu1  ;;  %v4867_v55 = vpop.f32.mrb[17].mxu0 }
 0x35b   : > { %v7151_v25 = vadd.f32 %v4855_v57, %v2654_v30 }
 0x35d   : > { %v7021_v16 = vpop.f32.mrb[18].mxu0  ;;  %5352 = vxpose.xlu0.b32.cont [8/16] (narrow) %v7142_v43, 8  ;;  %v6580_v15 = vpop.f32.mrb[16].mxu1 }
 0x35e   : > { %v7152_v59 = vadd.f32 %v7018_v7, %v6580_v15  ;;  %v2668_v37 = vpop.f32.mrb[17].mxu1  ;;  %v4879_v32 = vpop.f32.mrb[19].mxu0 }
 0x35f   : > { %v7153_v0 = vadd.f32 %v4867_v55, %v2668_v37 }
 0x361   : > { %v7024_v10 = vpop.f32.mrb[20].mxu0  ;;  %5353 = vxpose.xlu0.b32.cont [9/16] (narrow) %v7145_v46, 8  ;;  %5377 = vxpose.xlu1.b32.start [1/16] (narrow) %v7153_v0, 8  ;;  %v6583_v9 = vpop.f32.mrb[18].mxu1 }
 0x362   : > { %v7154_v28 = vadd.f32 %v7021_v16, %v6583_v9  ;;  %v2682_v29 = vpop.f32.mrb[19].mxu1  ;;  %v4891_v6 = vpop.f32.mrb[21].mxu0 }
 0x363   : > { %v7155_v48 = vadd.f32 %v4879_v32, %v2682_v29 }
 0x365   : > { %v7027_v13 = vpop.f32.mrb[22].mxu0  ;;  %5354 = vxpose.xlu0.b32.cont [10/16] (narrow) %v7144_v19, 8  ;;  %5378 = vxpose.xlu1.b32.cont [2/16] (narrow) %v7152_v59, 8  ;;  %v6586_v2 = vpop.f32.mrb[20].mxu1 }
 0x366   : > { %v7156_v44 = vadd.f32 %v7024_v10, %v6586_v2  ;;  %v2696_v51 = vpop.f32.mrb[21].mxu1  ;;  %v4903_v39 = vpop.f32.mrb[23].mxu0 }
 0x367   : > { %v7157_v20 = vadd.f32 %v4891_v6, %v2696_v51 }
 0x369   : > { %v7030_v34 = vpop.f32.mrb[24].mxu0  ;;  %5355 = vxpose.xlu0.b32.cont [11/16] (narrow) %v7147_v4, 8  ;;  %5379 = vxpose.xlu1.b32.cont [3/16] (narrow) %v7155_v48, 8  ;;  %v6589_v47 = vpop.f32.mrb[22].mxu1 }
 0x36a   : > { %v7158_v36 = vadd.f32 %v7027_v13, %v6589_v47  ;;  %v2710_v58 = vpop.f32.mrb[23].mxu1  ;;  %v4915_v12 = vpop.f32.mrb[25].mxu0 }
 0x36b   : > { %v7159_v5 = vadd.f32 %v4903_v39, %v2710_v58 }
 0x36d   : > { %v7033_v8 = vpop.f32.mrb[26].mxu0  ;;  %5356 = vxpose.xlu0.b32.cont [12/16] (narrow) %v7146_v26, 8  ;;  %5380 = vxpose.xlu1.b32.cont [4/16] (narrow) %v7154_v28, 8  ;;  %v6592_v63 = vpop.f32.mrb[24].mxu1 }
 0x36e   : > { %v7160_v42 = vadd.f32 %v7030_v34, %v6592_v63  ;;  %v2724_v41 = vpop.f32.mrb[25].mxu1  ;;  %v4927_v21 = vpop.f32.mrb[27].mxu0 }
 0x36f   : > { %v7161_v17 = vadd.f32 %v4915_v12, %v2724_v41 }
 0x371   : > { %v7036_v60 = vpop.f32.mrb[28].mxu0  ;;  %5357 = vxpose.xlu0.b32.cont [13/16] (narrow) %v7149_v52, 8  ;;  %5381 = vxpose.xlu1.b32.cont [5/16] (narrow) %v7157_v20, 8  ;;  %v6595_v62 = vpop.f32.mrb[26].mxu1 }
 0x372   : > { %v7162_v1 = vadd.f32 %v7033_v8, %v6595_v62  ;;  %v2738_v54 = vpop.f32.mrb[27].mxu1  ;;  %v4939_v49 = vpop.f32.mrb[29].mxu0 }
 0x373   : > { %v7163_v43 = vadd.f32 %v4927_v21, %v2738_v54 }
 0x375   : > { %v7039_v22 = vpop.f32.mrb[30].mxu0  ;;  %5358 = vxpose.xlu0.b32.cont [14/16] (narrow) %v7148_v33, 8  ;;  %5382 = vxpose.xlu1.b32.cont [6/16] (narrow) %v7156_v44, 8  ;;  %v6598_v40 = vpop.f32.mrb[28].mxu1 }
 0x376   : > { %v7164_v11 = vadd.f32 %v7036_v60, %v6598_v40  ;;  %v2752_v35 = vpop.f32.mrb[29].mxu1  ;;  %v4951_v31 = vpop.f32.mrb[31].mxu0 }
 0x377   : > { %v7165_v19 = vadd.f32 %v4939_v49, %v2752_v35 }
 0x379   : > { %v7042_v38 = vpop.f32.mrb[32].mxu0  ;;  %5359 = vxpose.xlu0.b32.cont [15/16] (narrow) %v7151_v25, 8  ;;  %5383 = vxpose.xlu1.b32.cont [7/16] (narrow) %v7159_v5, 8  ;;  %v6601_v27 = vpop.f32.mrb[30].mxu1 }
 0x37a   : > { %v9229_v46 = vadd.f32 %v7039_v22, %v6601_v27  ;;  %v2766_v24 = vpop.f32.mrb[31].mxu1  ;;  %v4963_v56 = vpop.f32.mrb[33].mxu0 }
 0x37b   : > { %v7167_v26 = vadd.f32 %v4951_v31, %v2766_v24 }
 0x37d   : > { %v7045_v61 = vpop.f32.mrb[34].mxu0  ;;  %5360 = vxpose.xlu0.b32.end [16/16] (narrow) %v9227_v18, 8  ;;  %5384 = vxpose.xlu1.b32.cont [8/16] (narrow) %v7158_v36, 8  ;;  %v6604_v53 = vpop.f32.mrb[32].mxu1 }
 0x37e   : > { %v7168_v4 = vadd.f32 %v7042_v38, %v6604_v53  ;;  %v2780_v14 = vpop.f32.mrb[33].mxu1  ;;  %v4975_v23 = vpop.f32.mrb[35].mxu0 }
 0x37f   : > { %v7169_v33 = vadd.f32 %v4963_v56, %v2780_v14 }
 0x381   : > { %v7048_v45 = vpop.f32.mrb[36].mxu0  ;;  %5385 = vxpose.xlu1.b32.cont [9/16] (narrow) %v7161_v17, 8  ;;  %5409 = vxpose.xlu0.b32.start [1/16] (narrow) %v7169_v33, 8  ;;  %v6607_v57 = vpop.f32.mrb[34].mxu1 }
 0x382   : > { %v7170_v52 = vadd.f32 %v7045_v61, %v6607_v57  ;;  %v2794_v7 = vpop.f32.mrb[35].mxu1  ;;  %v4987_v50 = vpop.f32.mrb[37].mxu0 }
 0x383   : > { %v7171_v30 = vadd.f32 %v4975_v23, %v2794_v7 }
 0x385   : > { %v7051_v55 = vpop.f32.mrb[38].mxu0  ;;  %5386 = vxpose.xlu1.b32.cont [10/16] (narrow) %v7160_v42, 8  ;;  %5410 = vxpose.xlu0.b32.cont [2/16] (narrow) %v7168_v4, 8  ;;  %v6610_v25 = vpop.f32.mrb[36].mxu1 }
 0x386   : > { %v7172_v16 = vadd.f32 %v7048_v45, %v6610_v25  ;;  %v2808_v18 = vpop.f32.mrb[37].mxu1  ;;  %v4999_v15 = vpop.f32.mrb[39].mxu0 }
 0x387   : > { %v7173_v59 = vadd.f32 %v4987_v50, %v2808_v18 }
 0x389   : > { %v7054_v37 = vpop.f32.mrb[40].mxu0  ;;  %5387 = vxpose.xlu1.b32.cont [11/16] (narrow) %v7163_v43, 8  ;;  %5411 = vxpose.xlu0.b32.cont [3/16] (narrow) %v7171_v30, 8  ;;  %v6613_v32 = vpop.f32.mrb[38].mxu1 }
 0x38a   : > { %v7174_v0 = vadd.f32 %v7051_v55, %v6613_v32  ;;  %v2822_v10 = vpop.f32.mrb[39].mxu1  ;;  %v5011_v9 = vpop.f32.mrb[41].mxu0 }
 0x38b   : > { %v7175_v28 = vadd.f32 %v4999_v15, %v2822_v10 }
 0x38d   : > { %v7057_v29 = vpop.f32.mrb[42].mxu0  ;;  %5388 = vxpose.xlu1.b32.cont [12/16] (narrow) %v7162_v1, 8  ;;  %5412 = vxpose.xlu0.b32.cont [4/16] (narrow) %v7170_v52, 8  ;;  %v6616_v6 = vpop.f32.mrb[40].mxu1 }
 0x38e   : > { %v7176_v48 = vadd.f32 %v7054_v37, %v6616_v6  ;;  %v2836_v13 = vpop.f32.mrb[41].mxu1  ;;  %v5023_v2 = vpop.f32.mrb[43].mxu0 }
 0x38f   : > { %v7177_v44 = vadd.f32 %v5011_v9, %v2836_v13 }
 0x391   : > { %v7060_v51 = vpop.f32.mrb[44].mxu0  ;;  %5389 = vxpose.xlu1.b32.cont [13/16] (narrow) %v7165_v19, 8  ;;  %5413 = vxpose.xlu0.b32.cont [5/16] (narrow) %v7173_v59, 8  ;;  %v6619_v39 = vpop.f32.mrb[42].mxu1 }
 0x392   : > { %v7178_v20 = vadd.f32 %v7057_v29, %v6619_v39  ;;  %v2850_v34 = vpop.f32.mrb[43].mxu1  ;;  %v5035_v47 = vpop.f32.mrb[45].mxu0 }
 0x393   : > { %v7179_v36 = vadd.f32 %v5023_v2, %v2850_v34 }
 0x395   : > { %v7063_v58 = vpop.f32.mrb[46].mxu0  ;;  %5390 = vxpose.xlu1.b32.cont [14/16] (narrow) %v7164_v11, 8  ;;  %5414 = vxpose.xlu0.b32.cont [6/16] (narrow) %v7172_v16, 8  ;;  %v6622_v12 = vpop.f32.mrb[44].mxu1 }
 0x396   : > { %v7180_v5 = vadd.f32 %v7060_v51, %v6622_v12  ;;  %v2864_v8 = vpop.f32.mrb[45].mxu1  ;;  %v5047_v63 = vpop.f32.mrb[47].mxu0 }
 0x397   : > { %v7181_v42 = vadd.f32 %v5035_v47, %v2864_v8 }
 0x399   : > { %v7066_v41 = vpop.f32.mrb[48].mxu0  ;;  %5391 = vxpose.xlu1.b32.cont [15/16] (narrow) %v7167_v26, 8  ;;  %5415 = vxpose.xlu0.b32.cont [7/16] (narrow) %v7175_v28, 8  ;;  %v6625_v21 = vpop.f32.mrb[46].mxu1 }
 0x39a   : > { %v9232_v17 = vadd.f32 %v7063_v58, %v6625_v21  ;;  %v2878_v60 = vpop.f32.mrb[47].mxu1  ;;  %v5059_v62 = vpop.f32.mrb[49].mxu0 }
 0x39b   : > { %v7183_v1 = vadd.f32 %v5047_v63, %v2878_v60 }
 0x39d   : > { %v7069_v54 = vpop.f32.mrb[50].mxu0  ;;  %5392 = vxpose.xlu1.b32.end [16/16] (narrow) %v9229_v46, 8  ;;  %5416 = vxpose.xlu0.b32.cont [8/16] (narrow) %v7174_v0, 8  ;;  %v6628_v49 = vpop.f32.mrb[48].mxu1 }
 0x39e   : > { %v7184_v43 = vadd.f32 %v7066_v41, %v6628_v49  ;;  %v2892_v22 = vpop.f32.mrb[49].mxu1  ;;  %v5071_v40 = vpop.f32.mrb[51].mxu0 }
 0x39f   : > { %v7185_v11 = vadd.f32 %v5059_v62, %v2892_v22 }
 0x3a1   : > { %v7072_v35 = vpop.f32.mrb[52].mxu0  ;;  %5417 = vxpose.xlu0.b32.cont [9/16] (narrow) %v7177_v44, 8  ;;  %5441 = vxpose.xlu1.b32.start [1/16] (narrow) %v7185_v11, 8  ;;  %v6631_v31 = vpop.f32.mrb[50].mxu1 }
 0x3a2   : > { %v7186_v19 = vadd.f32 %v7069_v54, %v6631_v31  ;;  %v2906_v38 = vpop.f32.mrb[51].mxu1  ;;  %v5083_v27 = vpop.f32.mrb[53].mxu0 }
 0x3a3   : > { %v7187_v24 = vadd.f32 %v5071_v40, %v2906_v38 }
 0x3a5   : > { %v7075_v56 = vpop.f32.mrb[54].mxu0  ;;  %5418 = vxpose.xlu0.b32.cont [10/16] (narrow) %v7176_v48, 8  ;;  %5442 = vxpose.xlu1.b32.cont [2/16] (narrow) %v7184_v43, 8  ;;  %v6634_v26 = vpop.f32.mrb[52].mxu1 }
 0x3a6   : > { %v7188_v61 = vadd.f32 %v7072_v35, %v6634_v26  ;;  %v2920_v46 = vpop.f32.mrb[53].mxu1  ;;  %v5095_v53 = vpop.f32.mrb[55].mxu0 }
 0x3a7   : > { %v7189_v4 = vadd.f32 %v5083_v27, %v2920_v46 }
 0x3a9   : > { %v7078_v14 = vpop.f32.mrb[56].mxu0  ;;  %5419 = vxpose.xlu0.b32.cont [11/16] (narrow) %v7179_v36, 8  ;;  %5443 = vxpose.xlu1.b32.cont [3/16] (narrow) %v7187_v24, 8  ;;  %v6637_v23 = vpop.f32.mrb[54].mxu1 }
 0x3aa   : > { %v7190_v33 = vadd.f32 %v7075_v56, %v6637_v23  ;;  %v2934_v45 = vpop.f32.mrb[55].mxu1  ;;  %v5107_v57 = vpop.f32.mrb[57].mxu0 }
 0x3ab   : > { %v7191_v52 = vadd.f32 %v5095_v53, %v2934_v45 }
 0x3ad   : > { %v7081_v7 = vpop.f32.mrb[58].mxu0  ;;  %5420 = vxpose.xlu0.b32.cont [12/16] (narrow) %v7178_v20, 8  ;;  %5444 = vxpose.xlu1.b32.cont [4/16] (narrow) %v7186_v19, 8  ;;  %v6640_v50 = vpop.f32.mrb[56].mxu1 }
 0x3ae   : > { %v7192_v30 = vadd.f32 %v7078_v14, %v6640_v50  ;;  %v2948_v55 = vpop.f32.mrb[57].mxu1  ;;  %v5119_v25 = vpop.f32.mrb[59].mxu0 }
 0x3af   : > { %v7193_v16 = vadd.f32 %v5107_v57, %v2948_v55 }
 0x3b1   : > { %v7084_v18 = vpop.f32.mrb[60].mxu0  ;;  %5421 = vxpose.xlu0.b32.cont [13/16] (narrow) %v7181_v42, 8  ;;  %5445 = vxpose.xlu1.b32.cont [5/16] (narrow) %v7189_v4, 8  ;;  %v6643_v15 = vpop.f32.mrb[58].mxu1 }
 0x3b2   : > { %v7194_v59 = vadd.f32 %v7081_v7, %v6643_v15  ;;  %v2962_v37 = vpop.f32.mrb[59].mxu1  ;;  %v5131_v32 = vpop.f32.mrb[61].mxu0 }
 0x3b3   : > { %v7195_v0 = vadd.f32 %v5119_v25, %v2962_v37  ;;  %v9244_v37 = vpop.permute.xlu1 %5540 }
 0x3b5   : > { %v7087_v10 = vpop.f32.mrb[62].mxu0  ;;  %5422 = vxpose.xlu0.b32.cont [14/16] (narrow) %v7180_v5, 8  ;;  %5446 = vxpose.xlu1.b32.cont [6/16] (narrow) %v7188_v61, 8  ;;  %v6646_v9 = vpop.f32.mrb[60].mxu1 }
 0x3b6   : > { %v7196_v28 = vadd.f32 %v7084_v18, %v6646_v9  ;;  %v2976_v29 = vpop.f32.mrb[61].mxu1  ;;  %v5143_v6 = vpop.f32.mrb[63].mxu0 }
 0x3b7   : > { %v7197_v48 = vadd.f32 %v5131_v32, %v2976_v29 }
 0x3b9   : > { %v7090_v13 = vpop.f32.mrb[64].mxu0  ;;  %5423 = vxpose.xlu0.b32.cont [15/16] (narrow) %v7183_v1, 8  ;;  %5447 = vxpose.xlu1.b32.cont [7/16] (narrow) %v7191_v52, 8  ;;  %v6649_v2 = vpop.f32.mrb[62].mxu1 }
 0x3ba   : > { %v9235_v44 = vadd.f32 %v7087_v10, %v6649_v2  ;;  %v2990_v51 = vpop.f32.mrb[63].mxu1  ;;  %v5155_v39 = vpop.f32.mrb[65].mxu0 }
 0x3bb   : > { %v7199_v20 = vadd.f32 %v5143_v6, %v2990_v51 }
 0x3bd   : > { %v7093_v34 = vpop.f32.mrb[66].mxu0  ;;  %5424 = vxpose.xlu0.b32.end [16/16] (narrow) %v9232_v17, 8  ;;  %5448 = vxpose.xlu1.b32.cont [8/16] (narrow) %v7190_v33, 8  ;;  %v6652_v47 = vpop.f32.mrb[64].mxu1 }
 0x3be   : > { %v7200_v36 = vadd.f32 %v7090_v13, %v6652_v47  ;;  %v3004_v58 = vpop.f32.mrb[65].mxu1  ;;  %v5167_v12 = vpop.f32.mrb[67].mxu0 }
 0x3bf   : > { %v7201_v5 = vadd.f32 %v5155_v39, %v3004_v58 }
 0x3c1   : > { %v7096_v8 = vpop.f32.mrb[68].mxu0  ;;  %5449 = vxpose.xlu1.b32.cont [9/16] (narrow) %v7193_v16, 8  ;;  %5473 = vxpose.xlu0.b32.start [1/16] (narrow) %v7201_v5, 8  ;;  %v6655_v63 = vpop.f32.mrb[66].mxu1 }
 0x3c2   : > { %v5179_v42 = vpop.f32.mrb[69].mxu0  ;;  %v7202_v41 = vadd.f32 %v7093_v34, %v6655_v63  ;;  %v3018_v21 = vpop.f32.mrb[67].mxu1 }
 0x3c3   : > { %v7203_v60 = vadd.f32 %v5167_v12, %v3018_v21  ;;  %v5361_v29 = vpop.trf.xlu0 }
 0x3c4   : > { %v5543_v2 = vadd.f32 %v9244_v37, %v5361_v29 }
 0x3c5   : > { %v7099_v62 = vpop.f32.mrb[70].mxu0  ;;  %5450 = vxpose.xlu1.b32.cont [10/16] (narrow) %v7192_v30, 8  ;;  %5474 = vxpose.xlu0.b32.cont [2/16] (narrow) %v7200_v36, 8  ;;  %v6658_v1 = vpop.f32.mrb[68].mxu1 }
 0x3c6   : > { %v7204_v54 = vadd.f32 %v7096_v8, %v6658_v1  ;;  %v3032_v17 = vpop.f32.mrb[69].mxu1  ;;  %v5191_v49 = vpop.f32.mrb[71].mxu0 }
 0x3c7   : > { %v7205_v43 = vadd.f32 %v5179_v42, %v3032_v17 }
 0x3c9   : > { %v7102_v22 = vpop.f32.mrb[72].mxu0  ;;  %5451 = vxpose.xlu1.b32.cont [11/16] (narrow) %v7195_v0, 8  ;;  %5475 = vxpose.xlu0.b32.cont [3/16] (narrow) %v7203_v60, 8  ;;  %v6661_v40 = vpop.f32.mrb[70].mxu1 }
 0x3ca   : > { %v7206_v11 = vadd.f32 %v7099_v62, %v6661_v40  ;;  %v3046_v35 = vpop.f32.mrb[71].mxu1  ;;  %v5203_v31 = vpop.f32.mrb[73].mxu0 }
 0x3cb   : > { %v7207_v19 = vadd.f32 %v5191_v49, %v3046_v35 }
 0x3cd   : > { %v7105_v38 = vpop.f32.mrb[74].mxu0  ;;  %5452 = vxpose.xlu1.b32.cont [12/16] (narrow) %v7194_v59, 8  ;;  %5476 = vxpose.xlu0.b32.cont [4/16] (narrow) %v7202_v41, 8  ;;  %v6664_v27 = vpop.f32.mrb[72].mxu1 }
 0x3ce   : > { %v7208_v24 = vadd.f32 %v7102_v22, %v6664_v27  ;;  %v3060_v56 = vpop.f32.mrb[73].mxu1  ;;  %v5215_v26 = vpop.f32.mrb[75].mxu0 }
 0x3cf   : > { %v7209_v61 = vadd.f32 %v5203_v31, %v3060_v56 }
 0x3d1   : > { %v7108_v46 = vpop.f32.mrb[76].mxu0  ;;  %5453 = vxpose.xlu1.b32.cont [13/16] (narrow) %v7197_v48, 8  ;;  %5477 = vxpose.xlu0.b32.cont [5/16] (narrow) %v7205_v43, 8  ;;  %v6667_v53 = vpop.f32.mrb[74].mxu1 }
 0x3d2   : > { %v7210_v4 = vadd.f32 %v7105_v38, %v6667_v53  ;;  %v3074_v14 = vpop.f32.mrb[75].mxu1  ;;  %v5227_v23 = vpop.f32.mrb[77].mxu0 }
 0x3d3   : > { %v7211_v33 = vadd.f32 %v5215_v26, %v3074_v14 }
 0x3d5   : > { %v7111_v45 = vpop.f32.mrb[78].mxu0  ;;  %5454 = vxpose.xlu1.b32.cont [14/16] (narrow) %v7196_v28, 8  ;;  %5478 = vxpose.xlu0.b32.cont [6/16] (narrow) %v7204_v54, 8  ;;  %v6670_v57 = vpop.f32.mrb[76].mxu1 }
 0x3d6   : > { %v9238_v52 = vadd.f32 %v7108_v46, %v6670_v57  ;;  %v3088_v7 = vpop.f32.mrb[77].mxu1  ;;  %v5239_v50 = vpop.f32.mrb[79].mxu0 }
 0x3d7   : > { %v7213_v30 = vadd.f32 %v5227_v23, %v3088_v7 }
 0x3d9   : > { %v7114_v55 = vpop.f32.mrb[80].mxu0  ;;  %5455 = vxpose.xlu1.b32.cont [15/16] (narrow) %v7199_v20, 8  ;;  %5479 = vxpose.xlu0.b32.cont [7/16] (narrow) %v7207_v19, 8  ;;  %v6673_v25 = vpop.f32.mrb[78].mxu1 }
 0x3da   : > { %v9240_v16 = vadd.f32 %v7111_v45, %v6673_v25  ;;  %v3102_v18 = vpop.f32.mrb[79].mxu1  ;;  %v5251_v15 = vpop.f32.mrb[81].mxu0 }
 0x3db   : > { %v9242_v59 = vadd.f32 %v5239_v50, %v3102_v18 }
 0x3dd   : > { %v7117_v32 = vpop.f32.mrb[82].mxu0  ;;  %5456 = vxpose.xlu1.b32.end [16/16] (narrow) %v9235_v44, 8  ;;  %5480 = vxpose.xlu0.b32.cont [8/16] (narrow) %v7206_v11, 8  ;;  %v6676_v0 = vpop.f32.mrb[80].mxu1 }
 0x3de   : > { %v7216_v10 = vadd.f32 %v7114_v55, %v6676_v0  ;;  %v3116_v9 = vpop.f32.mrb[81].mxu1  ;;  %v5263_v28 = vpop.f32.mrb[83].mxu0 }
 0x3df   : > { %v7217_v6 = vadd.f32 %v5251_v15, %v3116_v9 }
 0x3e1   : > { %v7120_v48 = vpop.f32.mrb[84].mxu0  ;;  %v5393_v13 = vpop.trf.xlu1  ;;  %5481 = vxpose.xlu0.b32.cont [9/16] (narrow) %v7209_v61, 8  ;;  %5505 = vxpose.xlu1.b32.start [1/16] (narrow) %v7217_v6, 8 }
 0x3e2   : > { %v5544_v51 = vadd.f32 %v9244_v37, %v5393_v13  ;;  %v6679_v39 = vpop.f32.mrb[82].mxu1  ;;  %v5275_v20 = vpop.f32.mrb[85].mxu0 }
 0x3e3   : > { %v7218_v44 = vadd.f32 %v7117_v32, %v6679_v39  ;;  %v3130_v34 = vpop.f32.mrb[83].mxu1 }
 0x3e4   : > { %v5553_v47 = vcombine.low %v5543_v2, %v5544_v51  ;;  %v7219_v36 = vadd.f32 %v5263_v28, %v3130_v34 }
 0x3e5   : > { %v7123_v58 = vpop.f32.mrb[86].mxu0  ;;  %5482 = vxpose.xlu0.b32.cont [10/16] (narrow) %v7208_v24, 8  ;;  %5506 = vxpose.xlu1.b32.cont [2/16] (narrow) %v7216_v10, 8  ;;  %v6682_v12 = vpop.f32.mrb[84].mxu1 }
 0x3e6   : > { %5557 = vst [vmem:[%s9251_s9] sm:$0x77] %v5553_v47  ;;  %v7220_v5 = vadd.f32 %v7120_v48, %v6682_v12  ;;  %v3144_v8 = vpop.f32.mrb[85].mxu1  ;;  %v5287_v63 = vpop.f32.mrb[87].mxu0 }
 0x3e7   : > { %v7221_v42 = vadd.f32 %v5275_v20, %v3144_v8 }
 0x3e9   : > { %v7126_v41 = vpop.f32.mrb[88].mxu0  ;;  %5483 = vxpose.xlu0.b32.cont [11/16] (narrow) %v7211_v33, 8  ;;  %5507 = vxpose.xlu1.b32.cont [3/16] (narrow) %v7219_v36, 8  ;;  %v6685_v21 = vpop.f32.mrb[86].mxu1 }
 0x3ea   : > { %v7222_v60 = vadd.f32 %v7123_v58, %v6685_v21  ;;  %v3158_v62 = vpop.f32.mrb[87].mxu1  ;;  %v5299_v1 = vpop.f32.mrb[89].mxu0 }
 0x3eb   : > { %v7223_v54 = vadd.f32 %v5287_v63, %v3158_v62 }
 0x3ed   : > { %v7129_v17 = vpop.f32.mrb[90].mxu0  ;;  %5484 = vxpose.xlu0.b32.cont [12/16] (narrow) %v7210_v4, 8  ;;  %5508 = vxpose.xlu1.b32.cont [4/16] (narrow) %v7218_v44, 8  ;;  %v6688_v49 = vpop.f32.mrb[88].mxu1 }
 0x3ee   : > { %v7224_v43 = vadd.f32 %v7126_v41, %v6688_v49  ;;  %v3172_v22 = vpop.f32.mrb[89].mxu1  ;;  %v5311_v40 = vpop.f32.mrb[91].mxu0 }
 0x3ef   : > { %v7225_v11 = vadd.f32 %v5299_v1, %v3172_v22 }
 0x3f1   : > { %v7132_v35 = vpop.f32.mrb[92].mxu0  ;;  %5485 = vxpose.xlu0.b32.cont [13/16] (narrow) %v7213_v30, 8  ;;  %5509 = vxpose.xlu1.b32.cont [5/16] (narrow) %v7221_v42, 8  ;;  %v6691_v31 = vpop.f32.mrb[90].mxu1 }
 0x3f2   : > { %v7226_v19 = vadd.f32 %v7129_v17, %v6691_v31  ;;  %v3186_v38 = vpop.f32.mrb[91].mxu1  ;;  %v5323_v27 = vpop.f32.mrb[93].mxu0 }
 0x3f3   : > { %v7227_v24 = vadd.f32 %v5311_v40, %v3186_v38 }
 0x3f5   : > { %v7135_v56 = vpop.f32.mrb[94].mxu0  ;;  %5486 = vxpose.xlu0.b32.cont [14/16] (narrow) %v9238_v52, 8  ;;  %5510 = vxpose.xlu1.b32.cont [6/16] (narrow) %v7220_v5, 8  ;;  %v6694_v26 = vpop.f32.mrb[92].mxu1 }
 0x3f6   : > { %v7228_v61 = vadd.f32 %v7132_v35, %v6694_v26  ;;  %v3200_v46 = vpop.f32.mrb[93].mxu1  ;;  %v5335_v53 = vpop.f32.mrb[95].mxu0 }
 0x3f7   : > { %v7229_v4 = vadd.f32 %v5323_v27, %v3200_v46 }
 0x3f9   : > { %5487 = vxpose.xlu0.b32.cont [15/16] (narrow) %v9242_v59, 8  ;;  %5511 = vxpose.xlu1.b32.cont [7/16] (narrow) %v7223_v54, 8  ;;  %v6697_v14 = vpop.f32.mrb[94].mxu1 }
 0x3fa   : > { %v7230_v23 = vadd.f32 %v7135_v56, %v6697_v14  ;;  %v3214_v33 = vpop.f32.mrb[95].mxu1 }
 0x3fb   : > { %v7231_v45 = vadd.f32 %v5335_v53, %v3214_v33 }
 0x3fd   : > { %5488 = vxpose.xlu0.b32.end [16/16] (narrow) %v9240_v16, 8  ;;  %5512 = vxpose.xlu1.b32.cont [8/16] (narrow) %v7222_v60, 8 }
 0x401   : > { %v5425_v57 = vpop.trf.xlu0  ;;  %5513 = vxpose.xlu1.b32.cont [9/16] (narrow) %v7225_v11, 8 }
 0x402   : > { %v5545_v52 = vadd.f32 %v9244_v37, %v5425_v57 }
 0x404   : > { %5558 = vst [vmem:[%s9251_s9 + $0x8] sm:$0x7] %v5545_v52 }
 0x405   : > { %5514 = vxpose.xlu1.b32.cont [10/16] (narrow) %v7224_v43, 8 }
 0x409   : > { %5515 = vxpose.xlu1.b32.cont [11/16] (narrow) %v7227_v24, 8 }
 0x40b   : > { %v5670_v59 = vld [vmem:[%s9251_s9 + $0x8] sm:$0xf] (%p7722_p5) }
 0x40c   : > { %5671 = vst [vmem:[%s5570_s17 + $0x8] sm:$0xf] (%p7722_p5), %v5670_v59 }
 0x40d   : > { %5516 = vxpose.xlu1.b32.cont [12/16] (narrow) %v7226_v19, 8 }
 0x411   : > { %5517 = vxpose.xlu1.b32.cont [13/16] (narrow) %v7229_v4, 8 }
 0x415   : > { %5518 = vxpose.xlu1.b32.cont [14/16] (narrow) %v7228_v61, 8 }
 0x419   : > { %5519 = vxpose.xlu1.b32.cont [15/16] (narrow) %v7231_v45, 8 }
 0x41d   : > { %5520 = vxpose.xlu1.b32.end [16/16] (narrow) %v7230_v23, 8 }
 0x421   : > { %v5457_v7 = vpop.trf.xlu1 }
 0x422   : > { %v5546_v30 = vadd.f32 %v9244_v37, %v5457_v7 }
 0x426   : > { %7646 = vset.pattern.permute.xlu0 %v7671_v3  ;;  %v5585_v3 = vld [vmem:[%s9251_s9] sm:$0xff] (%p7722_p5) }
 0x427   : > { %5586 = vst [vmem:[%s5570_s17] sm:$0xff] (%p7722_p5), %v5585_v3 }
 0x441   : > { %v5489_v50 = vpop.trf.xlu0 }
 0x442   : > { %v5547_v55 = vadd.f32 %v9244_v37, %v5489_v50 }
 0x444   : > { %v5554_v25 = vcombine.low %v5546_v30, %v5547_v55 }
 0x446   : > { %5559 = vst [vmem:[%s9251_s9 + $0xc] sm:$0x77] %v5554_v25 }
 0x44d   : > { %v5587_v15 = vld [vmem:[%s9251_s9 + $0xc] sm:$0xff] (%p7722_p5) }
 0x44e   : > { %5588 = vst [vmem:[%s5570_s17 + $0x18] sm:$0xff] (%p7722_p5), %v5587_v15 }
 0x45e   : > { %5567 = sbr.rel (!%p7722_p5) target bundleno = 1133 (0x46d), region = 59 }
 0x461   : > { %v5521_v16 = vpop.trf.xlu1 }
 0x462   : > { %v5548_v18 = vadd.f32 %v9244_v37, %v5521_v16 }
 0x464   : > { %5560 = vst [vmem:[%s9251_s9 + $0x14] sm:$0x7] %v5548_v18 }
 0x46b   : > { %v5672_v32 = vld [vmem:[%s9251_s9 + $0x14] sm:$0xf] }
 0x46c   : > { %5673 = vst [vmem:[%s5570_s17 + $0x20] sm:$0xf] %v5672_v32 }
 0x46d PF: > { %p10_p10 = scmp.ge.s32.totalorder %s7709_s16, 4   ;;  %s9886_s12 = smov %s7665_s13 }
 0x46e   : > { %s9887_s13 = smov %s7720_s19  ;;  %s9888_s14 = smov %s7709_s16 }
 0x46f   :  { %12 = sbr.rel (!%p10_p10) target bundleno = 2 (0x2), region = 122 }

</bundles_post_ra>
